<compile_context>
chip_gen: v6e
topology: v6e:2x2x1
jax: 0.10.0
libtpu: 0.0.40
codegen_flags: <defaults>
</compile_context>

<pallas_src>
import functools

import jax
import jax.numpy as jnp
from jax.experimental import pallas as pl
from jax.experimental.pallas import tpu as pltpu

EPS = 1e-5
LANE = 128  # TPU lane width; every channel axis is zero-padded to a multiple of this.


def _ceil_to(n, m):
    return ((n + m - 1) // m) * m


def _row_tile(m, target=256):
    """Largest row tile <= target dividing m; keep >=2 grid steps (v7x has 2 TCs)."""
    if m <= 16:
        return m
    t = min(target, m)
    while t > 8 and m % t:
        t -= 8
    if t == m and (m // 2) % 8 == 0:
        t = m // 2
    return t


# ------------------------------ Pallas kernels ------------------------------

def _mm_bn_stats_kernel(x_ref, scale_ref, shift_ref, w_ref,
                        y_ref, ssum_ref, ssq_ref, *, fuse_bn_relu):
    """y = [relu(x*scale+shift)] @ w  (f32 acc) + per-tile channel sum/sum-sq of y."""
    if fuse_bn_relu:
        a = x_ref[...].astype(jnp.float32)
        a = jnp.maximum(a * scale_ref[...] + shift_ref[...], 0.0)   # BN affine + ReLU (f32)
        a = a.astype(w_ref.dtype)                                   # MXU operand dtype
    else:
        a = x_ref[...]
    acc = jnp.dot(a, w_ref[...], preferred_element_type=jnp.float32)
    y_ref[...] = acc.astype(y_ref.dtype)
    # BN batch statistics from the f32 accumulator (no extra HBM pass).
    ssum_ref[...] = jnp.sum(acc, axis=0, keepdims=True).reshape(1, 1, -1)
    ssq_ref[...] = jnp.sum(acc * acc, axis=0, keepdims=True).reshape(1, 1, -1)


def matmul_bn_stats(x, w, scale=None, shift=None):
    """1x1 conv as a channels-last matmul with fused (optional) BN prologue and
    fused BN-stats epilogue.  Returns (y, per-tile sums, per-tile sums of squares)."""
    M, K = x.shape
    Np = w.shape[1]
    fuse = scale is not None
    if not fuse:
        scale = jnp.ones((1, K), jnp.float32)
        shift = jnp.zeros((1, K), jnp.float32)
    tm = _row_tile(M)
    G = M // tm
    kern = functools.partial(_mm_bn_stats_kernel, fuse_bn_relu=fuse)
    return pl.pallas_call(
        kern,
        out_shape=(jax.ShapeDtypeStruct((M, Np), x.dtype),
                   jax.ShapeDtypeStruct((G, 1, Np), jnp.float32),
                   jax.ShapeDtypeStruct((G, 1, Np), jnp.float32)),
        grid=(G,),
        in_specs=[pl.BlockSpec((tm, K), lambda i: (i, 0)),
                  pl.BlockSpec((1, K), lambda i: (0, 0)),
                  pl.BlockSpec((1, K), lambda i: (0, 0)),
                  pl.BlockSpec((K, Np), lambda i: (0, 0))],
        out_specs=(pl.BlockSpec((tm, Np), lambda i: (i, 0)),
                   pl.BlockSpec((1, 1, Np), lambda i: (i, 0, 0)),
                   pl.BlockSpec((1, 1, Np), lambda i: (i, 0, 0))),
        compiler_params=pltpu.CompilerParams(dimension_semantics=("parallel",)),
        cost_estimate=pl.CostEstimate(flops=2 * M * K * Np, transcendentals=0,
                                      bytes_accessed=2 * (M * K + K * Np + M * Np)),
    )(x, scale, shift, w)


def _conv3x3_bn_stats_kernel(x_ref, mask_ref, scale_ref, shift_ref, w_ref,
                             y_ref, ssum_ref, ssq_ref, *, stride, Ho, Wo):
    """Per image: bn1 affine+ReLU prologue, 3x3 conv as 9 accumulated MXU taps
    over contiguous in-VMEM slices, bn2 per-image stats epilogue."""
    CP = x_ref.shape[-1]
    scale = scale_ref[...].reshape(1, 1, 1, CP)
    shift = shift_ref[...].reshape(1, 1, 1, CP)
    a = x_ref[...].astype(jnp.float32)                  # (P, hp, wp, CP)
    a = jnp.maximum(a * scale + shift, 0.0)             # BN affine + ReLU (f32)
    a = a * mask_ref[...]                               # zero the spatial padding ring
    a = a.astype(w_ref.dtype)
    acc = jnp.zeros((Ho * Wo, CP), jnp.float32)
    for ky in range(3):
        for kx in range(3):
            if stride == 2:
                p, oy, ox = 2 * (ky % 2) + (kx % 2), ky // 2, kx // 2
            else:
                p, oy, ox = 0, ky, kx
            tap = a[p, oy:oy + Ho, ox:ox + Wo, :].reshape(Ho * Wo, CP)
            acc = acc + jnp.dot(tap, w_ref[3 * ky + kx],
                                preferred_element_type=jnp.float32)
    y_ref[...] = acc.astype(y_ref.dtype)
    ssum_ref[...] = jnp.sum(acc, axis=0, keepdims=True).reshape(1, 1, -1)
    ssq_ref[...] = jnp.sum(acc * acc, axis=0, keepdims=True).reshape(1, 1, -1)


def _pad_mask(P, hp, wp, CP, stride, H, W):
    """1.0 where a plane position maps to a real pixel, 0.0 on the padding ring."""
    iy = jnp.arange(hp).reshape(1, hp, 1)
    ix = jnp.arange(wp).reshape(1, 1, wp)
    if stride == 2:
        py = (jnp.arange(P) // 2).reshape(P, 1, 1)
        px = (jnp.arange(P) % 2).reshape(P, 1, 1)
        r, c = 2 * iy + py, 2 * ix + px
    else:
        r = jnp.broadcast_to(iy, (P, hp, wp))
        c = jnp.broadcast_to(ix, (P, hp, wp))
    valid = (r >= 1) & (r <= H) & (c >= 1) & (c <= W)
    valid = jnp.broadcast_to(valid.reshape(P, hp, wp, 1), (P, hp, wp, CP))
    return valid.astype(jnp.float32)


def conv3x3_bn_stats(y2d, scale, shift, w_taps, N, H, W, CP, stride):
    """3x3 conv (stride s, pad 1) on the raw conv1 output, with bn1 affine+ReLU
    fused as the in-kernel prologue and bn2 batch-stats fused as the epilogue."""
    Ho, Wo = H // stride, W // stride
    ypad = jnp.pad(y2d.reshape(N, H, W, CP), ((0, 0), (1, 1), (1, 1), (0, 0)))
    if stride == 2:
        # Split the padded image into 2x2 parity planes so every tap of the
        # strided conv becomes a contiguous (non-strided) in-kernel slice.
        P, hp, wp = 4, (H + 2) // 2, (W + 2) // 2
        planes = ypad.reshape(N, hp, 2, wp, 2, CP).transpose(0, 2, 4, 1, 3, 5)
        planes = planes.reshape(N * P, hp, wp, CP)
    else:
        P, hp, wp = 1, H + 2, W + 2
        planes = ypad
    mask = _pad_mask(P, hp, wp, CP, stride, H, W)

    Mo = N * Ho * Wo
    kern = functools.partial(_conv3x3_bn_stats_kernel, stride=stride, Ho=Ho, Wo=Wo)
    return pl.pallas_call(
        kern,
        out_shape=(jax.ShapeDtypeStruct((Mo, CP), y2d.dtype),
                   jax.ShapeDtypeStruct((N, 1, CP), jnp.float32),
                   jax.ShapeDtypeStruct((N, 1, CP), jnp.float32)),
        grid=(N,),
        in_specs=[pl.BlockSpec((P, hp, wp, CP), lambda n: (n, 0, 0, 0)),
                  pl.BlockSpec((P, hp, wp, CP), lambda n: (0, 0, 0, 0)),
                  pl.BlockSpec((1, CP), lambda n: (0, 0)),
                  pl.BlockSpec((1, CP), lambda n: (0, 0)),
                  pl.BlockSpec((9, CP, CP), lambda n: (0, 0, 0))],
        out_specs=(pl.BlockSpec((Ho * Wo, CP), lambda n: (n, 0)),
                   pl.BlockSpec((1, 1, CP), lambda n: (n, 0, 0)),
                   pl.BlockSpec((1, 1, CP), lambda n: (n, 0, 0))),
        compiler_params=pltpu.CompilerParams(dimension_semantics=("parallel",)),
        cost_estimate=pl.CostEstimate(
            flops=2 * Mo * 9 * CP * CP, transcendentals=0,
            bytes_accessed=2 * (N * P * hp * wp * CP + 9 * CP * CP + Mo * CP)),
    )(planes, mask, scale, shift, w_taps)


def _bn_add_relu_kernel(y_ref, sc_ref, ms_ref, mb_ref, ss_ref, sb_ref, o_ref):
    main = jnp.maximum(y_ref[...].astype(jnp.float32) * ms_ref[...] + mb_ref[...], 0.0)
    short = sc_ref[...].astype(jnp.float32) * ss_ref[...] + sb_ref[...]
    o_ref[...] = jnp.maximum(main + short, 0.0)


def bn_add_relu(y, m_scale, m_shift, sc, s_scale, s_shift):
    """relu( relu(bn3(main)) + bn(shortcut) ) in a single pass."""
    M, C = y.shape
    tm = _row_tile(M)
    return pl.pallas_call(
        _bn_add_relu_kernel,
        out_shape=jax.ShapeDtypeStruct((M, C), jnp.float32),
        grid=(M // tm,),
        in_specs=[pl.BlockSpec((tm, C), lambda i: (i, 0)),
                  pl.BlockSpec((tm, C), lambda i: (i, 0)),
                  pl.BlockSpec((1, C), lambda i: (0, 0)),
                  pl.BlockSpec((1, C), lambda i: (0, 0)),
                  pl.BlockSpec((1, C), lambda i: (0, 0)),
                  pl.BlockSpec((1, C), lambda i: (0, 0))],
        out_specs=pl.BlockSpec((tm, C), lambda i: (i, 0)),
        compiler_params=pltpu.CompilerParams(dimension_semantics=("parallel",)),
    )(y, sc, m_scale, m_shift, s_scale, s_shift)


# ------------------------------- glue (JAX) ---------------------------------

def bn_scale_shift(psum, psq, count, gamma, beta):
    """Fold training-mode BatchNorm into per-channel (scale, shift), f32."""
    mean = jnp.sum(psum, axis=0) / count                       # (1, C)
    # E[x^2]-E[x]^2 is fine at these sizes; use a two-pass/Welford form at scale.
    var = jnp.maximum(jnp.sum(psq, axis=0) / count - mean * mean, 0.0)
    scale = gamma[None, :] / jnp.sqrt(var + EPS)
    shift = beta[None, :] - mean * scale
    return scale, shift


@functools.partial(jax.jit, static_argnums=(2, 3, 4, 5))
def res_bottleneck_block(x_nchw, p, in_channels, out_channels, downsample,
                         compute_dtype=jnp.bfloat16):
    N, Cin, H, W = x_nchw.shape
    stride = 2 if downsample else 1
    Ho, Wo = H // stride, W // stride
    cmid = out_channels // 4
    CPi, CPm, CPo = (_ceil_to(c, LANE) for c in (Cin, cmid, out_channels))
    cdt = compute_dtype

    x = jnp.transpose(x_nchw, (0, 2, 3, 1)).astype(jnp.float32)          # NHWC
    x_p = jnp.pad(x, ((0, 0), (0, 0), (0, 0), (0, CPi - Cin))).astype(cdt)
    x2d = x_p.reshape(N * H * W, CPi)

    w1 = p["w1"].astype(cdt)
    w2 = p["w2"].astype(cdt)
    w3 = p["w3"].astype(cdt)

    # conv1 (1x1) + bn1 batch stats, one kernel
    y1, s1, q1 = matmul_bn_stats(x2d, w1)
    sc1, sh1 = bn_scale_shift(s1, q1, N * H * W, p["g1"], p["be1"])

    # shortcut branch
    if downsample or in_channels != out_channels:
        # stride-s sampling: tiny XLA slice at these sizes; for production-size
        # inputs fold it into the kernel's index_map / parity-plane layout.
        xs2d = x_p[:, ::stride, ::stride, :].reshape(N * Ho * Wo, CPi)
        ysc, ss_, qs_ = matmul_bn_stats(xs2d, p["ws"].astype(cdt))
        scs, shs = bn_scale_shift(ss_, qs_, N * Ho * Wo, p["gs"], p["bes"])
    else:
        ysc = x2d                                # identity shortcut (CPi == CPo here)
        scs = jnp.ones((1, CPo), jnp.float32)
        shs = jnp.zeros((1, CPo), jnp.float32)

    # bn1 affine+ReLU -> 3x3 conv (stride s) -> bn2 stats, one kernel
    y2, s2, q2 = conv3x3_bn_stats(y1, sc1, sh1, w2, N, H, W, CPm, stride)
    sc2, sh2 = bn_scale_shift(s2, q2, N * Ho * Wo, p["g2"], p["be2"])

    # bn2 affine+ReLU -> conv3 (1x1) -> bn3 stats, one kernel
    y3, s3, q3 = matmul_bn_stats(y2, w3, scale=sc2, shift=sh2)
    sc3, sh3 = bn_scale_shift(s3, q3, N * Ho * Wo, p["g3"], p["be3"])

    # relu(bn3(main)) + bn(shortcut) -> relu, one kernel
    out2d = bn_add_relu(y3, sc3, sh3, ysc, scs, shs)             # [N*Ho*Wo, CPo] f32
    out = out2d[:, :out_channels].reshape(N, Ho, Wo, out_channels)
    return jnp.transpose(out, (0, 3, 1, 2))                      # back to NCHW


# --------------------------- parameters & reference -------------------------

def _pad2(w, K, N):
    k, n = w.shape
    return jnp.pad(w, ((0, K - k), (0, N - n)))


def make_params(key, in_channels, out_channels):
    cmid = out_channels // 4
    CPi, CPm, CPo = (_ceil_to(c, LANE) for c in (in_channels, cmid, out_channels))
    ks = jax.random.split(key, 8)
    w1 = 0.1 * jax.random.normal(ks[0], (cmid, in_channels, 1, 1), jnp.float32)
    w2 = 0.1 * jax.random.normal(ks[1], (cmid, cmid, 3, 3), jnp.float32)
    w3 = 0.1 * jax.random.normal(ks[2], (out_channels, cmid, 1, 1), jnp.float32)
    ws = 0.1 * jax.random.normal(ks[3], (out_channels, in_channels, 1, 1), jnp.float32)
    b1 = 0.1 * jax.random.normal(ks[4], (cmid,), jnp.float32)
    b2 = 0.1 * jax.random.normal(ks[5], (cmid,), jnp.float32)
    b3 = 0.1 * jax.random.normal(ks[6], (out_channels,), jnp.float32)
    bs = 0.1 * jax.random.normal(ks[7], (out_channels,), jnp.float32)

    # 3x3 conv as 9 [Cin,Cout] taps, tap index t = 3*ky + kx, lane-padded.
    w2_taps = jnp.stack([_pad2(w2[:, :, ky, kx].T, CPm, CPm)
                         for ky in range(3) for kx in range(3)])

    def padded_gb(c, cp):
        return (jnp.pad(jnp.ones((c,), jnp.float32), (0, cp - c), constant_values=1.0),
                jnp.zeros((cp,), jnp.float32))

    g1, be1 = padded_gb(cmid, CPm)
    g2, be2 = padded_gb(cmid, CPm)
    g3, be3 = padded_gb(out_channels, CPo)
    gs, bes = padded_gb(out_channels, CPo)

    return {
        # Kernel weights: channels-last matmul form, zero-padded to the 128-lane
        # width.  Conv biases are dropped in the kernel path: each conv feeds a
        # training-mode BatchNorm, which cancels per-channel biases exactly.
        "w1": _pad2(w1[:, :, 0, 0].T, CPi, CPm),
        "w2": w2_taps,
        "w3": _pad2(w3[:, :, 0, 0].T, CPm, CPo),
        "ws": _pad2(ws[:, :, 0, 0].T, CPi, CPo),
        "g1": g1, "be1": be1, "g2": g2, "be2": be2,
        "g3": g3, "be3": be3, "gs": gs, "bes": bes,
        # f32 OIHW weights + biases for the lax reference (PyTorch semantics).
        "w1_oihw": w1, "w2_oihw": w2, "w3_oihw": w3, "ws_oihw": ws,
        "b1": b1, "b2": b2, "b3": b3, "bs": bs,
    }


def reference(x, p, in_channels, out_channels, downsample):
    """Pure f32 lax reference matching the PyTorch module (training-mode BN, with biases)."""
    cmid = out_channels // 4

    def conv(x, w, b, stride, pad):
        y = jax.lax.conv_general_dilated(
            x, w, (stride, stride), [(pad, pad), (pad, pad)],
            dimension_numbers=("NCHW", "OIHW", "NCHW"))
        return y + b[None, :, None, None]

    def bn(x, g, bb):
        m = jnp.mean(x, axis=(0, 2, 3), keepdims=True)
        v = jnp.var(x, axis=(0, 2, 3), keepdims=True)
        return (x - m) / jnp.sqrt(v + EPS) * g[None, :, None, None] + bb[None, :, None, None]

    relu = lambda t: jnp.maximum(t, 0.0)
    s = 2 if downsample else 1
    if downsample or in_channels != out_channels:
        sc = bn(conv(x, p["ws_oihw"], p["bs"], s, 0),
                p["gs"][:out_channels], p["bes"][:out_channels])
    else:
        sc = x
    h = relu(bn(conv(x, p["w1_oihw"], p["b1"], 1, 0), p["g1"][:cmid], p["be1"][:cmid]))
    h = relu(bn(conv(h, p["w2_oihw"], p["b2"], s, 1), p["g2"][:cmid], p["be2"][:cmid]))
    h = relu(bn(conv(h, p["w3_oihw"], p["b3"], 1, 0),
                p["g3"][:out_channels], p["be3"][:out_channels]))
    return relu(h + sc)


# ----------------------------------- main ------------------------------------

if __name__ == "__main__":
    key = jax.random.PRNGKey(0)
    configs = [
        (4, 16, True),    # projection shortcut, stride-2 3x3 conv
        (16, 16, False),  # identity shortcut, stride-1 3x3 conv
    ]
    for idx, (cin, cout, down) in enumerate(configs):
        kx, kp = jax.random.split(jax.random.fold_in(key, idx))
        x = jax.random.normal(kx, (2, cin, 16, 16), jnp.float32)
        params = make_params(kp, cin, cout)
        ref = reference(x, params, cin, cout, down)
        s = 2 if down else 1

        # f32 compute mode: tight structural check against the PyTorch-semantics reference.
        out_f32 = jax.block_until_ready(
            res_bottleneck_block(x, params, cin, cout, down, jnp.float32))
        assert out_f32.shape == ref.shape == (2, cout, 16 // s, 16 // s), out_f32.shape
        err32 = float(jnp.max(jnp.abs(out_f32 - ref)))
        assert err32 < 2e-3, f"f32 path mismatch: {err32}"

        # bf16 MXU mode (the performance configuration).  With Cmid=4 channels the
        # bf16 operand rounding leaves ~1e-2-level differences vs the f32 reference;
        # the f32 run above is the tight correctness check.
        out_bf16 = jax.block_until_ready(
            res_bottleneck_block(x, params, cin, cout, down, jnp.bfloat16))
        errbf = float(jnp.max(jnp.abs(out_bf16 - ref)))
        assert errbf < 1.5e-1, f"bf16 path mismatch: {errbf}"

    print("KERNEL_OK")
</pallas_src>

<mosaic_0001>
module attributes {stable_mosaic.version = 11 : i64} {
  func.func @_mm_bn_stats_kernel(%arg0: i32, %arg1: memref<256x128xf32, #tpu.memory_space<vmem>>, %arg2: memref<1x128xf32, #tpu.memory_space<vmem>>, %arg3: memref<1x128xf32, #tpu.memory_space<vmem>>, %arg4: memref<128x128xf32, #tpu.memory_space<vmem>>, %arg5: memref<256x128xf32, #tpu.memory_space<vmem>>, %arg6: memref<1x1x128xf32, #tpu.memory_space<vmem>>, %arg7: memref<1x1x128xf32, #tpu.memory_space<vmem>>) attributes {dimension_semantics = [#tpu.dimension_semantics<parallel>], iteration_bounds = array<i64: 2>, scalar_prefetch = 0 : i64, scratch_operands = 0 : i64, tpu.core_type = #tpu.core_type<tc>, window_params = [{transform_indices = @transform_0, window_bounds = array<i64: 256, 128>}, {pipeline_mode = #tpu.pipeline_mode<synchronous>, transform_indices = @transform_1, window_bounds = array<i64: 1, 128>}, {pipeline_mode = #tpu.pipeline_mode<synchronous>, transform_indices = @transform_2, window_bounds = array<i64: 1, 128>}, {pipeline_mode = #tpu.pipeline_mode<synchronous>, transform_indices = @transform_3, window_bounds = array<i64: 128, 128>}, {transform_indices = @transform_4, window_bounds = array<i64: 256, 128>}, {transform_indices = @transform_5, window_bounds = array<i64: 1, 1, 128>}, {transform_indices = @transform_6, window_bounds = array<i64: 1, 1, 128>}]} {
    %c0 = arith.constant 0 : index
    %c0_0 = arith.constant 0 : index
    %0 = vector.load %arg1[%c0, %c0_0] : memref<256x128xf32, #tpu.memory_space<vmem>>, vector<256x128xf32>
    %c0_1 = arith.constant 0 : index
    %c0_2 = arith.constant 0 : index
    %1 = vector.load %arg4[%c0_1, %c0_2] : memref<128x128xf32, #tpu.memory_space<vmem>>, vector<128x128xf32>
    %cst = arith.constant dense<0.000000e+00> : vector<256x128xf32>
    %2 = tpu.matmul %0, %1, %cst {dimension_numbers = #tpu.dot_dimension_numbers<[1], [0], [0], [1], [0, 0, 1, 1], [], []>} : vector<256x128xf32>, vector<128x128xf32>, vector<256x128xf32> -> vector<256x128xf32>
    %c0_3 = arith.constant 0 : index
    %c0_4 = arith.constant 0 : index
    %3 = vector.load %arg5[%c0_3, %c0_4] : memref<256x128xf32, #tpu.memory_space<vmem>>, vector<256x128xf32>
    tpu.vector_store %arg5[%c0_3, %c0_4], %2 {strides = array<i32>} : memref<256x128xf32, #tpu.memory_space<vmem>>, vector<256x128xf32>,
    %cst_5 = arith.constant dense<0.000000e+00> : vector<128xf32>
    %4 = vector.multi_reduction <add>, %2, %cst_5 [0] : vector<256x128xf32> to vector<128xf32>
    %5 = vector.shape_cast %4 : vector<128xf32> to vector<1x128xf32>
    %6 = vector.shape_cast %5 : vector<1x128xf32> to vector<1x1x128xf32>
    %c0_6 = arith.constant 0 : index
    %c0_7 = arith.constant 0 : index
    %c0_8 = arith.constant 0 : index
    %7 = vector.load %arg6[%c0_6, %c0_7, %c0_8] : memref<1x1x128xf32, #tpu.memory_space<vmem>>, vector<1x1x128xf32>
    tpu.vector_store %arg6[%c0_6, %c0_7, %c0_8], %6 {strides = array<i32>} : memref<1x1x128xf32, #tpu.memory_space<vmem>>, vector<1x1x128xf32>,
    %8 = arith.mulf %2, %2 : vector<256x128xf32>
    %cst_9 = arith.constant dense<0.000000e+00> : vector<128xf32>
    %9 = vector.multi_reduction <add>, %8, %cst_9 [0] : vector<256x128xf32> to vector<128xf32>
    %10 = vector.shape_cast %9 : vector<128xf32> to vector<1x128xf32>
    %11 = vector.shape_cast %10 : vector<1x128xf32> to vector<1x1x128xf32>
    %c0_10 = arith.constant 0 : index
    %c0_11 = arith.constant 0 : index
    %c0_12 = arith.constant 0 : index
    %12 = vector.load %arg7[%c0_10, %c0_11, %c0_12] : memref<1x1x128xf32, #tpu.memory_space<vmem>>, vector<1x1x128xf32>
    tpu.vector_store %arg7[%c0_10, %c0_11, %c0_12], %11 {strides = array<i32>} : memref<1x1x128xf32, #tpu.memory_space<vmem>>, vector<1x1x128xf32>,
    return
  }
  func.func @transform_0(%arg0: i32) -> (i32, i32) {
    %c0_i32 = arith.constant 0 : i32
    %c0_i32_0 = arith.constant 0 : i32
    return %arg0, %c0_i32 : i32, i32
  }
  func.func @transform_1(%arg0: i32) -> (i32, i32) {
    %c0_i32 = arith.constant 0 : i32
    %c0_i32_0 = arith.constant 0 : i32
    %c0_i32_1 = arith.constant 0 : i32
    return %c0_i32, %c0_i32_0 : i32, i32
  }
  func.func @transform_2(%arg0: i32) -> (i32, i32) {
    %c0_i32 = arith.constant 0 : i32
    %c0_i32_0 = arith.constant 0 : i32
    %c0_i32_1 = arith.constant 0 : i32
    return %c0_i32, %c0_i32_0 : i32, i32
  }
  func.func @transform_3(%arg0: i32) -> (i32, i32) {
    %c0_i32 = arith.constant 0 : i32
    %c0_i32_0 = arith.constant 0 : i32
    %c0_i32_1 = arith.constant 0 : i32
    return %c0_i32, %c0_i32_0 : i32, i32
  }
  func.func @transform_4(%arg0: i32) -> (i32, i32) {
    %c0_i32 = arith.constant 0 : i32
    %c0_i32_0 = arith.constant 0 : i32
    return %arg0, %c0_i32 : i32, i32
  }
  func.func @transform_5(%arg0: i32) -> (i32, i32, i32) {
    %c0_i32 = arith.constant 0 : i32
    %c0_i32_0 = arith.constant 0 : i32
    %c0_i32_1 = arith.constant 0 : i32
    return %arg0, %c0_i32, %c0_i32_0 : i32, i32, i32
  }
  func.func @transform_6(%arg0: i32) -> (i32, i32, i32) {
    %c0_i32 = arith.constant 0 : i32
    %c0_i32_0 = arith.constant 0 : i32
    %c0_i32_1 = arith.constant 0 : i32
    return %arg0, %c0_i32, %c0_i32_0 : i32, i32, i32
  }
}

module attributes {stable_mosaic.version = 11 : i64} {
  func.func @_mm_bn_stats_kernel(%arg0: i32, %arg1: memref<64x128xf32, #tpu.memory_space<vmem>>, %arg2: memref<1x128xf32, #tpu.memory_space<vmem>>, %arg3: memref<1x128xf32, #tpu.memory_space<vmem>>, %arg4: memref<128x128xf32, #tpu.memory_space<vmem>>, %arg5: memref<64x128xf32, #tpu.memory_space<vmem>>, %arg6: memref<1x1x128xf32, #tpu.memory_space<vmem>>, %arg7: memref<1x1x128xf32, #tpu.memory_space<vmem>>) attributes {dimension_semantics = [#tpu.dimension_semantics<parallel>], iteration_bounds = array<i64: 2>, scalar_prefetch = 0 : i64, scratch_operands = 0 : i64, tpu.core_type = #tpu.core_type<tc>, window_params = [{transform_indices = @transform_0, window_bounds = array<i64: 64, 128>}, {pipeline_mode = #tpu.pipeline_mode<synchronous>, transform_indices = @transform_1, window_bounds = array<i64: 1, 128>}, {pipeline_mode = #tpu.pipeline_mode<synchronous>, transform_indices = @transform_2, window_bounds = array<i64: 1, 128>}, {pipeline_mode = #tpu.pipeline_mode<synchronous>, transform_indices = @transform_3, window_bounds = array<i64: 128, 128>}, {transform_indices = @transform_4, window_bounds = array<i64: 64, 128>}, {transform_indices = @transform_5, window_bounds = array<i64: 1, 1, 128>}, {transform_indices = @transform_6, window_bounds = array<i64: 1, 1, 128>}]} {
    %c0 = arith.constant 0 : index
    %c0_0 = arith.constant 0 : index
    %0 = vector.load %arg1[%c0, %c0_0] : memref<64x128xf32, #tpu.memory_space<vmem>>, vector<64x128xf32>
    %c0_1 = arith.constant 0 : index
    %c0_2 = arith.constant 0 : index
    %1 = vector.load %arg2[%c0_1, %c0_2] : memref<1x128xf32, #tpu.memory_space<vmem>>, vector<1x128xf32>
    %2 = vector.broadcast %1 : vector<1x128xf32> to vector<64x128xf32>
    %3 = arith.mulf %0, %2 : vector<64x128xf32>
    %c0_3 = arith.constant 0 : index
    %c0_4 = arith.constant 0 : index
    %4 = vector.load %arg3[%c0_3, %c0_4] : memref<1x128xf32, #tpu.memory_space<vmem>>, vector<1x128xf32>
    %5 = vector.broadcast %4 : vector<1x128xf32> to vector<64x128xf32>
    %6 = arith.addf %3, %5 : vector<64x128xf32>
    %cst = arith.constant 0.000000e+00 : f32
    %7 = vector.broadcast %cst : f32 to vector<64x128xf32>
    %8 = arith.maximumf %6, %7 : vector<64x128xf32>
    %c0_5 = arith.constant 0 : index
    %c0_6 = arith.constant 0 : index
    %9 = vector.load %arg4[%c0_5, %c0_6] : memref<128x128xf32, #tpu.memory_space<vmem>>, vector<128x128xf32>
    %cst_7 = arith.constant dense<0.000000e+00> : vector<64x128xf32>
    %10 = tpu.matmul %8, %9, %cst_7 {dimension_numbers = #tpu.dot_dimension_numbers<[1], [0], [0], [1], [0, 0, 1, 1], [], []>} : vector<64x128xf32>, vector<128x128xf32>, vector<64x128xf32> -> vector<64x128xf32>
    %c0_8 = arith.constant 0 : index
    %c0_9 = arith.constant 0 : index
    %11 = vector.load %arg5[%c0_8, %c0_9] : memref<64x128xf32, #tpu.memory_space<vmem>>, vector<64x128xf32>
    tpu.vector_store %arg5[%c0_8, %c0_9], %10 {strides = array<i32>} : memref<64x128xf32, #tpu.memory_space<vmem>>, vector<64x128xf32>,
    %cst_10 = arith.constant dense<0.000000e+00> : vector<128xf32>
    %12 = vector.multi_reduction <add>, %10, %cst_10 [0] : vector<64x128xf32> to vector<128xf32>
    %13 = vector.shape_cast %12 : vector<128xf32> to vector<1x128xf32>
    %14 = vector.shape_cast %13 : vector<1x128xf32> to vector<1x1x128xf32>
    %c0_11 = arith.constant 0 : index
    %c0_12 = arith.constant 0 : index
    %c0_13 = arith.constant 0 : index
    %15 = vector.load %arg6[%c0_11, %c0_12, %c0_13] : memref<1x1x128xf32, #tpu.memory_space<vmem>>, vector<1x1x128xf32>
    tpu.vector_store %arg6[%c0_11, %c0_12, %c0_13], %14 {strides = array<i32>} : memref<1x1x128xf32, #tpu.memory_space<vmem>>, vector<1x1x128xf32>,
    %16 = arith.mulf %10, %10 : vector<64x128xf32>
    %cst_14 = arith.constant dense<0.000000e+00> : vector<128xf32>
    %17 = vector.multi_reduction <add>, %16, %cst_14 [0] : vector<64x128xf32> to vector<128xf32>
    %18 = vector.shape_cast %17 : vector<128xf32> to vector<1x128xf32>
    %19 = vector.shape_cast %18 : vector<1x128xf32> to vector<1x1x128xf32>
    %c0_15 = arith.constant 0 : index
    %c0_16 = arith.constant 0 : index
    %c0_17 = arith.constant 0 : index
    %20 = vector.load %arg7[%c0_15, %c0_16, %c0_17] : memref<1x1x128xf32, #tpu.memory_space<vmem>>, vector<1x1x128xf32>
    tpu.vector_store %arg7[%c0_15, %c0_16, %c0_17], %19 {strides = array<i32>} : memref<1x1x128xf32, #tpu.memory_space<vmem>>, vector<1x1x128xf32>,
    return
  }
  func.func @transform_0(%arg0: i32) -> (i32, i32) {
    %c0_i32 = arith.constant 0 : i32
    %c0_i32_0 = arith.constant 0 : i32
    return %arg0, %c0_i32 : i32, i32
  }
  func.func @transform_1(%arg0: i32) -> (i32, i32) {
    %c0_i32 = arith.constant 0 : i32
    %c0_i32_0 = arith.constant 0 : i32
    %c0_i32_1 = arith.constant 0 : i32
    return %c0_i32, %c0_i32_0 : i32, i32
  }
  func.func @transform_2(%arg0: i32) -> (i32, i32) {
    %c0_i32 = arith.constant 0 : i32
    %c0_i32_0 = arith.constant 0 : i32
    %c0_i32_1 = arith.constant 0 : i32
    return %c0_i32, %c0_i32_0 : i32, i32
  }
  func.func @transform_3(%arg0: i32) -> (i32, i32) {
    %c0_i32 = arith.constant 0 : i32
    %c0_i32_0 = arith.constant 0 : i32
    %c0_i32_1 = arith.constant 0 : i32
    return %c0_i32, %c0_i32_0 : i32, i32
  }
  func.func @transform_4(%arg0: i32) -> (i32, i32) {
    %c0_i32 = arith.constant 0 : i32
    %c0_i32_0 = arith.constant 0 : i32
    return %arg0, %c0_i32 : i32, i32
  }
  func.func @transform_5(%arg0: i32) -> (i32, i32, i32) {
    %c0_i32 = arith.constant 0 : i32
    %c0_i32_0 = arith.constant 0 : i32
    %c0_i32_1 = arith.constant 0 : i32
    return %arg0, %c0_i32, %c0_i32_0 : i32, i32, i32
  }
  func.func @transform_6(%arg0: i32) -> (i32, i32, i32) {
    %c0_i32 = arith.constant 0 : i32
    %c0_i32_0 = arith.constant 0 : i32
    %c0_i32_1 = arith.constant 0 : i32
    return %arg0, %c0_i32, %c0_i32_0 : i32, i32, i32
  }
}

module attributes {stable_mosaic.version = 11 : i64} {
  func.func @_conv3x3_bn_stats_kernel(%arg0: i32, %arg1: memref<4x9x9x128xf32, #tpu.memory_space<vmem>>, %arg2: memref<4x9x9x128xf32, #tpu.memory_space<vmem>>, %arg3: memref<1x128xf32, #tpu.memory_space<vmem>>, %arg4: memref<1x128xf32, #tpu.memory_space<vmem>>, %arg5: memref<9x128x128xf32, #tpu.memory_space<vmem>>, %arg6: memref<64x128xf32, #tpu.memory_space<vmem>>, %arg7: memref<1x1x128xf32, #tpu.memory_space<vmem>>, %arg8: memref<1x1x128xf32, #tpu.memory_space<vmem>>) attributes {dimension_semantics = [#tpu.dimension_semantics<parallel>], iteration_bounds = array<i64: 2>, scalar_prefetch = 0 : i64, scratch_operands = 0 : i64, tpu.core_type = #tpu.core_type<tc>, window_params = [{transform_indices = @transform_0, window_bounds = array<i64: 4, 9, 9, 128>}, {pipeline_mode = #tpu.pipeline_mode<synchronous>, transform_indices = @transform_1, window_bounds = array<i64: 4, 9, 9, 128>}, {pipeline_mode = #tpu.pipeline_mode<synchronous>, transform_indices = @transform_2, window_bounds = array<i64: 1, 128>}, {pipeline_mode = #tpu.pipeline_mode<synchronous>, transform_indices = @transform_3, window_bounds = array<i64: 1, 128>}, {pipeline_mode = #tpu.pipeline_mode<synchronous>, transform_indices = @transform_4, window_bounds = array<i64: 9, 128, 128>}, {transform_indices = @transform_5, window_bounds = array<i64: 64, 128>}, {transform_indices = @transform_6, window_bounds = array<i64: 1, 1, 128>}, {transform_indices = @transform_7, window_bounds = array<i64: 1, 1, 128>}]} {
    %c0 = arith.constant 0 : index
    %c0_0 = arith.constant 0 : index
    %0 = vector.load %arg3[%c0, %c0_0] : memref<1x128xf32, #tpu.memory_space<vmem>>, vector<1x128xf32>
    %1 = vector.shape_cast %0 : vector<1x128xf32> to vector<1x1x1x128xf32>
    %c0_1 = arith.constant 0 : index
    %c0_2 = arith.constant 0 : index
    %2 = vector.load %arg4[%c0_1, %c0_2] : memref<1x128xf32, #tpu.memory_space<vmem>>, vector<1x128xf32>
    %3 = vector.shape_cast %2 : vector<1x128xf32> to vector<1x1x1x128xf32>
    %c0_3 = arith.constant 0 : index
    %c0_4 = arith.constant 0 : index
    %c0_5 = arith.constant 0 : index
    %c0_6 = arith.constant 0 : index
    %4 = vector.load %arg1[%c0_3, %c0_4, %c0_5, %c0_6] : memref<4x9x9x128xf32, #tpu.memory_space<vmem>>, vector<4x9x9x128xf32>
    %5 = vector.broadcast %1 : vector<1x1x1x128xf32> to vector<4x9x9x128xf32>
    %6 = arith.mulf %4, %5 : vector<4x9x9x128xf32>
    %7 = vector.broadcast %3 : vector<1x1x1x128xf32> to vector<4x9x9x128xf32>
    %8 = arith.addf %6, %7 : vector<4x9x9x128xf32>
    %cst = arith.constant 0.000000e+00 : f32
    %9 = vector.broadcast %cst : f32 to vector<4x9x9x128xf32>
    %10 = arith.maximumf %8, %9 : vector<4x9x9x128xf32>
    %c0_7 = arith.constant 0 : index
    %c0_8 = arith.constant 0 : index
    %c0_9 = arith.constant 0 : index
    %c0_10 = arith.constant 0 : index
    %11 = vector.load %arg2[%c0_7, %c0_8, %c0_9, %c0_10] : memref<4x9x9x128xf32, #tpu.memory_space<vmem>>, vector<4x9x9x128xf32>
    %12 = arith.mulf %10, %11 : vector<4x9x9x128xf32>
    %cst_11 = arith.constant 0.000000e+00 : f32
    %13 = vector.broadcast %cst_11 : f32 to vector<64x128xf32>
    %14 = vector.extract_strided_slice %12 {offsets = [0, 0, 0, 0], sizes = [1, 8, 8, 128], strides = [1, 1, 1, 1]} : vector<4x9x9x128xf32> to vector<1x8x8x128xf32>
    %15 = vector.shape_cast %14 : vector<1x8x8x128xf32> to vector<8x8x128xf32>
    %16 = vector.shape_cast %15 : vector<8x8x128xf32> to vector<64x128xf32>
    %c0_12 = arith.constant 0 : index
    %c0_13 = arith.constant 0 : index
    %c0_14 = arith.constant 0 : index
    %17 = vector.load %arg5[%c0_12, %c0_13, %c0_14] : memref<9x128x128xf32, #tpu.memory_space<vmem>>, vector<1x128x128xf32>
    %18 = vector.shape_cast %17 : vector<1x128x128xf32> to vector<128x128xf32>
    %cst_15 = arith.constant dense<0.000000e+00> : vector<64x128xf32>
    %19 = tpu.matmul %16, %18, %cst_15 {dimension_numbers = #tpu.dot_dimension_numbers<[1], [0], [0], [1], [0, 0, 1, 1], [], []>} : vector<64x128xf32>, vector<128x128xf32>, vector<64x128xf32> -> vector<64x128xf32>
    %20 = arith.addf %13, %19 : vector<64x128xf32>
    %21 = vector.extract_strided_slice %12 {offsets = [1, 0, 0, 0], sizes = [1, 8, 8, 128], strides = [1, 1, 1, 1]} : vector<4x9x9x128xf32> to vector<1x8x8x128xf32>
    %22 = vector.shape_cast %21 : vector<1x8x8x128xf32> to vector<8x8x128xf32>
    %23 = vector.shape_cast %22 : vector<8x8x128xf32> to vector<64x128xf32>
    %c1 = arith.constant 1 : index
    %c0_16 = arith.constant 0 : index
    %c0_17 = arith.constant 0 : index
    %24 = vector.load %arg5[%c1, %c0_16, %c0_17] : memref<9x128x128xf32, #tpu.memory_space<vmem>>, vector<1x128x128xf32>
    %25 = vector.shape_cast %24 : vector<1x128x128xf32> to vector<128x128xf32>
    %cst_18 = arith.constant dense<0.000000e+00> : vector<64x128xf32>
    %26 = tpu.matmul %23, %25, %cst_18 {dimension_numbers = #tpu.dot_dimension_numbers<[1], [0], [0], [1], [0, 0, 1, 1], [], []>} : vector<64x128xf32>, vector<128x128xf32>, vector<64x128xf32> -> vector<64x128xf32>
    %27 = arith.addf %20, %26 : vector<64x128xf32>
    %28 = vector.extract_strided_slice %12 {offsets = [0, 0, 1, 0], sizes = [1, 8, 8, 128], strides = [1, 1, 1, 1]} : vector<4x9x9x128xf32> to vector<1x8x8x128xf32>
    %29 = vector.shape_cast %28 : vector<1x8x8x128xf32> to vector<8x8x128xf32>
    %30 = vector.shape_cast %29 : vector<8x8x128xf32> to vector<64x128xf32>
    %c2 = arith.constant 2 : index
    %c0_19 = arith.constant 0 : index
    %c0_20 = arith.constant 0 : index
    %31 = vector.load %arg5[%c2, %c0_19, %c0_20] : memref<9x128x128xf32, #tpu.memory_space<vmem>>, vector<1x128x128xf32>
    %32 = vector.shape_cast %31 : vector<1x128x128xf32> to vector<128x128xf32>
    %cst_21 = arith.constant dense<0.000000e+00> : vector<64x128xf32>
    %33 = tpu.matmul %30, %32, %cst_21 {dimension_numbers = #tpu.dot_dimension_numbers<[1], [0], [0], [1], [0, 0, 1, 1], [], []>} : vector<64x128xf32>, vector<128x128xf32>, vector<64x128xf32> -> vector<64x128xf32>
    %34 = arith.addf %27, %33 : vector<64x128xf32>
    %35 = vector.extract_strided_slice %12 {offsets = [2, 0, 0, 0], sizes = [1, 8, 8, 128], strides = [1, 1, 1, 1]} : vector<4x9x9x128xf32> to vector<1x8x8x128xf32>
    %36 = vector.shape_cast %35 : vector<1x8x8x128xf32> to vector<8x8x128xf32>
    %37 = vector.shape_cast %36 : vector<8x8x128xf32> to vector<64x128xf32>
    %c3 = arith.constant 3 : index
    %c0_22 = arith.constant 0 : index
    %c0_23 = arith.constant 0 : index
    %38 = vector.load %arg5[%c3, %c0_22, %c0_23] : memref<9x128x128xf32, #tpu.memory_space<vmem>>, vector<1x128x128xf32>
    %39 = vector.shape_cast %38 : vector<1x128x128xf32> to vector<128x128xf32>
    %cst_24 = arith.constant dense<0.000000e+00> : vector<64x128xf32>
    %40 = tpu.matmul %37, %39, %cst_24 {dimension_numbers = #tpu.dot_dimension_numbers<[1], [0], [0], [1], [0, 0, 1, 1], [], []>} : vector<64x128xf32>, vector<128x128xf32>, vector<64x128xf32> -> vector<64x128xf32>
    %41 = arith.addf %34, %40 : vector<64x128xf32>
    %42 = vector.extract_strided_slice %12 {offsets = [3, 0, 0, 0], sizes = [1, 8, 8, 128], strides = [1, 1, 1, 1]} : vector<4x9x9x128xf32> to vector<1x8x8x128xf32>
    %43 = vector.shape_cast %42 : vector<1x8x8x128xf32> to vector<8x8x128xf32>
    %44 = vector.shape_cast %43 : vector<8x8x128xf32> to vector<64x128xf32>
    %c4 = arith.constant 4 : index
    %c0_25 = arith.constant 0 : index
    %c0_26 = arith.constant 0 : index
    %45 = vector.load %arg5[%c4, %c0_25, %c0_26] : memref<9x128x128xf32, #tpu.memory_space<vmem>>, vector<1x128x128xf32>
    %46 = vector.shape_cast %45 : vector<1x128x128xf32> to vector<128x128xf32>
    %cst_27 = arith.constant dense<0.000000e+00> : vector<64x128xf32>
    %47 = tpu.matmul %44, %46, %cst_27 {dimension_numbers = #tpu.dot_dimension_numbers<[1], [0], [0], [1], [0, 0, 1, 1], [], []>} : vector<64x128xf32>, vector<128x128xf32>, vector<64x128xf32> -> vector<64x128xf32>
    %48 = arith.addf %41, %47 : vector<64x128xf32>
    %49 = vector.extract_strided_slice %12 {offsets = [2, 0, 1, 0], sizes = [1, 8, 8, 128], strides = [1, 1, 1, 1]} : vector<4x9x9x128xf32> to vector<1x8x8x128xf32>
    %50 = vector.shape_cast %49 : vector<1x8x8x128xf32> to vector<8x8x128xf32>
    %51 = vector.shape_cast %50 : vector<8x8x128xf32> to vector<64x128xf32>
    %c5 = arith.constant 5 : index
    %c0_28 = arith.constant 0 : index
    %c0_29 = arith.constant 0 : index
    %52 = vector.load %arg5[%c5, %c0_28, %c0_29] : memref<9x128x128xf32, #tpu.memory_space<vmem>>, vector<1x128x128xf32>
    %53 = vector.shape_cast %52 : vector<1x128x128xf32> to vector<128x128xf32>
    %cst_30 = arith.constant dense<0.000000e+00> : vector<64x128xf32>
    %54 = tpu.matmul %51, %53, %cst_30 {dimension_numbers = #tpu.dot_dimension_numbers<[1], [0], [0], [1], [0, 0, 1, 1], [], []>} : vector<64x128xf32>, vector<128x128xf32>, vector<64x128xf32> -> vector<64x128xf32>
    %55 = arith.addf %48, %54 : vector<64x128xf32>
    %56 = vector.extract_strided_slice %12 {offsets = [0, 1, 0, 0], sizes = [1, 8, 8, 128], strides = [1, 1, 1, 1]} : vector<4x9x9x128xf32> to vector<1x8x8x128xf32>
    %57 = vector.shape_cast %56 : vector<1x8x8x128xf32> to vector<8x8x128xf32>
    %58 = vector.shape_cast %57 : vector<8x8x128xf32> to vector<64x128xf32>
    %c6 = arith.constant 6 : index
    %c0_31 = arith.constant 0 : index
    %c0_32 = arith.constant 0 : index
    %59 = vector.load %arg5[%c6, %c0_31, %c0_32] : memref<9x128x128xf32, #tpu.memory_space<vmem>>, vector<1x128x128xf32>
    %60 = vector.shape_cast %59 : vector<1x128x128xf32> to vector<128x128xf32>
    %cst_33 = arith.constant dense<0.000000e+00> : vector<64x128xf32>
    %61 = tpu.matmul %58, %60, %cst_33 {dimension_numbers = #tpu.dot_dimension_numbers<[1], [0], [0], [1], [0, 0, 1, 1], [], []>} : vector<64x128xf32>, vector<128x128xf32>, vector<64x128xf32> -> vector<64x128xf32>
    %62 = arith.addf %55, %61 : vector<64x128xf32>
    %63 = vector.extract_strided_slice %12 {offsets = [1, 1, 0, 0], sizes = [1, 8, 8, 128], strides = [1, 1, 1, 1]} : vector<4x9x9x128xf32> to vector<1x8x8x128xf32>
    %64 = vector.shape_cast %63 : vector<1x8x8x128xf32> to vector<8x8x128xf32>
    %65 = vector.shape_cast %64 : vector<8x8x128xf32> to vector<64x128xf32>
    %c7 = arith.constant 7 : index
    %c0_34 = arith.constant 0 : index
    %c0_35 = arith.constant 0 : index
    %66 = vector.load %arg5[%c7, %c0_34, %c0_35] : memref<9x128x128xf32, #tpu.memory_space<vmem>>, vector<1x128x128xf32>
    %67 = vector.shape_cast %66 : vector<1x128x128xf32> to vector<128x128xf32>
    %cst_36 = arith.constant dense<0.000000e+00> : vector<64x128xf32>
    %68 = tpu.matmul %65, %67, %cst_36 {dimension_numbers = #tpu.dot_dimension_numbers<[1], [0], [0], [1], [0, 0, 1, 1], [], []>} : vector<64x128xf32>, vector<128x128xf32>, vector<64x128xf32> -> vector<64x128xf32>
    %69 = arith.addf %62, %68 : vector<64x128xf32>
    %70 = vector.extract_strided_slice %12 {offsets = [0, 1, 1, 0], sizes = [1, 8, 8, 128], strides = [1, 1, 1, 1]} : vector<4x9x9x128xf32> to vector<1x8x8x128xf32>
    %71 = vector.shape_cast %70 : vector<1x8x8x128xf32> to vector<8x8x128xf32>
    %72 = vector.shape_cast %71 : vector<8x8x128xf32> to vector<64x128xf32>
    %c8 = arith.constant 8 : index
    %c0_37 = arith.constant 0 : index
    %c0_38 = arith.constant 0 : index
    %73 = vector.load %arg5[%c8, %c0_37, %c0_38] : memref<9x128x128xf32, #tpu.memory_space<vmem>>, vector<1x128x128xf32>
    %74 = vector.shape_cast %73 : vector<1x128x128xf32> to vector<128x128xf32>
    %cst_39 = arith.constant dense<0.000000e+00> : vector<64x128xf32>
    %75 = tpu.matmul %72, %74, %cst_39 {dimension_numbers = #tpu.dot_dimension_numbers<[1], [0], [0], [1], [0, 0, 1, 1], [], []>} : vector<64x128xf32>, vector<128x128xf32>, vector<64x128xf32> -> vector<64x128xf32>
    %76 = arith.addf %69, %75 : vector<64x128xf32>
    %c0_40 = arith.constant 0 : index
    %c0_41 = arith.constant 0 : index
    %77 = vector.load %arg6[%c0_40, %c0_41] : memref<64x128xf32, #tpu.memory_space<vmem>>, vector<64x128xf32>
    tpu.vector_store %arg6[%c0_40, %c0_41], %76 {strides = array<i32>} : memref<64x128xf32, #tpu.memory_space<vmem>>, vector<64x128xf32>,
    %cst_42 = arith.constant dense<0.000000e+00> : vector<128xf32>
    %78 = vector.multi_reduction <add>, %76, %cst_42 [0] : vector<64x128xf32> to vector<128xf32>
    %79 = vector.shape_cast %78 : vector<128xf32> to vector<1x128xf32>
    %80 = vector.shape_cast %79 : vector<1x128xf32> to vector<1x1x128xf32>
    %c0_43 = arith.constant 0 : index
    %c0_44 = arith.constant 0 : index
    %c0_45 = arith.constant 0 : index
    %81 = vector.load %arg7[%c0_43, %c0_44, %c0_45] : memref<1x1x128xf32, #tpu.memory_space<vmem>>, vector<1x1x128xf32>
    tpu.vector_store %arg7[%c0_43, %c0_44, %c0_45], %80 {strides = array<i32>} : memref<1x1x128xf32, #tpu.memory_space<vmem>>, vector<1x1x128xf32>,
    %82 = arith.mulf %76, %76 : vector<64x128xf32>
    %cst_46 = arith.constant dense<0.000000e+00> : vector<128xf32>
    %83 = vector.multi_reduction <add>, %82, %cst_46 [0] : vector<64x128xf32> to vector<128xf32>
    %84 = vector.shape_cast %83 : vector<128xf32> to vector<1x128xf32>
    %85 = vector.shape_cast %84 : vector<1x128xf32> to vector<1x1x128xf32>
    %c0_47 = arith.constant 0 : index
    %c0_48 = arith.constant 0 : index
    %c0_49 = arith.constant 0 : index
    %86 = vector.load %arg8[%c0_47, %c0_48, %c0_49] : memref<1x1x128xf32, #tpu.memory_space<vmem>>, vector<1x1x128xf32>
    tpu.vector_store %arg8[%c0_47, %c0_48, %c0_49], %85 {strides = array<i32>} : memref<1x1x128xf32, #tpu.memory_space<vmem>>, vector<1x1x128xf32>,
    return
  }
  func.func @transform_0(%arg0: i32) -> (i32, i32, i32, i32) {
    %c0_i32 = arith.constant 0 : i32
    %c0_i32_0 = arith.constant 0 : i32
    %c0_i32_1 = arith.constant 0 : i32
    %c0_i32_2 = arith.constant 0 : i32
    return %arg0, %c0_i32, %c0_i32_0, %c0_i32_1 : i32, i32, i32, i32
  }
  func.func @transform_1(%arg0: i32) -> (i32, i32, i32, i32) {
    %c0_i32 = arith.constant 0 : i32
    %c0_i32_0 = arith.constant 0 : i32
    %c0_i32_1 = arith.constant 0 : i32
    %c0_i32_2 = arith.constant 0 : i32
    %c0_i32_3 = arith.constant 0 : i32
    return %c0_i32, %c0_i32_0, %c0_i32_1, %c0_i32_2 : i32, i32, i32, i32
  }
  func.func @transform_2(%arg0: i32) -> (i32, i32) {
    %c0_i32 = arith.constant 0 : i32
    %c0_i32_0 = arith.constant 0 : i32
    %c0_i32_1 = arith.constant 0 : i32
    return %c0_i32, %c0_i32_0 : i32, i32
  }
  func.func @transform_3(%arg0: i32) -> (i32, i32) {
    %c0_i32 = arith.constant 0 : i32
    %c0_i32_0 = arith.constant 0 : i32
    %c0_i32_1 = arith.constant 0 : i32
    return %c0_i32, %c0_i32_0 : i32, i32
  }
  func.func @transform_4(%arg0: i32) -> (i32, i32, i32) {
    %c0_i32 = arith.constant 0 : i32
    %c0_i32_0 = arith.constant 0 : i32
    %c0_i32_1 = arith.constant 0 : i32
    %c0_i32_2 = arith.constant 0 : i32
    return %c0_i32, %c0_i32_0, %c0_i32_1 : i32, i32, i32
  }
  func.func @transform_5(%arg0: i32) -> (i32, i32) {
    %c0_i32 = arith.constant 0 : i32
    %c0_i32_0 = arith.constant 0 : i32
    return %arg0, %c0_i32 : i32, i32
  }
  func.func @transform_6(%arg0: i32) -> (i32, i32, i32) {
    %c0_i32 = arith.constant 0 : i32
    %c0_i32_0 = arith.constant 0 : i32
    %c0_i32_1 = arith.constant 0 : i32
    return %arg0, %c0_i32, %c0_i32_0 : i32, i32, i32
  }
  func.func @transform_7(%arg0: i32) -> (i32, i32, i32) {
    %c0_i32 = arith.constant 0 : i32
    %c0_i32_0 = arith.constant 0 : i32
    %c0_i32_1 = arith.constant 0 : i32
    return %arg0, %c0_i32, %c0_i32_0 : i32, i32, i32
  }
}

module attributes {stable_mosaic.version = 11 : i64} {
  func.func @_mm_bn_stats_kernel(%arg0: i32, %arg1: memref<64x128xf32, #tpu.memory_space<vmem>>, %arg2: memref<1x128xf32, #tpu.memory_space<vmem>>, %arg3: memref<1x128xf32, #tpu.memory_space<vmem>>, %arg4: memref<128x128xf32, #tpu.memory_space<vmem>>, %arg5: memref<64x128xf32, #tpu.memory_space<vmem>>, %arg6: memref<1x1x128xf32, #tpu.memory_space<vmem>>, %arg7: memref<1x1x128xf32, #tpu.memory_space<vmem>>) attributes {dimension_semantics = [#tpu.dimension_semantics<parallel>], iteration_bounds = array<i64: 2>, scalar_prefetch = 0 : i64, scratch_operands = 0 : i64, tpu.core_type = #tpu.core_type<tc>, window_params = [{transform_indices = @transform_0, window_bounds = array<i64: 64, 128>}, {pipeline_mode = #tpu.pipeline_mode<synchronous>, transform_indices = @transform_1, window_bounds = array<i64: 1, 128>}, {pipeline_mode = #tpu.pipeline_mode<synchronous>, transform_indices = @transform_2, window_bounds = array<i64: 1, 128>}, {pipeline_mode = #tpu.pipeline_mode<synchronous>, transform_indices = @transform_3, window_bounds = array<i64: 128, 128>}, {transform_indices = @transform_4, window_bounds = array<i64: 64, 128>}, {transform_indices = @transform_5, window_bounds = array<i64: 1, 1, 128>}, {transform_indices = @transform_6, window_bounds = array<i64: 1, 1, 128>}]} {
    %c0 = arith.constant 0 : index
    %c0_0 = arith.constant 0 : index
    %0 = vector.load %arg1[%c0, %c0_0] : memref<64x128xf32, #tpu.memory_space<vmem>>, vector<64x128xf32>
    %c0_1 = arith.constant 0 : index
    %c0_2 = arith.constant 0 : index
    %1 = vector.load %arg4[%c0_1, %c0_2] : memref<128x128xf32, #tpu.memory_space<vmem>>, vector<128x128xf32>
    %cst = arith.constant dense<0.000000e+00> : vector<64x128xf32>
    %2 = tpu.matmul %0, %1, %cst {dimension_numbers = #tpu.dot_dimension_numbers<[1], [0], [0], [1], [0, 0, 1, 1], [], []>} : vector<64x128xf32>, vector<128x128xf32>, vector<64x128xf32> -> vector<64x128xf32>
    %c0_3 = arith.constant 0 : index
    %c0_4 = arith.constant 0 : index
    %3 = vector.load %arg5[%c0_3, %c0_4] : memref<64x128xf32, #tpu.memory_space<vmem>>, vector<64x128xf32>
    tpu.vector_store %arg5[%c0_3, %c0_4], %2 {strides = array<i32>} : memref<64x128xf32, #tpu.memory_space<vmem>>, vector<64x128xf32>,
    %cst_5 = arith.constant dense<0.000000e+00> : vector<128xf32>
    %4 = vector.multi_reduction <add>, %2, %cst_5 [0] : vector<64x128xf32> to vector<128xf32>
    %5 = vector.shape_cast %4 : vector<128xf32> to vector<1x128xf32>
    %6 = vector.shape_cast %5 : vector<1x128xf32> to vector<1x1x128xf32>
    %c0_6 = arith.constant 0 : index
    %c0_7 = arith.constant 0 : index
    %c0_8 = arith.constant 0 : index
    %7 = vector.load %arg6[%c0_6, %c0_7, %c0_8] : memref<1x1x128xf32, #tpu.memory_space<vmem>>, vector<1x1x128xf32>
    tpu.vector_store %arg6[%c0_6, %c0_7, %c0_8], %6 {strides = array<i32>} : memref<1x1x128xf32, #tpu.memory_space<vmem>>, vector<1x1x128xf32>,
    %8 = arith.mulf %2, %2 : vector<64x128xf32>
    %cst_9 = arith.constant dense<0.000000e+00> : vector<128xf32>
    %9 = vector.multi_reduction <add>, %8, %cst_9 [0] : vector<64x128xf32> to vector<128xf32>
    %10 = vector.shape_cast %9 : vector<128xf32> to vector<1x128xf32>
    %11 = vector.shape_cast %10 : vector<1x128xf32> to vector<1x1x128xf32>
    %c0_10 = arith.constant 0 : index
    %c0_11 = arith.constant 0 : index
    %c0_12 = arith.constant 0 : index
    %12 = vector.load %arg7[%c0_10, %c0_11, %c0_12] : memref<1x1x128xf32, #tpu.memory_space<vmem>>, vector<1x1x128xf32>
    tpu.vector_store %arg7[%c0_10, %c0_11, %c0_12], %11 {strides = array<i32>} : memref<1x1x128xf32, #tpu.memory_space<vmem>>, vector<1x1x128xf32>,
    return
  }
  func.func @transform_0(%arg0: i32) -> (i32, i32) {
    %c0_i32 = arith.constant 0 : i32
    %c0_i32_0 = arith.constant 0 : i32
    return %arg0, %c0_i32 : i32, i32
  }
  func.func @transform_1(%arg0: i32) -> (i32, i32) {
    %c0_i32 = arith.constant 0 : i32
    %c0_i32_0 = arith.constant 0 : i32
    %c0_i32_1 = arith.constant 0 : i32
    return %c0_i32, %c0_i32_0 : i32, i32
  }
  func.func @transform_2(%arg0: i32) -> (i32, i32) {
    %c0_i32 = arith.constant 0 : i32
    %c0_i32_0 = arith.constant 0 : i32
    %c0_i32_1 = arith.constant 0 : i32
    return %c0_i32, %c0_i32_0 : i32, i32
  }
  func.func @transform_3(%arg0: i32) -> (i32, i32) {
    %c0_i32 = arith.constant 0 : i32
    %c0_i32_0 = arith.constant 0 : i32
    %c0_i32_1 = arith.constant 0 : i32
    return %c0_i32, %c0_i32_0 : i32, i32
  }
  func.func @transform_4(%arg0: i32) -> (i32, i32) {
    %c0_i32 = arith.constant 0 : i32
    %c0_i32_0 = arith.constant 0 : i32
    return %arg0, %c0_i32 : i32, i32
  }
  func.func @transform_5(%arg0: i32) -> (i32, i32, i32) {
    %c0_i32 = arith.constant 0 : i32
    %c0_i32_0 = arith.constant 0 : i32
    %c0_i32_1 = arith.constant 0 : i32
    return %arg0, %c0_i32, %c0_i32_0 : i32, i32, i32
  }
  func.func @transform_6(%arg0: i32) -> (i32, i32, i32) {
    %c0_i32 = arith.constant 0 : i32
    %c0_i32_0 = arith.constant 0 : i32
    %c0_i32_1 = arith.constant 0 : i32
    return %arg0, %c0_i32, %c0_i32_0 : i32, i32, i32
  }
}

module attributes {stable_mosaic.version = 11 : i64} {
  func.func @_bn_add_relu_kernel(%arg0: i32, %arg1: memref<64x128xf32, #tpu.memory_space<vmem>>, %arg2: memref<64x128xf32, #tpu.memory_space<vmem>>, %arg3: memref<1x128xf32, #tpu.memory_space<vmem>>, %arg4: memref<1x128xf32, #tpu.memory_space<vmem>>, %arg5: memref<1x128xf32, #tpu.memory_space<vmem>>, %arg6: memref<1x128xf32, #tpu.memory_space<vmem>>, %arg7: memref<64x128xf32, #tpu.memory_space<vmem>>) attributes {dimension_semantics = [#tpu.dimension_semantics<parallel>], iteration_bounds = array<i64: 2>, scalar_prefetch = 0 : i64, scratch_operands = 0 : i64, tpu.core_type = #tpu.core_type<tc>, window_params = [{transform_indices = @transform_0, window_bounds = array<i64: 64, 128>}, {transform_indices = @transform_1, window_bounds = array<i64: 64, 128>}, {pipeline_mode = #tpu.pipeline_mode<synchronous>, transform_indices = @transform_2, window_bounds = array<i64: 1, 128>}, {pipeline_mode = #tpu.pipeline_mode<synchronous>, transform_indices = @transform_3, window_bounds = array<i64: 1, 128>}, {pipeline_mode = #tpu.pipeline_mode<synchronous>, transform_indices = @transform_4, window_bounds = array<i64: 1, 128>}, {pipeline_mode = #tpu.pipeline_mode<synchronous>, transform_indices = @transform_5, window_bounds = array<i64: 1, 128>}, {transform_indices = @transform_6, window_bounds = array<i64: 64, 128>}]} {
    %c0 = arith.constant 0 : index
    %c0_0 = arith.constant 0 : index
    %0 = vector.load %arg1[%c0, %c0_0] : memref<64x128xf32, #tpu.memory_space<vmem>>, vector<64x128xf32>
    %c0_1 = arith.constant 0 : index
    %c0_2 = arith.constant 0 : index
    %1 = vector.load %arg3[%c0_1, %c0_2] : memref<1x128xf32, #tpu.memory_space<vmem>>, vector<1x128xf32>
    %2 = vector.broadcast %1 : vector<1x128xf32> to vector<64x128xf32>
    %3 = arith.mulf %0, %2 : vector<64x128xf32>
    %c0_3 = arith.constant 0 : index
    %c0_4 = arith.constant 0 : index
    %4 = vector.load %arg4[%c0_3, %c0_4] : memref<1x128xf32, #tpu.memory_space<vmem>>, vector<1x128xf32>
    %5 = vector.broadcast %4 : vector<1x128xf32> to vector<64x128xf32>
    %6 = arith.addf %3, %5 : vector<64x128xf32>
    %cst = arith.constant 0.000000e+00 : f32
    %7 = vector.broadcast %cst : f32 to vector<64x128xf32>
    %8 = arith.maximumf %6, %7 : vector<64x128xf32>
    %c0_5 = arith.constant 0 : index
    %c0_6 = arith.constant 0 : index
    %9 = vector.load %arg2[%c0_5, %c0_6] : memref<64x128xf32, #tpu.memory_space<vmem>>, vector<64x128xf32>
    %c0_7 = arith.constant 0 : index
    %c0_8 = arith.constant 0 : index
    %10 = vector.load %arg5[%c0_7, %c0_8] : memref<1x128xf32, #tpu.memory_space<vmem>>, vector<1x128xf32>
    %11 = vector.broadcast %10 : vector<1x128xf32> to vector<64x128xf32>
    %12 = arith.mulf %9, %11 : vector<64x128xf32>
    %c0_9 = arith.constant 0 : index
    %c0_10 = arith.constant 0 : index
    %13 = vector.load %arg6[%c0_9, %c0_10] : memref<1x128xf32, #tpu.memory_space<vmem>>, vector<1x128xf32>
    %14 = vector.broadcast %13 : vector<1x128xf32> to vector<64x128xf32>
    %15 = arith.addf %12, %14 : vector<64x128xf32>
    %16 = arith.addf %8, %15 : vector<64x128xf32>
    %cst_11 = arith.constant 0.000000e+00 : f32
    %17 = vector.broadcast %cst_11 : f32 to vector<64x128xf32>
    %18 = arith.maximumf %16, %17 : vector<64x128xf32>
    %c0_12 = arith.constant 0 : index
    %c0_13 = arith.constant 0 : index
    %19 = vector.load %arg7[%c0_12, %c0_13] : memref<64x128xf32, #tpu.memory_space<vmem>>, vector<64x128xf32>
    tpu.vector_store %arg7[%c0_12, %c0_13], %18 {strides = array<i32>} : memref<64x128xf32, #tpu.memory_space<vmem>>, vector<64x128xf32>,
    return
  }
  func.func @transform_0(%arg0: i32) -> (i32, i32) {
    %c0_i32 = arith.constant 0 : i32
    %c0_i32_0 = arith.constant 0 : i32
    return %arg0, %c0_i32 : i32, i32
  }
  func.func @transform_1(%arg0: i32) -> (i32, i32) {
    %c0_i32 = arith.constant 0 : i32
    %c0_i32_0 = arith.constant 0 : i32
    return %arg0, %c0_i32 : i32, i32
  }
  func.func @transform_2(%arg0: i32) -> (i32, i32) {
    %c0_i32 = arith.constant 0 : i32
    %c0_i32_0 = arith.constant 0 : i32
    %c0_i32_1 = arith.constant 0 : i32
    return %c0_i32, %c0_i32_0 : i32, i32
  }
  func.func @transform_3(%arg0: i32) -> (i32, i32) {
    %c0_i32 = arith.constant 0 : i32
    %c0_i32_0 = arith.constant 0 : i32
    %c0_i32_1 = arith.constant 0 : i32
    return %c0_i32, %c0_i32_0 : i32, i32
  }
  func.func @transform_4(%arg0: i32) -> (i32, i32) {
    %c0_i32 = arith.constant 0 : i32
    %c0_i32_0 = arith.constant 0 : i32
    %c0_i32_1 = arith.constant 0 : i32
    return %c0_i32, %c0_i32_0 : i32, i32
  }
  func.func @transform_5(%arg0: i32) -> (i32, i32) {
    %c0_i32 = arith.constant 0 : i32
    %c0_i32_0 = arith.constant 0 : i32
    %c0_i32_1 = arith.constant 0 : i32
    return %c0_i32, %c0_i32_0 : i32, i32
  }
  func.func @transform_6(%arg0: i32) -> (i32, i32) {
    %c0_i32 = arith.constant 0 : i32
    %c0_i32_0 = arith.constant 0 : i32
    return %arg0, %c0_i32 : i32, i32
  }
}

</mosaic_0001>

<bundles_post_ra>
// kernel: res_bottleneck_block.5
= control target key start
LH: loop header
LB: loop body
LE: loop exit
PB: predicated region body
PF: predicated region fallthrough
CT: control target
= control target key end

     0   :  { %s1013_s21 = smov 0   ;;  %s1236_s0 = inlined_call_operand.vmem [shape: f32[512,128], index: 0, kind: input, shape index: {}]   ;;  %s1237_s1 = inlined_call_operand.vmem [shape: f32[1,128], index: 1, kind: input, shape index: {}]   ;;  %s1238_s2 = inlined_call_operand.vmem [shape: f32[1,128], index: 2, kind: input, shape index: {}]   ;;  %s1239_s3 = inlined_call_operand.vmem [shape: f32[128,128], index: 3, kind: input, shape index: {}]   ;;  %s1240_s4 = inlined_call_operand.vmem [shape: f32[512,128], index: 4, kind: output, shape index: {0}]   ;;  %s1241_s5 = inlined_call_operand.vmem [shape: f32[2,1,128], index: 5, kind: output, shape index: {1}]   ;;  %s1242_s6 = inlined_call_operand.vmem [shape: f32[2,1,128], index: 6, kind: output, shape index: {2}]  }
   0x1 LB: > { %s1019_s1 = sadd.s32 4294967295, %s976_s21   ;;  %p795_p0 = scmp.ge.s32.totalorder %s976_s21, 1  ;;  %s976_s21 = sphi %s1013_s21, %s17_s21  }
   0x2   : > { %p218_p1 = scmp.lt.s32.totalorder %s976_s21, 3 }
   0x4   : > { %p219_p2 = pnand %p795_p0, %p218_p1 }
   0x5   : > { %s796_s25 = sshll.u32 (!%p219_p2), %s1019_s1, 5  ;;  %p266_p4 = scmp.lt.s32.totalorder (!%p219_p2), %s1019_s1, 1 }
   0x6   : > { %222 = sbr.rel (%p219_p2) target bundleno = 318 (0x13e), region = 36  ;;  %p255_p3 = scmp.lt.s32.totalorder (!%p219_p2), %s796_s25, 63 }
   0xb   : > { %v319_v0 = vld [vmem:[%s1239_s3 + $0x78] sm:$0xff]  ;;  %v318_v1 = vld [vmem:[%s1239_s3 + $0x70] sm:$0xff]  ;;  %v317_v2 = vld [vmem:[%s1239_s3 + $0x68] sm:$0xff]  ;;  %s1244_s25 = smov (!%p255_p3, %s796_s25), 63  ;;  %s1246_s1 = smov (!%p266_p4, %s1019_s1), 1 }
   0xc   : > { %850 = vmatprep.subr.mxu0 %v319_v0  ;;  %930 = vmatprep.subr.mxu1 %v319_v0  ;;  %v316_v3 = vld [vmem:[%s1239_s3 + $0x60] sm:$0xff]  ;;  %s797_s30 = sshll.u32 %s1244_s25, 3  ;;  %v315_v4 = vld [vmem:[%s1239_s3 + $0x58] sm:$0xff]  ;;  %v314_v6 = vld [vmem:[%s1239_s3 + $0x50] sm:$0xff]  ;;  %s271_s18 = scalar_lea.vmem %s1242_s6, %s1246_s1 }
   0xd   : > { %851 = vmatpush3.msra.mxu0 %v319_v0  ;;  %946 = vmatpush3.msra.mxu1 %v319_v0  ;;  %s1047_s11 = scalar_lea.vmem %s1236_s0, %s797_s30  ;;  %v313_v7 = vld [vmem:[%s1239_s3 + $0x48] sm:$0xff]  ;;  %v312_v8 = vld [vmem:[%s1239_s3 + $0x40] sm:$0xff]  ;;  %v311_v9 = vld [vmem:[%s1239_s3 + $0x38] sm:$0xff]  ;;  %s1119_s15 = scalar_lea.vmem %s1240_s4, %s797_s30 }
   0xe   : > { %852 = vmatprep.subr.mxu0 %v318_v1  ;;  %931 = vmatprep.subr.mxu1 %v318_v1  ;;  %v272_v5 = vld [vmem:[%s1047_s11] sm:$0xff]  ;;  %v310_v10 = vld [vmem:[%s1239_s3 + $0x30] sm:$0xff]  ;;  %v309_v11 = vld [vmem:[%s1239_s3 + $0x28] sm:$0xff] }
   0xf   : > { %853 = vmatpush3.msra.mxu0 %v318_v1  ;;  %947 = vmatpush3.msra.mxu1 %v318_v1  ;;  %v308_v12 = vld [vmem:[%s1239_s3 + $0x20] sm:$0xff]  ;;  %v307_v13 = vld [vmem:[%s1239_s3 + $0x18] sm:$0xff]  ;;  %v306_v14 = vld [vmem:[%s1239_s3 + $0x10] sm:$0xff] }
  0x10   : > { %854 = vmatprep.subr.mxu0 %v317_v2  ;;  %932 = vmatprep.subr.mxu1 %v317_v2  ;;  %v305_v15 = vld [vmem:[%s1239_s3 + $0x8] sm:$0xff]  ;;  %v304_v16 = vld [vmem:[%s1239_s3] sm:$0xff]  ;;  %v274_v18 = vld [vmem:[%s1047_s11 + $0x10] sm:$0xff] }
  0x11   : > { %855 = vmatpush3.msra.mxu0 %v317_v2  ;;  %948 = vmatpush3.msra.mxu1 %v317_v2  ;;  %v273_v17 = vld [vmem:[%s1047_s11 + $0x8] sm:$0xff]  ;;  %v288_v19 = vld [vmem:[%s1047_s11 + $0x80] sm:$0xff]  ;;  %v290_v21 = vld [vmem:[%s1047_s11 + $0x90] sm:$0xff] }
  0x12   : > { %856 = vmatprep.subr.mxu0 %v316_v3  ;;  %933 = vmatprep.subr.mxu1 %v316_v3  ;;  %v289_v20 = vld [vmem:[%s1047_s11 + $0x88] sm:$0xff]  ;;  %v275_v22 = vld [vmem:[%s1047_s11 + $0x18] sm:$0xff]  ;;  %v276_v23 = vld [vmem:[%s1047_s11 + $0x20] sm:$0xff] }
  0x13   : > { %857 = vmatpush3.msra.mxu0 %v316_v3  ;;  %882 = vmatprep.mubr.f32.mxu0 %v272_v5  ;;  %v291_v24 = vld [vmem:[%s1047_s11 + $0x98] sm:$0xff]  ;;  %v292_v25 = vld [vmem:[%s1047_s11 + $0xa0] sm:$0xff]  ;;  %v277_v26 = vld [vmem:[%s1047_s11 + $0x28] sm:$0xff] }
  0x14   : > { %858 = vmatprep.subr.mxu0 %v315_v4  ;;  %949 = vmatpush3.msra.mxu1 %v316_v3  ;;  %v278_v27 = vld [vmem:[%s1047_s11 + $0x30] sm:$0xff]  ;;  %v293_v28 = vld [vmem:[%s1047_s11 + $0xa8] sm:$0xff]  ;;  %v279_v30 = vld [vmem:[%s1047_s11 + $0x38] sm:$0xff] }
  0x15   : > { %859 = vmatpush3.msra.mxu0 %v315_v4  ;;  %934 = vmatprep.subr.mxu1 %v315_v4  ;;  %v294_v29 = vld [vmem:[%s1047_s11 + $0xb0] sm:$0xff]  ;;  %v280_v31 = vld [vmem:[%s1047_s11 + $0x40] sm:$0xff]  ;;  %v295_v32 = vld [vmem:[%s1047_s11 + $0xb8] sm:$0xff] }
  0x16   : > { %860 = vmatprep.subr.mxu0 %v314_v6  ;;  %950 = vmatpush3.msra.mxu1 %v315_v4  ;;  %v296_v33 = vld [vmem:[%s1047_s11 + $0xc0] sm:$0xff]  ;;  %v281_v34 = vld [vmem:[%s1047_s11 + $0x48] sm:$0xff]  ;;  %v282_v35 = vld [vmem:[%s1047_s11 + $0x50] sm:$0xff] }
  0x17   : > { %861 = vmatpush3.msra.mxu0 %v314_v6  ;;  %935 = vmatprep.subr.mxu1 %v314_v6  ;;  %v297_v36 = vld [vmem:[%s1047_s11 + $0xc8] sm:$0xff]  ;;  %v298_v37 = vld [vmem:[%s1047_s11 + $0xd0] sm:$0xff]  ;;  %v283_v38 = vld [vmem:[%s1047_s11 + $0x58] sm:$0xff] }
  0x18   : > { %862 = vmatprep.subr.mxu0 %v313_v7  ;;  %951 = vmatpush3.msra.mxu1 %v314_v6  ;;  %v284_v39 = vld [vmem:[%s1047_s11 + $0x60] sm:$0xff]  ;;  %v299_v40 = vld [vmem:[%s1047_s11 + $0xd8] sm:$0xff]  ;;  %v285_v42 = vld [vmem:[%s1047_s11 + $0x68] sm:$0xff] }
  0x19   : > { %863 = vmatpush3.msra.mxu0 %v313_v7  ;;  %936 = vmatprep.subr.mxu1 %v313_v7  ;;  %v300_v41 = vld [vmem:[%s1047_s11 + $0xe0] sm:$0xff]  ;;  %v286_v43 = vld [vmem:[%s1047_s11 + $0x70] sm:$0xff]  ;;  %v301_v44 = vld [vmem:[%s1047_s11 + $0xe8] sm:$0xff] }
  0x1a   : > { %864 = vmatprep.subr.mxu0 %v312_v8  ;;  %952 = vmatpush3.msra.mxu1 %v313_v7  ;;  %v302_v45 = vld [vmem:[%s1047_s11 + $0xf0] sm:$0xff]  ;;  %v287_v46 = vld [vmem:[%s1047_s11 + $0x78] sm:$0xff] }
  0x1b   : > { %865 = vmatpush3.msra.mxu0 %v312_v8  ;;  %937 = vmatprep.subr.mxu1 %v312_v8  ;;  %v303_v47 = vld [vmem:[%s1047_s11 + $0xf8] sm:$0xff]  ;;  %s268_s11 = scalar_lea.vmem %s1241_s5, %s1246_s1 }
  0x1c   : > { %866 = vmatprep.subr.mxu0 %v311_v9  ;;  %953 = vmatpush3.msra.mxu1 %v312_v8 }
  0x1d   : > { %867 = vmatpush3.msra.mxu0 %v311_v9  ;;  %938 = vmatprep.subr.mxu1 %v311_v9 }
  0x1e   : > { %868 = vmatprep.subr.mxu0 %v310_v10  ;;  %954 = vmatpush3.msra.mxu1 %v311_v9 }
  0x1f   : > { %869 = vmatpush3.msra.mxu0 %v310_v10  ;;  %939 = vmatprep.subr.mxu1 %v310_v10 }
  0x20   : > { %870 = vmatprep.subr.mxu0 %v309_v11  ;;  %955 = vmatpush3.msra.mxu1 %v310_v10 }
  0x21   : > { %871 = vmatpush3.msra.mxu0 %v309_v11  ;;  %940 = vmatprep.subr.mxu1 %v309_v11 }
  0x22   : > { %872 = vmatprep.subr.mxu0 %v308_v12  ;;  %956 = vmatpush3.msra.mxu1 %v309_v11 }
  0x23   : > { %873 = vmatpush3.msra.mxu0 %v308_v12  ;;  %941 = vmatprep.subr.mxu1 %v308_v12 }
  0x24   : > { %874 = vmatprep.subr.mxu0 %v307_v13  ;;  %957 = vmatpush3.msra.mxu1 %v308_v12 }
  0x25   : > { %875 = vmatpush3.msra.mxu0 %v307_v13  ;;  %942 = vmatprep.subr.mxu1 %v307_v13 }
  0x26   : > { %876 = vmatprep.subr.mxu0 %v306_v14  ;;  %958 = vmatpush3.msra.mxu1 %v307_v13 }
  0x27   : > { %877 = vmatpush3.msra.mxu0 %v306_v14  ;;  %943 = vmatprep.subr.mxu1 %v306_v14 }
  0x28   : > { %878 = vmatprep.subr.mxu0 %v305_v15  ;;  %959 = vmatpush3.msra.mxu1 %v306_v14 }
  0x29   : > { %879 = vmatpush3.msra.mxu0 %v305_v15  ;;  %944 = vmatprep.subr.mxu1 %v305_v15 }
  0x2a   : > { %880 = vmatprep.subr.mxu0 %v304_v16  ;;  %960 = vmatpush3.msra.mxu1 %v305_v15 }
  0x2b   : > { %881 = vmatpush3.msra.mxu0 %v304_v16  ;;  %945 = vmatprep.subr.mxu1 %v304_v16 }
  0x2c   : > { %883 = vmatmul.mubr.f32.vlgmr.msra.gmra.mxu0 %v273_v17  ;;  %961 = vmatpush3.msra.mxu1 %v304_v16 }
  0x2d   : > { %885 = vmatprep.mubr.f32.mxu0 %v274_v18  ;;  %906 = vmatprep.mubr.f32.mxu1 %v288_v19 }
  0x2e   : > { %907 = vmatmul.mubr.f32.vlgmr.msra.gmra.mxu1 %v289_v20 }
  0x2f   : > { %909 = vmatprep.mubr.f32.mxu1 %v290_v21 }
  0x30   : > { %886 = vmatmul.mubr.f32.gmra.mxu0 %v275_v22 }
  0x31   : > { %888 = vmatprep.mubr.f32.mxu0 %v276_v23 }
  0x32   : > { %910 = vmatmul.mubr.f32.gmra.mxu1 %v291_v24 }
  0x33   : > { %912 = vmatprep.mubr.f32.mxu1 %v292_v25 }
  0x34   : > { %889 = vmatmul.mubr.f32.gmra.mxu0 %v277_v26 }
  0x35   : > { %891 = vmatprep.mubr.f32.mxu0 %v278_v27 }
  0x36   : > { %913 = vmatmul.mubr.f32.gmra.mxu1 %v293_v28 }
  0x37   : > { %915 = vmatprep.mubr.f32.mxu1 %v294_v29 }
  0x38   : > { %892 = vmatmul.mubr.f32.gmra.mxu0 %v279_v30 }
  0x39   : > { %894 = vmatprep.mubr.f32.mxu0 %v280_v31 }
  0x3a   : > { %916 = vmatmul.mubr.f32.gmra.mxu1 %v295_v32 }
  0x3b   : > { %918 = vmatprep.mubr.f32.mxu1 %v296_v33 }
  0x3c   : > { %895 = vmatmul.mubr.f32.gmra.mxu0 %v281_v34 }
  0x3d   : > { %897 = vmatprep.mubr.f32.mxu0 %v282_v35 }
  0x3e   : > { %919 = vmatmul.mubr.f32.gmra.mxu1 %v297_v36 }
  0x3f   : > { %921 = vmatprep.mubr.f32.mxu1 %v298_v37 }
  0x40   : > { %898 = vmatmul.mubr.f32.gmra.mxu0 %v283_v38 }
  0x41   : > { %900 = vmatprep.mubr.f32.mxu0 %v284_v39 }
  0x42   : > { %922 = vmatmul.mubr.f32.gmra.mxu1 %v299_v40 }
  0x43   : > { %924 = vmatprep.mubr.f32.mxu1 %v300_v41 }
  0x44   : > { %901 = vmatmul.mubr.f32.gmra.mxu0 %v285_v42 }
  0x45   : > { %903 = vmatprep.mubr.f32.mxu0 %v286_v43 }
  0x46   : > { %925 = vmatmul.mubr.f32.gmra.mxu1 %v301_v44 }
  0x47   : > { %927 = vmatprep.mubr.f32.mxu1 %v302_v45 }
  0x48   : > { %904 = vmatmul.mubr.f32.gmra.mxu0 %v287_v46 }
  0x4a   : > { %928 = vmatmul.mubr.f32.gmra.mxu1 %v303_v47 }
  0xec   : > { %v884_v48 = vpop.f32.mrf.mxu0 }
  0xed   : > { %546 = vst [vmem:[%s1119_s15 + $0x8] sm:$0xff] %v884_v48  ;;  %v616_v54 = vmul.f32 %v884_v48, %v884_v48 }
  0xee   : > { %v386_v49 = vpop.f32.mrf.mxu0  ;;  %v1122_v50 = vpop.f32.mrf.mxu1 }
  0xef   : > { %545 = vst [vmem:[%s1119_s15] sm:$0xff] %v386_v49  ;;  %v615_v51 = vmul.f32 %v386_v49, %v386_v49  ;;  %562 = vst [vmem:[%s1119_s15 + $0x88] sm:$0xff] %v1122_v50  ;;  %v577_v55 = vadd.f32 %v884_v48, %v386_v49 }
  0xf0   : > { %v887_v52 = vpop.f32.mrf.mxu0  ;;  %v1127_v53 = vpop.f32.mrf.mxu1 }
  0xf1   : > { %548 = vst [vmem:[%s1119_s15 + $0x18] sm:$0xff] %v887_v52  ;;  %561 = vst [vmem:[%s1119_s15 + $0x80] sm:$0xff] %v1127_v53  ;;  %v647_v58 = vadd.f32 %v616_v54, %v615_v51  ;;  %v618_v63 = vmul.f32 %v887_v52, %v887_v52 }
  0xf2   : > { %v396_v56 = vpop.f32.mrf.mxu0  ;;  %v1132_v57 = vpop.f32.mrf.mxu1 }
  0xf3   : > { %547 = vst [vmem:[%s1119_s15 + $0x10] sm:$0xff] %v396_v56  ;;  %v578_v59 = vadd.f32 %v577_v55, %v396_v56  ;;  %v617_v60 = vmul.f32 %v396_v56, %v396_v56  ;;  %564 = vst [vmem:[%s1119_s15 + $0x98] sm:$0xff] %v1132_v57 }
  0xf4   : > { %v890_v61 = vpop.f32.mrf.mxu0  ;;  %v1137_v62 = vpop.f32.mrf.mxu1 }
  0xf5   : > { %v648_v0 = vadd.f32 %v647_v58, %v617_v60  ;;  %550 = vst [vmem:[%s1119_s15 + $0x28] sm:$0xff] %v890_v61  ;;  %v579_v1 = vadd.f32 %v887_v52, %v578_v59  ;;  %563 = vst [vmem:[%s1119_s15 + $0x90] sm:$0xff] %v1137_v62  ;;  %v620_v9 = vmul.f32 %v890_v61, %v890_v61 }
  0xf6   : > { %v406_v2 = vpop.f32.mrf.mxu0  ;;  %v1142_v3 = vpop.f32.mrf.mxu1 }
  0xf7   : > { %549 = vst [vmem:[%s1119_s15 + $0x20] sm:$0xff] %v406_v2  ;;  %v580_v4 = vadd.f32 %v579_v1, %v406_v2  ;;  %v619_v5 = vmul.f32 %v406_v2, %v406_v2  ;;  %v649_v6 = vadd.f32 %v648_v0, %v618_v63  ;;  %566 = vst [vmem:[%s1119_s15 + $0xa8] sm:$0xff] %v1142_v3 }
  0xf8   : > { %v893_v7 = vpop.f32.mrf.mxu0  ;;  %v1147_v8 = vpop.f32.mrf.mxu1 }
  0xf9   : > { %v650_v10 = vadd.f32 %v649_v6, %v619_v5  ;;  %552 = vst [vmem:[%s1119_s15 + $0x38] sm:$0xff] %v893_v7  ;;  %v581_v11 = vadd.f32 %v890_v61, %v580_v4  ;;  %565 = vst [vmem:[%s1119_s15 + $0xa0] sm:$0xff] %v1147_v8  ;;  %v622_v19 = vmul.f32 %v893_v7, %v893_v7 }
  0xfa   : > { %v416_v12 = vpop.f32.mrf.mxu0  ;;  %v1152_v13 = vpop.f32.mrf.mxu1  ;;  %v631_v4 = vmul.f32 %v1127_v53, %v1127_v53  ;;  %v632_v5 = vmul.f32 %v1122_v50, %v1122_v50 }
  0xfb   : > { %551 = vst [vmem:[%s1119_s15 + $0x30] sm:$0xff] %v416_v12  ;;  %v582_v14 = vadd.f32 %v581_v11, %v416_v12  ;;  %v621_v15 = vmul.f32 %v416_v12, %v416_v12  ;;  %v651_v16 = vadd.f32 %v650_v10, %v620_v9  ;;  %568 = vst [vmem:[%s1119_s15 + $0xb8] sm:$0xff] %v1152_v13 }
  0xfc   : > { %v896_v17 = vpop.f32.mrf.mxu0  ;;  %v1157_v18 = vpop.f32.mrf.mxu1  ;;  %v633_v10 = vmul.f32 %v1137_v62, %v1137_v62  ;;  %v634_v12 = vmul.f32 %v1132_v57, %v1132_v57 }
  0xfd   : > { %v652_v20 = vadd.f32 %v651_v16, %v621_v15  ;;  %554 = vst [vmem:[%s1119_s15 + $0x48] sm:$0xff] %v896_v17  ;;  %v583_v21 = vadd.f32 %v893_v7, %v582_v14  ;;  %567 = vst [vmem:[%s1119_s15 + $0xb0] sm:$0xff] %v1157_v18  ;;  %v624_v29 = vmul.f32 %v896_v17, %v896_v17 }
  0xfe   : > { %v426_v22 = vpop.f32.mrf.mxu0  ;;  %v1162_v23 = vpop.f32.mrf.mxu1  ;;  %v635_v16 = vmul.f32 %v1147_v8, %v1147_v8 }
  0xff   : > { %553 = vst [vmem:[%s1119_s15 + $0x40] sm:$0xff] %v426_v22  ;;  %v584_v24 = vadd.f32 %v583_v21, %v426_v22  ;;  %v623_v25 = vmul.f32 %v426_v22, %v426_v22  ;;  %v653_v26 = vadd.f32 %v652_v20, %v622_v19  ;;  %570 = vst [vmem:[%s1119_s15 + $0xc8] sm:$0xff] %v1162_v23 }
 0x100   : > { %v899_v27 = vpop.f32.mrf.mxu0  ;;  %v1167_v28 = vpop.f32.mrf.mxu1  ;;  %v637_v21 = vmul.f32 %v1157_v18, %v1157_v18 }
 0x101   : > { %v654_v30 = vadd.f32 %v653_v26, %v623_v25  ;;  %556 = vst [vmem:[%s1119_s15 + $0x58] sm:$0xff] %v899_v27  ;;  %v585_v31 = vadd.f32 %v896_v17, %v584_v24  ;;  %569 = vst [vmem:[%s1119_s15 + $0xc0] sm:$0xff] %v1167_v28  ;;  %v626_v39 = vmul.f32 %v899_v27, %v899_v27 }
 0x102   : > { %v436_v32 = vpop.f32.mrf.mxu0  ;;  %v1172_v33 = vpop.f32.mrf.mxu1  ;;  %v639_v26 = vmul.f32 %v1167_v28, %v1167_v28 }
 0x103   : > { %555 = vst [vmem:[%s1119_s15 + $0x50] sm:$0xff] %v436_v32  ;;  %v586_v34 = vadd.f32 %v585_v31, %v436_v32  ;;  %v625_v35 = vmul.f32 %v436_v32, %v436_v32  ;;  %v655_v36 = vadd.f32 %v654_v30, %v624_v29  ;;  %572 = vst [vmem:[%s1119_s15 + $0xd8] sm:$0xff] %v1172_v33 }
 0x104   : > { %v902_v37 = vpop.f32.mrf.mxu0  ;;  %v516_v38 = vpop.f32.mrf.mxu1 }
 0x105   : > { %v656_v40 = vadd.f32 %v655_v36, %v625_v35  ;;  %558 = vst [vmem:[%s1119_s15 + $0x68] sm:$0xff] %v902_v37  ;;  %v587_v41 = vadd.f32 %v899_v27, %v586_v34  ;;  %571 = vst [vmem:[%s1119_s15 + $0xd0] sm:$0xff] %v516_v38  ;;  %v628_v49 = vmul.f32 %v902_v37, %v902_v37 }
 0x106   : > { %v446_v42 = vpop.f32.mrf.mxu0  ;;  %v1179_v43 = vpop.f32.mrf.mxu1  ;;  %v641_v31 = vmul.f32 %v516_v38, %v516_v38  ;;  %v642_v34 = vmul.f32 %v1172_v33, %v1172_v33 }
 0x107   : > { %557 = vst [vmem:[%s1119_s15 + $0x60] sm:$0xff] %v446_v42  ;;  %v588_v44 = vadd.f32 %v587_v41, %v446_v42  ;;  %v627_v45 = vmul.f32 %v446_v42, %v446_v42  ;;  %v657_v46 = vadd.f32 %v656_v40, %v626_v39  ;;  %574 = vst [vmem:[%s1119_s15 + $0xe8] sm:$0xff] %v1179_v43 }
 0x108   : > { %v905_v47 = vpop.f32.mrf.mxu0  ;;  %v526_v48 = vpop.f32.mrf.mxu1  ;;  %v644_v39 = vmul.f32 %v1179_v43, %v1179_v43 }
 0x109   : > { %v658_v51 = vadd.f32 %v657_v46, %v627_v45  ;;  %560 = vst [vmem:[%s1119_s15 + $0x78] sm:$0xff] %v905_v47  ;;  %v589_v52 = vadd.f32 %v902_v37, %v588_v44  ;;  %573 = vst [vmem:[%s1119_s15 + $0xe0] sm:$0xff] %v526_v48  ;;  %v630_v61 = vmul.f32 %v905_v47, %v905_v47 }
 0x10a   : > { %v456_v54 = vpop.f32.mrf.mxu0  ;;  %v929_v55 = vpop.f32.mrf.mxu1  ;;  %v643_v37 = vmul.f32 %v526_v48, %v526_v48 }
 0x10b   : > { %559 = vst [vmem:[%s1119_s15 + $0x70] sm:$0xff] %v456_v54  ;;  %v590_v56 = vadd.f32 %v589_v52, %v456_v54  ;;  %v629_v58 = vmul.f32 %v456_v54, %v456_v54  ;;  %v659_v59 = vadd.f32 %v658_v51, %v628_v49  ;;  %576 = vst [vmem:[%s1119_s15 + $0xf8] sm:$0xff] %v929_v55 }
 0x10c   : > { %v536_v60 = vpop.f32.mrf.mxu1  ;;  %v646_v44 = vmul.f32 %v929_v55, %v929_v55 }
 0x10d   : > { %v591_v63 = vadd.f32 %v905_v47, %v590_v56  ;;  %v660_v0 = vadd.f32 %v659_v59, %v629_v58  ;;  %575 = vst [vmem:[%s1119_s15 + $0xf0] sm:$0xff] %v536_v60 }
 0x10f   : > { %v661_v1 = vadd.f32 %v660_v0, %v630_v61  ;;  %v592_v2 = vadd.f32 %v591_v63, %v1127_v53 }
 0x111   : > { %v662_v6 = vadd.f32 %v661_v1, %v631_v4  ;;  %v593_v7 = vadd.f32 %v1122_v50, %v592_v2  ;;  %v636_v50 = vmul.f32 %v1142_v3, %v1142_v3 }
 0x113   : > { %v594_v9 = vadd.f32 %v593_v7, %v1137_v62  ;;  %v663_v11 = vadd.f32 %v662_v6, %v632_v5 }
 0x115   : > { %v664_v14 = vadd.f32 %v663_v11, %v633_v10  ;;  %v595_v15 = vadd.f32 %v1132_v57, %v594_v9  ;;  %v638_v57 = vmul.f32 %v1152_v13, %v1152_v13 }
 0x117   : > { %v596_v53 = vadd.f32 %v595_v15, %v1147_v8  ;;  %v665_v17 = vadd.f32 %v664_v14, %v634_v12 }
 0x119   : > { %v666_v19 = vadd.f32 %v665_v17, %v635_v16  ;;  %v597_v20 = vadd.f32 %v1142_v3, %v596_v53  ;;  %v640_v3 = vmul.f32 %v1162_v23, %v1162_v23 }
 0x11b   : > { %v598_v62 = vadd.f32 %v597_v20, %v1157_v18  ;;  %v667_v22 = vadd.f32 %v666_v19, %v636_v50 }
 0x11d   : > { %v668_v24 = vadd.f32 %v667_v22, %v637_v21  ;;  %v599_v25 = vadd.f32 %v1152_v13, %v598_v62 }
 0x11f   : > { %v600_v8 = vadd.f32 %v599_v25, %v1167_v28  ;;  %v669_v27 = vadd.f32 %v668_v24, %v638_v57 }
 0x121   : > { %v670_v29 = vadd.f32 %v669_v27, %v639_v26  ;;  %v601_v30 = vadd.f32 %v1162_v23, %v600_v8 }
 0x123   : > { %v602_v18 = vadd.f32 %v601_v30, %v516_v38  ;;  %v671_v32 = vadd.f32 %v670_v29, %v640_v3  ;;  %v645_v38 = vmul.f32 %v536_v60, %v536_v60 }
 0x125   : > { %v672_v35 = vadd.f32 %v671_v32, %v641_v31  ;;  %v603_v13 = vadd.f32 %v1172_v33, %v602_v18 }
 0x127   : > { %v604_v36 = vadd.f32 %v603_v13, %v526_v48  ;;  %v673_v28 = vadd.f32 %v672_v35, %v642_v34 }
 0x129   : > { %v674_v40 = vadd.f32 %v673_v28, %v643_v37  ;;  %v605_v23 = vadd.f32 %v1179_v43, %v604_v36 }
 0x12b   : > { %v606_v41 = vadd.f32 %v605_v23, %v536_v60  ;;  %v675_v42 = vadd.f32 %v674_v40, %v644_v39 }
 0x12d   : > { %v607_v45 = vadd.f32 %v929_v55, %v606_v41  ;;  %v676_v46 = vadd.f32 %v675_v42, %v645_v38 }
 0x12f   : > { %v608_v47 = vrot.slane %v607_v45, 4  ;;  %v677_v49 = vadd.f32 %v676_v46, %v646_v44 }
 0x131   : > { %v609_v33 = vadd.f32 %v608_v47, %v607_v45  ;;  %v678_v51 = vrot.slane %v677_v49, 4 }
 0x133   : > { %v610_v48 = vrot.slane %v609_v33, 2  ;;  %v679_v52 = vadd.f32 %v678_v51, %v677_v49 }
 0x135   : > { %v611_v54 = vadd.f32 %v610_v48, %v609_v33  ;;  %v680_v56 = vrot.slane %v679_v52, 2 }
 0x137   : > { %v612_v58 = vrot.slane %v611_v54, 1  ;;  %v681_v59 = vadd.f32 %v680_v56, %v679_v52 }
 0x139   : > { %v613_v43 = vadd.f32 %v612_v58, %v611_v54  ;;  %v682_v60 = vrot.slane %v681_v59, 1 }
 0x13b   : > { %614 = vst [vmem:[%s268_s11] sm:$0x1] %v613_v43  ;;  %v683_v55 = vadd.f32 %v682_v60, %v681_v59 }
 0x13d   : > { %684 = vst [vmem:[%s271_s18] sm:$0x1] %v683_v55 }
 0x13e PF: > { %s17_s21 = sadd.s32 1, %s976_s21  }
 0x13f   : > { %p14_p5 = scmp.ge.s32.totalorder %s17_s21, 4  }
 0x141   :  { %16 = sbr.rel (!%p14_p5) target bundleno = 1 (0x1), region = 90 }

// kernel: res_bottleneck_block.8
= control target key start
LH: loop header
LB: loop body
LE: loop exit
PB: predicated region body
PF: predicated region fallthrough
CT: control target
= control target key end

     0   :  { %s753_s21 = smov 0   ;;  %s862_s0 = inlined_call_operand.vmem [shape: f32[128,128], index: 0, kind: input, shape index: {}]   ;;  %s863_s1 = inlined_call_operand.vmem [shape: f32[1,128], index: 1, kind: input, shape index: {}]   ;;  %s864_s2 = inlined_call_operand.vmem [shape: f32[1,128], index: 2, kind: input, shape index: {}]   ;;  %s865_s3 = inlined_call_operand.vmem [shape: f32[128,128], index: 3, kind: input, shape index: {}]   ;;  %s866_s4 = inlined_call_operand.vmem [shape: f32[128,128], index: 4, kind: output, shape index: {0}]   ;;  %s867_s5 = inlined_call_operand.vmem [shape: f32[2,1,128], index: 5, kind: output, shape index: {1}]   ;;  %s868_s6 = inlined_call_operand.vmem [shape: f32[2,1,128], index: 6, kind: output, shape index: {2}]  }
   0x1 LB: > { %s759_s22 = sadd.s32 4294967295, %s716_s21   ;;  %p593_p0 = scmp.ge.s32.totalorder %s716_s21, 1  ;;  %s716_s21 = sphi %s753_s21, %s17_s21  }
   0x2   : > { %p218_p1 = scmp.lt.s32.totalorder %s716_s21, 3 }
   0x4   : > { %p219_p2 = pnand %p593_p0, %p218_p1 }
   0x5   : > { %s594_s27 = sshll.u32 (!%p219_p2), %s759_s22, 3  ;;  %p266_p4 = scmp.lt.s32.totalorder (!%p219_p2), %s759_s22, 1 }
   0x6   : > { %222 = sbr.rel (%p219_p2) target bundleno = 270 (0x10e), region = 36  ;;  %p255_p3 = scmp.lt.s32.totalorder (!%p219_p2), %s594_s27, 15 }
   0xb   : > { %v333_v0 = vld [vmem:[%s865_s3 + $0x78] sm:$0xff]  ;;  %v332_v1 = vld [vmem:[%s865_s3 + $0x70] sm:$0xff]  ;;  %v331_v2 = vld [vmem:[%s865_s3 + $0x68] sm:$0xff]  ;;  %s870_s27 = smov (!%p255_p3, %s594_s27), 15  ;;  %s872_s22 = smov (!%p266_p4, %s759_s22), 1 }
   0xc   : > { %626 = vmatprep.subr.mxu0 %v333_v0  ;;  %670 = vmatprep.subr.mxu1 %v333_v0  ;;  %v330_v3 = vld [vmem:[%s865_s3 + $0x60] sm:$0xff]  ;;  %v329_v4 = vld [vmem:[%s865_s3 + $0x58] sm:$0xff]  ;;  %s595_s10 = sshll.u32 %s870_s27, 3  ;;  %v328_v5 = vld [vmem:[%s865_s3 + $0x50] sm:$0xff]  ;;  %s268_s25 = scalar_lea.vmem %s867_s5, %s872_s22 }
   0xd   : > { %627 = vmatpush3.msra.mxu0 %v333_v0  ;;  %686 = vmatpush3.msra.mxu1 %v333_v0  ;;  %s790_s15 = scalar_lea.vmem %s862_s0, %s595_s10  ;;  %v327_v6 = vld [vmem:[%s865_s3 + $0x48] sm:$0xff]  ;;  %v326_v7 = vld [vmem:[%s865_s3 + $0x40] sm:$0xff]  ;;  %v325_v10 = vld [vmem:[%s865_s3 + $0x38] sm:$0xff]  ;;  %s264_s24 = scalar_lea.vmem %s866_s4, %s595_s10 }
   0xe   : > { %628 = vmatprep.subr.mxu0 %v332_v1  ;;  %671 = vmatprep.subr.mxu1 %v332_v1  ;;  %v272_v8 = vld [vmem:[%s790_s15] sm:$0xff]  ;;  %v324_v12 = vld [vmem:[%s865_s3 + $0x30] sm:$0xff]  ;;  %v323_v14 = vld [vmem:[%s865_s3 + $0x28] sm:$0xff]  ;;  %s271_s29 = scalar_lea.vmem %s868_s6, %s872_s22 }
   0xf   : > { %629 = vmatpush3.msra.mxu0 %v332_v1  ;;  %687 = vmatpush3.msra.mxu1 %v332_v1  ;;  %v598_v9 = vld [vmem:[%s863_s1] ss:$0 sm:$0xff]  ;;  %v273_v15 = vld [vmem:[%s790_s15 + $0x8] sm:$0xff]  ;;  %v274_v17 = vld [vmem:[%s790_s15 + $0x10] sm:$0xff] }
  0x10   : > { %630 = vmatprep.subr.mxu0 %v331_v2  ;;  %672 = vmatprep.subr.mxu1 %v331_v2  ;;  %v287_v11 = vmul.f32 %v598_v9, %v272_v8  ;;  %v811_v13 = vld [vmem:[%s864_s2] ss:$0 sm:$0xff]  ;;  %v277_v20 = vld [vmem:[%s790_s15 + $0x28] sm:$0xff]  ;;  %v288_v21 = vmul.f32 %v598_v9, %v273_v15  ;;  %v278_v22 = vld [vmem:[%s790_s15 + $0x30] sm:$0xff]  ;;  %v289_v24 = vmul.f32 %v598_v9, %v274_v17 }
  0x11   : > { %631 = vmatpush3.msra.mxu0 %v331_v2  ;;  %688 = vmatpush3.msra.mxu1 %v331_v2  ;;  %v276_v18 = vld [vmem:[%s790_s15 + $0x20] sm:$0xff]  ;;  %v321_v23 = vld [vmem:[%s865_s3 + $0x18] sm:$0xff]  ;;  %v292_v28 = vmul.f32 %v598_v9, %v277_v20  ;;  %v320_v29 = vld [vmem:[%s865_s3 + $0x10] sm:$0xff]  ;;  %v293_v30 = vmul.f32 %v598_v9, %v278_v22 }
  0x12   : > { %632 = vmatprep.subr.mxu0 %v330_v3  ;;  %673 = vmatprep.subr.mxu1 %v330_v3  ;;  %v302_v16 = vadd.f32 %v811_v13, %v287_v11  ;;  %v322_v19 = vld [vmem:[%s865_s3 + $0x20] sm:$0xff]  ;;  %v275_v25 = vld [vmem:[%s790_s15 + $0x18] sm:$0xff]  ;;  %v291_v26 = vmul.f32 %v598_v9, %v276_v18  ;;  %v303_v32 = vadd.f32 %v811_v13, %v288_v21  ;;  %v319_v34 = vld [vmem:[%s865_s3 + $0x8] sm:$0xff] }
  0x13   : > { %633 = vmatpush3.msra.mxu0 %v330_v3  ;;  %689 = vmatpush3.msra.mxu1 %v330_v3  ;;  %v279_v31 = vld [vmem:[%s790_s15 + $0x38] sm:$0xff]  ;;  %v290_v33 = vmul.f32 %v598_v9, %v275_v25  ;;  %v304_v35 = vadd.f32 %v811_v13, %v289_v24  ;;  %v307_v37 = vadd.f32 %v811_v13, %v292_v28  ;;  %v318_v39 = vld [vmem:[%s865_s3] sm:$0xff] }
  0x14   : > { %634 = vmatprep.subr.mxu0 %v329_v4  ;;  %674 = vmatprep.subr.mxu1 %v329_v4  ;;  %v310_v27 = vmax.f32 %v302_v16, 0.0  ;;  %v306_v36 = vadd.f32 %v811_v13, %v291_v26  ;;  %v294_v38 = vmul.f32 %v598_v9, %v279_v31  ;;  %v308_v40 = vadd.f32 %v811_v13, %v293_v30 }
  0x15   : > { %635 = vmatpush3.msra.mxu0 %v329_v4  ;;  %690 = vmatpush3.msra.mxu1 %v329_v4  ;;  %v311_v41 = vmax.f32 %v303_v32, 0.0  ;;  %v305_v42 = vadd.f32 %v811_v13, %v290_v33  ;;  %v312_v43 = vmax.f32 %v304_v35, 0.0  ;;  %v315_v45 = vmax.f32 %v307_v37, 0.0 }
  0x16   : > { %636 = vmatprep.subr.mxu0 %v328_v5  ;;  %675 = vmatprep.subr.mxu1 %v328_v5  ;;  %v314_v44 = vmax.f32 %v306_v36, 0.0  ;;  %v309_v46 = vadd.f32 %v811_v13, %v294_v38  ;;  %v316_v47 = vmax.f32 %v308_v40, 0.0 }
  0x17   : > { %637 = vmatpush3.msra.mxu0 %v328_v5  ;;  %691 = vmatpush3.msra.mxu1 %v328_v5  ;;  %v313_v48 = vmax.f32 %v305_v42, 0.0 }
  0x18   : > { %638 = vmatprep.subr.mxu0 %v327_v6  ;;  %676 = vmatprep.subr.mxu1 %v327_v6  ;;  %v317_v49 = vmax.f32 %v309_v46, 0.0 }
  0x19   : > { %639 = vmatpush3.msra.mxu0 %v327_v6  ;;  %692 = vmatpush3.msra.mxu1 %v327_v6 }
  0x1a   : > { %640 = vmatprep.subr.mxu0 %v326_v7  ;;  %677 = vmatprep.subr.mxu1 %v326_v7 }
  0x1b   : > { %641 = vmatpush3.msra.mxu0 %v326_v7  ;;  %693 = vmatpush3.msra.mxu1 %v326_v7 }
  0x1c   : > { %642 = vmatprep.subr.mxu0 %v325_v10  ;;  %678 = vmatprep.subr.mxu1 %v325_v10 }
  0x1d   : > { %643 = vmatpush3.msra.mxu0 %v325_v10  ;;  %694 = vmatpush3.msra.mxu1 %v325_v10 }
  0x1e   : > { %644 = vmatprep.subr.mxu0 %v324_v12  ;;  %679 = vmatprep.subr.mxu1 %v324_v12 }
  0x1f   : > { %645 = vmatpush3.msra.mxu0 %v324_v12  ;;  %695 = vmatpush3.msra.mxu1 %v324_v12 }
  0x20   : > { %646 = vmatprep.subr.mxu0 %v323_v14  ;;  %680 = vmatprep.subr.mxu1 %v323_v14 }
  0x21   : > { %647 = vmatpush3.msra.mxu0 %v323_v14  ;;  %696 = vmatpush3.msra.mxu1 %v323_v14 }
  0x22   : > { %648 = vmatprep.subr.mxu0 %v322_v19  ;;  %681 = vmatprep.subr.mxu1 %v322_v19 }
  0x23   : > { %649 = vmatpush3.msra.mxu0 %v322_v19  ;;  %697 = vmatpush3.msra.mxu1 %v322_v19 }
  0x24   : > { %650 = vmatprep.subr.mxu0 %v321_v23  ;;  %682 = vmatprep.subr.mxu1 %v321_v23 }
  0x25   : > { %651 = vmatpush3.msra.mxu0 %v321_v23  ;;  %698 = vmatpush3.msra.mxu1 %v321_v23 }
  0x26   : > { %652 = vmatprep.subr.mxu0 %v320_v29  ;;  %658 = vmatprep.mubr.f32.mxu0 %v310_v27 }
  0x27   : > { %653 = vmatpush3.msra.mxu0 %v320_v29  ;;  %683 = vmatprep.subr.mxu1 %v320_v29 }
  0x28   : > { %654 = vmatprep.subr.mxu0 %v319_v34  ;;  %699 = vmatpush3.msra.mxu1 %v320_v29 }
  0x29   : > { %655 = vmatpush3.msra.mxu0 %v319_v34  ;;  %684 = vmatprep.subr.mxu1 %v319_v34 }
  0x2a   : > { %656 = vmatprep.subr.mxu0 %v318_v39  ;;  %700 = vmatpush3.msra.mxu1 %v319_v34 }
  0x2b   : > { %657 = vmatpush3.msra.mxu0 %v318_v39  ;;  %685 = vmatprep.subr.mxu1 %v318_v39 }
  0x2c   : > { %659 = vmatmul.mubr.f32.vlgmr.msra.gmra.mxu0 %v311_v41  ;;  %701 = vmatpush3.msra.mxu1 %v318_v39 }
  0x2d   : > { %661 = vmatprep.mubr.f32.mxu0 %v312_v43  ;;  %664 = vmatprep.mubr.f32.mxu1 %v314_v44 }
  0x2e   : > { %665 = vmatmul.mubr.f32.vlgmr.msra.gmra.mxu1 %v315_v45 }
  0x2f   : > { %667 = vmatprep.mubr.f32.mxu1 %v316_v47 }
  0x30   : > { %662 = vmatmul.mubr.f32.gmra.mxu0 %v313_v48 }
  0x32   : > { %668 = vmatmul.mubr.f32.gmra.mxu1 %v317_v49 }
  0xec   : > { %v660_v50 = vpop.f32.mrf.mxu0 }
  0xed   : > { %440 = vst [vmem:[%s264_s24 + $0x8] sm:$0xff] %v660_v50  ;;  %v462_v56 = vmul.f32 %v660_v50, %v660_v50 }
  0xee   : > { %v400_v51 = vpop.f32.mrf.mxu0  ;;  %v666_v52 = vpop.f32.mrf.mxu1 }
  0xef   : > { %439 = vst [vmem:[%s264_s24] sm:$0xff] %v400_v51  ;;  %v461_v53 = vmul.f32 %v400_v51, %v400_v51  ;;  %444 = vst [vmem:[%s264_s24 + $0x28] sm:$0xff] %v666_v52  ;;  %v447_v57 = vadd.f32 %v660_v50, %v400_v51  ;;  %v466_v6 = vmul.f32 %v666_v52, %v666_v52 }
  0xf0   : > { %v663_v54 = vpop.f32.mrf.mxu0  ;;  %v420_v55 = vpop.f32.mrf.mxu1 }
  0xf1   : > { %442 = vst [vmem:[%s264_s24 + $0x18] sm:$0xff] %v663_v54  ;;  %443 = vst [vmem:[%s264_s24 + $0x20] sm:$0xff] %v420_v55  ;;  %v469_v60 = vadd.f32 %v462_v56, %v461_v53  ;;  %v464_v0 = vmul.f32 %v663_v54, %v663_v54  ;;  %v465_v5 = vmul.f32 %v420_v55, %v420_v55 }
  0xf2   : > { %v410_v58 = vpop.f32.mrf.mxu0  ;;  %v669_v59 = vpop.f32.mrf.mxu1 }
  0xf3   : > { %441 = vst [vmem:[%s264_s24 + $0x10] sm:$0xff] %v410_v58  ;;  %v448_v61 = vadd.f32 %v447_v57, %v410_v58  ;;  %v463_v62 = vmul.f32 %v410_v58, %v410_v58  ;;  %446 = vst [vmem:[%s264_s24 + $0x38] sm:$0xff] %v669_v59  ;;  %v468_v12 = vmul.f32 %v669_v59, %v669_v59 }
  0xf4   : > { %v430_v63 = vpop.f32.mrf.mxu1 }
  0xf5   : > { %v449_v1 = vadd.f32 %v663_v54, %v448_v61  ;;  %v470_v2 = vadd.f32 %v469_v60, %v463_v62  ;;  %445 = vst [vmem:[%s264_s24 + $0x30] sm:$0xff] %v430_v63  ;;  %v467_v10 = vmul.f32 %v430_v63, %v430_v63 }
  0xf7   : > { %v471_v3 = vadd.f32 %v470_v2, %v464_v0  ;;  %v450_v4 = vadd.f32 %v449_v1, %v420_v55 }
  0xf9   : > { %v472_v7 = vadd.f32 %v471_v3, %v465_v5  ;;  %v451_v8 = vadd.f32 %v666_v52, %v450_v4 }
  0xfb   : > { %v452_v9 = vadd.f32 %v451_v8, %v430_v63  ;;  %v473_v11 = vadd.f32 %v472_v7, %v466_v6 }
  0xfd   : > { %v453_v13 = vadd.f32 %v669_v59, %v452_v9  ;;  %v474_v14 = vadd.f32 %v473_v11, %v467_v10 }
  0xff   : > { %v454_v15 = vrot.slane %v453_v13, 4  ;;  %v475_v16 = vadd.f32 %v474_v14, %v468_v12 }
 0x101   : > { %v455_v17 = vadd.f32 %v454_v15, %v453_v13  ;;  %v476_v18 = vrot.slane %v475_v16, 4 }
 0x103   : > { %v456_v19 = vrot.slane %v455_v17, 2  ;;  %v477_v20 = vadd.f32 %v476_v18, %v475_v16 }
 0x105   : > { %v457_v21 = vadd.f32 %v456_v19, %v455_v17  ;;  %v478_v22 = vrot.slane %v477_v20, 2 }
 0x107   : > { %v458_v23 = vrot.slane %v457_v21, 1  ;;  %v479_v24 = vadd.f32 %v478_v22, %v477_v20 }
 0x109   : > { %v459_v25 = vadd.f32 %v458_v23, %v457_v21  ;;  %v480_v26 = vrot.slane %v479_v24, 1 }
 0x10b   : > { %460 = vst [vmem:[%s268_s25] sm:$0x1] %v459_v25  ;;  %v481_v27 = vadd.f32 %v480_v26, %v479_v24 }
 0x10d   : > { %482 = vst [vmem:[%s271_s29] sm:$0x1] %v481_v27 }
 0x10e PF: > { %s17_s21 = sadd.s32 1, %s716_s21  }
 0x10f   : > { %p14_p5 = scmp.ge.s32.totalorder %s17_s21, 4  }
 0x111   :  { %16 = sbr.rel (!%p14_p5) target bundleno = 1 (0x1), region = 90 }

// kernel: res_bottleneck_block.7
= control target key start
LH: loop header
LB: loop body
LE: loop exit
PB: predicated region body
PF: predicated region fallthrough
CT: control target
= control target key end

     0   :  { %s2872_s24 = smov 0   ;;  %s3852_s0 = inlined_call_operand.vmem [shape: f32[8,9,9,128], index: 0, kind: input, shape index: {}]   ;;  %s3853_s1 = inlined_call_operand.vmem [shape: f32[4,9,9,128], index: 1, kind: input, shape index: {}]   ;;  %s3854_s2 = inlined_call_operand.vmem [shape: f32[1,128], index: 2, kind: input, shape index: {}]   ;;  %s3855_s3 = inlined_call_operand.vmem [shape: f32[1,128], index: 3, kind: input, shape index: {}]   ;;  %s3856_s4 = inlined_call_operand.vmem [shape: f32[9,128,128], index: 4, kind: input, shape index: {}]   ;;  %s3857_s5 = inlined_call_operand.vmem [shape: f32[128,128], index: 5, kind: output, shape index: {0}]   ;;  %s3858_s6 = inlined_call_operand.vmem [shape: f32[2,1,128], index: 6, kind: output, shape index: {1}]   ;;  %s3859_s7 = inlined_call_operand.vmem [shape: f32[2,1,128], index: 7, kind: output, shape index: {2}]  }
   0x1 LB: > { %s2878_s25 = sadd.s32 4294967295, %s2830_s24   ;;  %p2032_p0 = scmp.ge.s32.totalorder %s2830_s24, 1  ;;  %s2830_s24 = sphi %s2872_s24, %s18_s24  }
   0x2   : > { %p244_p1 = scmp.lt.s32.totalorder %s2830_s24, 3 }
   0x4   : > { %p245_p2 = pnand %p2032_p0, %p244_p1 }
   0x6   : > { %248 = sbr.rel (%p245_p2) target bundleno = 433 (0x1b1), region = 40 }
   0xb   : > { %v2054_v0 = vld [vmem:[%s3856_s4 + $0xf8] sm:$0xff]  ;;  %v2053_v2 = vld [vmem:[%s3856_s4 + $0xf0] sm:$0xff]  ;;  %s2033_s9 = sshll.u32 %s2878_s25, 2  ;;  %v2052_v4 = vld [vmem:[%s3856_s4 + $0xe8] sm:$0xff]  ;;  %vm881_vm0 = vcmask 1046528   ;;  %p296_p5 = scmp.lt.s32.totalorder %s2878_s25, 1 }
   0xc   : > { %v637_v1 = vld [vmem:[%s3856_s4 + $0x78] sm:$0xff]  ;;  %2385 = vmatprep.subr.mxu0 %v2054_v0  ;;  %v636_v3 = vld [vmem:[%s3856_s4 + $0x70] sm:$0xff]  ;;  %p284_p3 = scmp.lt.s32.totalorder %s2033_s9, 7  ;;  %v635_v5 = vld [vmem:[%s3856_s4 + $0x68] sm:$0xff] }
   0xd   : > { %2429 = vmatprep.subr.mxu1 %v637_v1  ;;  %2386 = vmatpush3.msra.mxu0 %v2054_v0  ;;  %v2051_v6 = vld [vmem:[%s3856_s4 + $0xe0] sm:$0xff]  ;;  %v2050_v8 = vld [vmem:[%s3856_s4 + $0xd8] sm:$0xff]  ;;  %v2049_v10 = vld [vmem:[%s3856_s4 + $0xd0] sm:$0xff] }
   0xe   : > { %2430 = vmatpush3.msra.mxu1 %v637_v1  ;;  %2387 = vmatprep.subr.mxu0 %v2053_v2  ;;  %s3877_s9 = smov (!%p284_p3, %s2033_s9), 7  ;;  %v634_v7 = vld [vmem:[%s3856_s4 + $0x60] sm:$0xff]  ;;  %v633_v9 = vld [vmem:[%s3856_s4 + $0x58] sm:$0xff]  ;;  %v632_v11 = vld [vmem:[%s3856_s4 + $0x50] sm:$0xff] }
   0xf   : > { %2431 = vmatprep.subr.mxu1 %v636_v3  ;;  %2388 = vmatpush3.msra.mxu0 %v2053_v2  ;;  %s2813_s26 = smul.u32 144, %s3877_s9  ;;  %v2048_v12 = vld [vmem:[%s3856_s4 + $0xc8] sm:$0xff]  ;;  %v2047_v14 = vld [vmem:[%s3856_s4 + $0xc0] sm:$0xff]  ;;  %v2046_v18 = vld [vmem:[%s3856_s4 + $0xb8] sm:$0xff] }
  0x10   : > { %2432 = vmatpush3.msra.mxu1 %v636_v3  ;;  %2389 = vmatprep.subr.mxu0 %v2052_v4  ;;  %v631_v13 = vld [vmem:[%s3856_s4 + $0x48] sm:$0xff]  ;;  %v630_v15 = vld [vmem:[%s3856_s4 + $0x40] sm:$0xff]  ;;  %v629_v19 = vld [vmem:[%s3856_s4 + $0x38] sm:$0xff] }
  0x11   : > { %2433 = vmatprep.subr.mxu1 %v635_v5  ;;  %2390 = vmatpush3.msra.mxu0 %v2052_v4  ;;  %s2928_s14 = scalar_lea.vmem %s3852_s0, %s2813_s26  ;;  %v2939_v16 = vld [vmem:[%s3854_s2] ss:$0 sm:$0xff]  ;;  %v2045_v23 = vld [vmem:[%s3856_s4 + $0xb0] sm:$0xff]  ;;  %v2044_v28 = vld [vmem:[%s3856_s4 + $0xa8] sm:$0xff]  ;;  %s2035_s26 = sshll.u32 %s2878_s25, 3 }
  0x12   : > { %2434 = vmatpush3.msra.mxu1 %v635_v5  ;;  %2391 = vmatprep.subr.mxu0 %v2051_v6  ;;  %v322_v17 = vld [vmem:[%s2928_s14 + $0x90] sm:$0xff]  ;;  %v304_v20 = vld [vmem:[%s2928_s14] sm:$0xff]  ;;  %v627_v29 = vld [vmem:[%s3856_s4 + $0x28] sm:$0xff]  ;;  %p291_p4 = scmp.lt.s32.totalorder %s2035_s26, 15  ;;  %s3881_s25 = smov (!%p296_p5, %s2878_s25), 1 }
  0x13   : > { %2435 = vmatprep.subr.mxu1 %v634_v7  ;;  %2392 = vmatpush3.msra.mxu0 %v2051_v6  ;;  %v323_v21 = vld [vmem:[%s2928_s14 + $0xa0] sm:$0xff]  ;;  %v306_v22 = vld [vmem:[%s2928_s14 + $0x10] sm:$0xff]  ;;  %v379_v25 = vmul.f32 %v2939_v16, %v322_v17  ;;  %v361_v27 = vmul.f32 %v2939_v16, %v304_v20  ;;  %v2042_v36 = vld [vmem:[%s3856_s4 + $0x98] sm:$0xff]  ;;  %s301_s12 = scalar_lea.vmem %s3859_s7, %s3881_s25 }
  0x14   : > { %2436 = vmatpush3.msra.mxu1 %v634_v7  ;;  %2393 = vmatprep.subr.mxu0 %v2050_v8  ;;  %v628_v24 = vld [vmem:[%s3856_s4 + $0x30] sm:$0xff]  ;;  %v2961_v26 = vld [vmem:[%s3855_s3] ss:$0 sm:$0xff]  ;;  %v380_v30 = vmul.f32 %v2939_v16, %v323_v21  ;;  %v363_v31 = vmul.f32 %v2939_v16, %v306_v22  ;;  %v625_v37 = vld [vmem:[%s3856_s4 + $0x18] sm:$0xff]  ;;  %s3879_s26 = smov (!%p291_p4, %s2035_s26), 15 }
  0x15   : > { %2437 = vmatprep.subr.mxu1 %v633_v9  ;;  %2394 = vmatpush3.msra.mxu0 %v2050_v8  ;;  %v2043_v32 = vld [vmem:[%s3856_s4 + $0xa0] sm:$0xff]  ;;  %v436_v34 = vadd.f32 %v2961_v26, %v379_v25  ;;  %v418_v35 = vadd.f32 %v2961_v26, %v361_v27  ;;  %v2041_v40 = vld [vmem:[%s3856_s4 + $0x90] sm:$0xff]  ;;  %v2040_v45 = vld [vmem:[%s3856_s4 + $0x88] sm:$0xff]  ;;  %s2036_s27 = sshll.u32 %s3879_s26, 3 }
  0x16   : > { %2438 = vmatpush3.msra.mxu1 %v633_v9  ;;  %2395 = vmatprep.subr.mxu0 %v2049_v10  ;;  %v626_v33 = vld [vmem:[%s3856_s4 + $0x20] sm:$0xff]  ;;  %v437_v38 = vadd.f32 %v2961_v26, %v380_v30  ;;  %v420_v39 = vadd.f32 %v2961_v26, %v363_v31  ;;  %v624_v41 = vld [vmem:[%s3856_s4 + $0x10] sm:$0xff]  ;;  %v623_v46 = vld [vmem:[%s3856_s4 + $0x8] sm:$0xff]  ;;  %s3829_s30 = scalar_lea.vmem %s3857_s5, %s2036_s27 }
  0x17   : > { %2439 = vmatprep.subr.mxu1 %v632_v11  ;;  %2396 = vmatpush3.msra.mxu0 %v2049_v10  ;;  %v487_v42 = vmax.f32 %v436_v34, 0.0  ;;  %v538_v43 = vld [vmem:[%s3853_s1 + $0x90] sm:$0xff]  ;;  %v469_v44 = vmax.f32 %v418_v35, 0.0  ;;  %v520_v47 = vld [vmem:[%s3853_s1] sm:$0xff]  ;;  %v2070_v58 = vld [vmem:[%s3856_s4 + $0x178] sm:$0xff] }
  0x18   : > { %2440 = vmatpush3.msra.mxu1 %v632_v11  ;;  %2397 = vmatprep.subr.mxu0 %v2048_v12  ;;  %v488_v48 = vmax.f32 %v437_v38, 0.0  ;;  %v471_v49 = vmax.f32 %v420_v39, 0.0  ;;  %v539_v50 = vld [vmem:[%s3853_s1 + $0xa0] sm:$0xff]  ;;  %v522_v51 = vld [vmem:[%s3853_s1 + $0x10] sm:$0xff]  ;;  %v2086_v59 = vld [vmem:[%s3856_s4 + $0x1f8] sm:$0xff] }
  0x19   : > { %2441 = vmatprep.subr.mxu1 %v631_v13  ;;  %2398 = vmatpush3.msra.mxu0 %v2048_v12  ;;  %v2039_v52 = vld [vmem:[%s3856_s4 + $0x80] sm:$0xff]  ;;  %v589_v54 = vmul.f32 %v538_v43, %v487_v42  ;;  %v3018_v55 = vmul.f32 %v520_v47, %v469_v44  ;;  %v324_v60 = vld [vmem:[%s2928_s14 + $0xb0] sm:$0xff]  ;;  %v2068_v2 = vld [vmem:[%s3856_s4 + $0x168] sm:$0xff] }
  0x1a   : > { %2442 = vmatpush3.msra.mxu1 %v631_v13  ;;  %2399 = vmatprep.subr.mxu0 %v2047_v14  ;;  %v622_v53 = vld [vmem:[%s3856_s4] sm:$0xff]  ;;  %v3020_v56 = vmul.f32 %v539_v50, %v488_v48  ;;  %v3022_v57 = vmul.f32 %v522_v51, %v471_v49  ;;  %v2069_v62 = vld [vmem:[%s3856_s4 + $0x170] sm:$0xff]  ;;  %v381_v0 = vmul.f32 %v2939_v16, %v324_v60  ;;  %v2084_v3 = vld [vmem:[%s3856_s4 + $0x1e8] sm:$0xff] }
  0x1b   : > { %2443 = vmatprep.subr.mxu1 %v630_v15  ;;  %2400 = vmatpush3.msra.mxu0 %v2047_v14  ;;  %v308_v61 = vld [vmem:[%s2928_s14 + $0x20] sm:$0xff]  ;;  %v2085_v63 = vld [vmem:[%s3856_s4 + $0x1f0] sm:$0xff]  ;;  %v2066_v13 = vld [vmem:[%s3856_s4 + $0x158] sm:$0xff] }
  0x1c   : > { %2444 = vmatpush3.msra.mxu1 %v630_v15  ;;  %2401 = vmatprep.subr.mxu0 %v2046_v18  ;;  %v325_v1 = vld [vmem:[%s2928_s14 + $0xc0] sm:$0xff]  ;;  %v365_v4 = vmul.f32 %v2939_v16, %v308_v61  ;;  %v310_v5 = vld [vmem:[%s2928_s14 + $0x30] sm:$0xff]  ;;  %v438_v9 = vadd.f32 %v2961_v26, %v381_v0  ;;  %v2082_v14 = vld [vmem:[%s3856_s4 + $0x1d8] sm:$0xff] }
  0x1d   : > { %2445 = vmatprep.subr.mxu1 %v629_v19  ;;  %2402 = vmatpush3.msra.mxu0 %v2046_v18  ;;  %v2067_v6 = vld [vmem:[%s3856_s4 + $0x160] sm:$0xff]  ;;  %v382_v8 = vmul.f32 %v2939_v16, %v325_v1  ;;  %v367_v10 = vmul.f32 %v2939_v16, %v310_v5  ;;  %v326_v11 = vld [vmem:[%s2928_s14 + $0xd0] sm:$0xff]  ;;  %v2062_v38 = vld [vmem:[%s3856_s4 + $0x138] sm:$0xff] }
  0x1e   : > { %2446 = vmatpush3.msra.mxu1 %v629_v19  ;;  %2403 = vmatprep.subr.mxu0 %v2045_v23  ;;  %v2083_v7 = vld [vmem:[%s3856_s4 + $0x1e0] sm:$0xff]  ;;  %v422_v15 = vadd.f32 %v2961_v26, %v365_v4  ;;  %v2065_v17 = vld [vmem:[%s3856_s4 + $0x150] sm:$0xff]  ;;  %v383_v20 = vmul.f32 %v2939_v16, %v326_v11  ;;  %v489_v25 = vmax.f32 %v438_v9, 0.0  ;;  %v305_v42 = vld [vmem:[%s2928_s14 + $0x8] sm:$0x1] }
  0x1f   : > { %2447 = vmatprep.subr.mxu1 %v628_v24  ;;  %2404 = vmatpush3.msra.mxu0 %v2045_v23  ;;  %v312_v12 = vld [vmem:[%s2928_s14 + $0x40] sm:$0xff]  ;;  %v2081_v18 = vld [vmem:[%s3856_s4 + $0x1d0] sm:$0xff]  ;;  %v439_v19 = vadd.f32 %v2961_v26, %v382_v8  ;;  %v424_v27 = vadd.f32 %v2961_v26, %v367_v10  ;;  %v2078_v43 = vld [vmem:[%s3856_s4 + $0x1b8] sm:$0xff] }
  0x20   : > { %2448 = vmatpush3.msra.mxu1 %v628_v24  ;;  %2405 = vmatprep.subr.mxu0 %v2044_v28  ;;  %v369_v21 = vmul.f32 %v2939_v16, %v312_v12  ;;  %v327_v22 = vld [vmem:[%s2928_s14 + $0xe0] sm:$0xff]  ;;  %v314_v23 = vld [vmem:[%s2928_s14 + $0x50] sm:$0xff]  ;;  %v2064_v24 = vld [vmem:[%s3856_s4 + $0x148] sm:$0xff]  ;;  %v473_v31 = vmax.f32 %v422_v15, 0.0 }
  0x21   : > { %2449 = vmatprep.subr.mxu1 %v627_v29  ;;  %2406 = vmatpush3.msra.mxu0 %v2044_v28  ;;  %v2080_v28 = vld [vmem:[%s3856_s4 + $0x1c8] sm:$0xff]  ;;  %v540_v30 = vld [vmem:[%s3853_s1 + $0xb0] sm:$0xff]  ;;  %v371_v34 = vmul.f32 %v2939_v16, %v314_v23  ;;  %v490_v39 = vmax.f32 %v439_v19, 0.0  ;;  %v307_v47 = vld [vmem:[%s2928_s14 + $0x18] sm:$0x1] }
  0x22   : > { %2450 = vmatpush3.msra.mxu1 %v627_v29  ;;  %2407 = vmatprep.subr.mxu0 %v2043_v32  ;;  %v2063_v29 = vld [vmem:[%s3856_s4 + $0x140] sm:$0xff]  ;;  %v328_v35 = vld [vmem:[%s2928_s14 + $0xf0] sm:$0xff]  ;;  %v3112_v44 = vmul.f32 %v540_v30, %v489_v25  ;;  %v364_v0 = vmul.f32 %v2939_v16, %v307_v47  ;;  %v309_v9 = vld [vmem:[%s2928_s14 + $0x28] sm:$0x1] }
  0x23   : > { %2451 = vmatprep.subr.mxu1 %v626_v33  ;;  %2408 = vmatpush3.msra.mxu0 %v2043_v32  ;;  %v524_v32 = vld [vmem:[%s3853_s1 + $0x20] sm:$0xff]  ;;  %v526_v49 = vld [vmem:[%s3853_s1 + $0x30] sm:$0xff]  ;;  %v385_v50 = vmul.f32 %v2939_v16, %v328_v35  ;;  %v2060_v10 = vld [vmem:[%s3856_s4 + $0x128] sm:$0xff] }
  0x24   : > { %2452 = vmatpush3.msra.mxu1 %v626_v33  ;;  %2409 = vmatprep.subr.mxu0 %v2042_v36  ;;  %v384_v33 = vmul.f32 %v2939_v16, %v327_v22  ;;  %v3118_v48 = vmul.f32 %v524_v32, %v473_v31  ;;  %v2061_v60 = vld [vmem:[%s3856_s4 + $0x130] sm:$0xff]  ;;  %v528_v4 = vld [vmem:[%s3853_s1 + $0x40] sm:$0xff]  ;;  %v2076_v11 = vld [vmem:[%s3856_s4 + $0x1a8] sm:$0xff] }
  0x25   : > { %2453 = vmatprep.subr.mxu1 %v625_v37  ;;  %2410 = vmatpush3.msra.mxu0 %v2042_v36  ;;  %v316_v36 = vld [vmem:[%s2928_s14 + $0x60] sm:$0xff]  ;;  %v2077_v1 = vld [vmem:[%s3856_s4 + $0x1b0] sm:$0xff]  ;;  %v311_v15 = vld [vmem:[%s2928_s14 + $0x38] sm:$0x1] }
  0x26   : > { %2454 = vmatpush3.msra.mxu1 %v625_v37  ;;  %2411 = vmatprep.subr.mxu0 %v2041_v40  ;;  %v2079_v37 = vld [vmem:[%s3856_s4 + $0x1c0] sm:$0xff]  ;;  %v373_v51 = vmul.f32 %v2939_v16, %v316_v36  ;;  %v333_v25 = vld [vmem:[%s2928_s14 + $0x130] sm:$0xff]  ;;  %v368_v31 = vmul.f32 %v2939_v16, %v311_v15  ;;  %v523_v47 = vld [vmem:[%s3853_s1 + $0x18] sm:$0x1] }
  0x27   : > { %2455 = vmatprep.subr.mxu1 %v624_v41  ;;  %2412 = vmatpush3.msra.mxu0 %v2041_v40  ;;  %v440_v40 = vadd.f32 %v2961_v26, %v383_v20  ;;  %v543_v19 = vld [vmem:[%s3853_s1 + $0xe0] sm:$0xff]  ;;  %v530_v20 = vld [vmem:[%s3853_s1 + $0x50] sm:$0xff] }
  0x28   : > { %2456 = vmatpush3.msra.mxu1 %v624_v41  ;;  %2413 = vmatprep.subr.mxu0 %v2040_v45  ;;  %v426_v41 = vadd.f32 %v2961_v26, %v369_v21  ;;  %v430_v8 = vadd.f32 %v2961_v26, %v373_v51  ;;  %v421_v21 = vadd.f32 %v2961_v26, %v364_v0  ;;  %v331_v22 = vld [vmem:[%s2928_s14 + $0x120] sm:$0xff]  ;;  %v544_v35 = vld [vmem:[%s3853_s1 + $0xf0] sm:$0xff]  ;;  %v2074_v51 = vld [vmem:[%s3856_s4 + $0x198] sm:$0xff] }
  0x29   : > { %2457 = vmatprep.subr.mxu1 %v623_v46  ;;  %2414 = vmatpush3.msra.mxu0 %v2040_v45  ;;  %v541_v45 = vld [vmem:[%s3853_s1 + $0xc0] sm:$0xff] }
  0x2a   : > { %2458 = vmatpush3.msra.mxu1 %v623_v46  ;;  %2415 = vmatprep.subr.mxu0 %v2039_v52  ;;  %v475_v46 = vmax.f32 %v424_v27, 0.0  ;;  %v3133_v61 = vmul.f32 %v541_v45, %v490_v39  ;;  %v366_v27 = vmul.f32 %v2939_v16, %v309_v9  ;;  %v481_v30 = vmax.f32 %v430_v8, 0.0  ;;  %v2075_v32 = vld [vmem:[%s3856_s4 + $0x1a0] sm:$0xff]  ;;  %v2058_v39 = vld [vmem:[%s3856_s4 + $0x118] sm:$0xff] }
  0x2b   : > { %2459 = vmatprep.subr.mxu1 %v622_v53  ;;  %2416 = vmatpush3.msra.mxu0 %v2039_v52  ;;  %v329_v52 = vld [vmem:[%s2928_s14 + $0x100] sm:$0xff] }
  0x2c   : > { %2417 = vmatprep.mubr.f32.mxu0 %v589_v54  ;;  %2460 = vmatpush3.msra.mxu1 %v622_v53  ;;  %v318_v53 = vld [vmem:[%s2928_s14 + $0x70] sm:$0xff]  ;;  %v441_v54 = vadd.f32 %v2961_v26, %v384_v33  ;;  %v386_v5 = vmul.f32 %v2939_v16, %v329_v52  ;;  %v532_v36 = vld [vmem:[%s3853_s1 + $0x60] sm:$0xff] }
  0x2d   : > { %2461 = vmatprep.mubr.f32.mxu1 %v3018_v55  ;;  %2418 = vmatmul.mubr.f32.vlgmr.msra.gmra.mxu0 %v3020_v56 }
  0x2e   : > { %2462 = vmatmul.mubr.f32.vlgmr.msra.gmra.mxu1 %v3022_v57  ;;  %2473 = vmatprep.subr.mxu0 %v2070_v58  ;;  %v492_v12 = vmax.f32 %v441_v54, 0.0  ;;  %v443_v23 = vadd.f32 %v2961_v26, %v386_v5  ;;  %v545_v54 = vld [vmem:[%s3853_s1 + $0x100] sm:$0xff]  ;;  %v882_v5 = vrot.slane %v3018_v55, 1  ;;  %v525_v55 = vld [vmem:[%s3853_s1 + $0x28] sm:$0x1] }
  0x2f   : > { %2517 = vmatprep.subr.mxu1 %v2086_v59  ;;  %2474 = vmatpush3.msra.mxu0 %v2070_v58  ;;  %v428_v58 = vadd.f32 %v2961_v26, %v371_v34 }
  0x30   : > { %2518 = vmatpush3.msra.mxu1 %v2086_v59  ;;  %2475 = vmatprep.subr.mxu0 %v2069_v62  ;;  %v362_v59 = vmul.f32 %v2939_v16, %v305_v42  ;;  %v3187_v33 = vmul.f32 %v543_v19, %v492_v12  ;;  %v390_v42 = vmul.f32 %v2939_v16, %v333_v25  ;;  %v494_v45 = vmax.f32 %v443_v23, 0.0  ;;  %v337_v12 = vld [vmem:[%s2928_s14 + $0x150] sm:$0xff]  ;;  %v527_v19 = vld [vmem:[%s3853_s1 + $0x38] sm:$0x1]  ;;  %v2056_v23 = vld [vmem:[%s3856_s4 + $0x108] sm:$0xff] }
  0x31   : > { %2519 = vmatprep.subr.mxu1 %v2085_v63  ;;  %2476 = vmatpush3.msra.mxu0 %v2069_v62  ;;  %v491_v62 = vmax.f32 %v440_v40, 0.0  ;;  %v521_v40 = vld [vmem:[%s3853_s1 + $0x8] sm:$0x1] }
  0x32   : > { %2520 = vmatpush3.msra.mxu1 %v2085_v63  ;;  %2477 = vmatprep.subr.mxu0 %v2068_v2  ;;  %v477_v63 = vmax.f32 %v426_v41, 0.0  ;;  %v472_v41 = vmax.f32 %v421_v21, 0.0  ;;  %v3243_v8 = vmul.f32 %v545_v54, %v494_v45 }
  0x33   : > { %2521 = vmatprep.subr.mxu1 %v2084_v3  ;;  %2478 = vmatpush3.msra.mxu0 %v2068_v2  ;;  %v3139_v2 = vmul.f32 %v526_v49, %v475_v46  ;;  %v423_v49 = vadd.f32 %v2961_v26, %v366_v27 }
  0x34   : > { %2522 = vmatpush3.msra.mxu1 %v2084_v3  ;;  %2479 = vmatprep.subr.mxu0 %v2067_v6  ;;  %v542_v3 = vld [vmem:[%s3853_s1 + $0xd0] sm:$0xff]  ;;  %v574_v0 = vmul.f32 %v523_v47, %v472_v41 }
  0x35   : > { %2523 = vmatprep.subr.mxu1 %v2083_v7  ;;  %2480 = vmatpush3.msra.mxu0 %v2067_v6  ;;  %v375_v6 = vmul.f32 %v2939_v16, %v318_v53  ;;  %v3218_v53 = vmul.f32 %v532_v36, %v481_v30  ;;  %v547_v30 = vld [vmem:[%s3853_s1 + $0x120] sm:$0xff] }
  0x36   : > { %2524 = vmatpush3.msra.mxu1 %v2083_v7  ;;  %2481 = vmatprep.subr.mxu0 %v2066_v13  ;;  %v442_v7 = vadd.f32 %v2961_v26, %v385_v50  ;;  %v315_v50 = vld [vmem:[%s2928_s14 + $0x58] sm:$0x1]  ;;  %v886_v25 = vrot.slane %v574_v0, 1 }
  0x37   : > { %2525 = vmatprep.subr.mxu1 %v2082_v14  ;;  %2482 = vmatpush3.msra.mxu0 %v2066_v13  ;;  %v479_v13 = vmax.f32 %v428_v58, 0.0  ;;  %v534_v58 = vld [vmem:[%s3853_s1 + $0x70] sm:$0xff] }
  0x38   : > { %2526 = vmatpush3.msra.mxu1 %v2082_v14  ;;  %2483 = vmatprep.subr.mxu0 %v2065_v17  ;;  %v419_v14 = vadd.f32 %v2961_v26, %v362_v59  ;;  %v425_v59 = vadd.f32 %v2961_v26, %v368_v31  ;;  %v549_v31 = vld [vmem:[%s3853_s1 + $0x130] sm:$0xff] }
  0x39   : > { %2527 = vmatprep.subr.mxu1 %v2081_v18  ;;  %2484 = vmatpush3.msra.mxu0 %v2065_v17  ;;  %v3162_v17 = vmul.f32 %v542_v3, %v491_v62  ;;  %v3189_v34 = vmul.f32 %v530_v20, %v479_v13  ;;  %v335_v3 = vld [vmem:[%s2928_s14 + $0x140] sm:$0xff]  ;;  %v317_v13 = vld [vmem:[%s2928_s14 + $0x68] sm:$0x1] }
  0x3a   : > { %2528 = vmatpush3.msra.mxu1 %v2081_v18  ;;  %2485 = vmatprep.subr.mxu0 %v2064_v24  ;;  %v3164_v18 = vmul.f32 %v528_v4, %v477_v63  ;;  %v372_v4 = vmul.f32 %v2939_v16, %v315_v50  ;;  %v392_v20 = vmul.f32 %v2939_v16, %v335_v3  ;;  %v2118_v3 = vld [vmem:[%s3856_s4 + $0x2f8] sm:$0xff] }
  0x3b   : > { %2529 = vmatprep.subr.mxu1 %v2080_v28  ;;  %2486 = vmatpush3.msra.mxu0 %v2064_v24  ;;  %v432_v24 = vadd.f32 %v2961_v26, %v375_v6  ;;  %v2057_v6 = vld [vmem:[%s3856_s4 + $0x110] sm:$0xff]  ;;  %v374_v36 = vmul.f32 %v2939_v16, %v317_v13  ;;  %v551_v13 = vld [vmem:[%s3853_s1 + $0x140] sm:$0xff] }
  0x3c   : > { %2530 = vmatpush3.msra.mxu1 %v2080_v28  ;;  %2487 = vmatprep.subr.mxu0 %v2063_v29  ;;  %v2059_v28 = vld [vmem:[%s3856_s4 + $0x120] sm:$0xff]  ;;  %v449_v45 = vadd.f32 %v2961_v26, %v392_v20 }
  0x3d   : > { %2531 = vmatprep.subr.mxu1 %v2079_v37  ;;  %2488 = vmatpush3.msra.mxu0 %v2063_v29  ;;  %v493_v29 = vmax.f32 %v442_v7, 0.0  ;;  %v483_v46 = vmax.f32 %v432_v24, 0.0  ;;  %v2073_v7 = vld [vmem:[%s3856_s4 + $0x190] sm:$0xff]  ;;  %v2072_v24 = vld [vmem:[%s3856_s4 + $0x188] sm:$0xff] }
  0x3e   : > { %2532 = vmatpush3.msra.mxu1 %v2079_v37  ;;  %2489 = vmatprep.subr.mxu0 %v2062_v38  ;;  %v470_v37 = vmax.f32 %v419_v14, 0.0  ;;  %v885_v14 = vrot.slane %v3022_v57, 1 }
  0x3f   : > { %2533 = vmatprep.subr.mxu1 %v2078_v43  ;;  %2490 = vmatpush3.msra.mxu0 %v2062_v38  ;;  %v388_v38 = vmul.f32 %v2939_v16, %v331_v22  ;;  %v3216_v52 = vmul.f32 %v544_v35, %v493_v29  ;;  %v3245_v9 = vmul.f32 %v534_v58, %v483_v46  ;;  %v319_v22 = vld [vmem:[%s2928_s14 + $0x78] sm:$0x1]  ;;  %v341_v58 = vld [vmem:[%s2928_s14 + $0x170] sm:$0xff] }
  0x40   : > { %2534 = vmatpush3.msra.mxu1 %v2078_v43  ;;  %2420 = vmatprep.mubr.f32.mxu0 %v3112_v44  ;;  %v313_v43 = vld [vmem:[%s2928_s14 + $0x48] sm:$0x1]  ;;  %v429_v29 = vadd.f32 %v2961_v26, %v372_v4  ;;  %v394_v35 = vmul.f32 %v2939_v16, %v337_v12  ;;  %v376_v41 = vmul.f32 %v2939_v16, %v319_v22  ;;  %v891_v4 = vrot.slane %v3139_v2, 1  ;;  %v2117_v12 = vld [vmem:[%s3856_s4 + $0x2f0] sm:$0xff] }
  0x41   : > { %2464 = vmatprep.mubr.f32.mxu1 %v3118_v48  ;;  %2491 = vmatprep.subr.mxu0 %v2061_v60  ;;  %v3230_v62 = vadd.f32 %v2961_v26, %v388_v38  ;;  %v370_v63 = vmul.f32 %v2939_v16, %v313_v43  ;;  %v2071_v38 = vld [vmem:[%s3856_s4 + $0x180] sm:$0xff]  ;;  %v888_v43 = vrot.slane %v3118_v48, 1  ;;  %v3291_v47 = vsel %vm881_vm0, %v885_v14, %v886_v25 }
  0x42   : > { %2535 = vmatprep.subr.mxu1 %v2077_v1  ;;  %2421 = vmatmul.mubr.f32.gmra.mxu0 %v3133_v61  ;;  %v480_v54 = vmax.f32 %v429_v29, 0.0  ;;  %v894_v25 = vrot.slane %v3164_v18, 1  ;;  %v345_v29 = vld [vmem:[%s2928_s14 + $0x190] sm:$0xff] }
  0x43   : > { %2465 = vmatmul.mubr.f32.gmra.mxu1 %v3139_v2  ;;  %2492 = vmatpush3.msra.mxu0 %v2061_v60  ;;  %v572_v60 = vmul.f32 %v521_v40, %v470_v37  ;;  %v427_v21 = vadd.f32 %v2961_v26, %v370_v63  ;;  %v496_v27 = vmax.f32 %v3230_v62, 0.0  ;;  %v2055_v37 = vld [vmem:[%s3856_s4 + $0x100] sm:$0xff]  ;;  %v451_v62 = vadd.f32 %v2961_v26, %v394_v35  ;;  %v531_v63 = vld [vmem:[%s3853_s1 + $0x58] sm:$0x1] }
  0x44   : > { %2536 = vmatpush3.msra.mxu1 %v2077_v1  ;;  %2493 = vmatprep.subr.mxu0 %v2060_v10  ;;  %v447_v1 = vadd.f32 %v2961_v26, %v390_v42  ;;  %v339_v40 = vld [vmem:[%s2928_s14 + $0x160] sm:$0xff]  ;;  %v582_v14 = vmul.f32 %v531_v63, %v480_v54 }
  0x45   : > { %2537 = vmatprep.subr.mxu1 %v2076_v11  ;;  %2494 = vmatpush3.msra.mxu0 %v2060_v10  ;;  %v474_v10 = vmax.f32 %v423_v49, 0.0  ;;  %v883_v15 = vrot.slane %v572_v60, 1  ;;  %v478_v46 = vmax.f32 %v427_v21, 0.0  ;;  %v3293_v49 = vmul.f32 %v547_v30, %v496_v27  ;;  %v533_v27 = vld [vmem:[%s3853_s1 + $0x68] sm:$0x1]  ;;  %v555_v54 = vld [vmem:[%s3853_s1 + $0x160] sm:$0xff] }
  0x46   : > { %2538 = vmatpush3.msra.mxu1 %v2076_v11  ;;  %2423 = vmatprep.mubr.f32.mxu0 %v3162_v17  ;;  %v476_v11 = vmax.f32 %v425_v59, 0.0  ;;  %v2102_v59 = vld [vmem:[%s3856_s4 + $0x278] sm:$0xff]  ;;  %v396_v0 = vmul.f32 %v2939_v16, %v339_v40  ;;  %v502_v20 = vmax.f32 %v451_v62, 0.0  ;;  %v2100_v30 = vld [vmem:[%s3856_s4 + $0x268] sm:$0xff]  ;;  %v898_v40 = vrot.slane %v582_v14, 1  ;;  %v2113_v14 = vld [vmem:[%s3856_s4 + $0x2d0] sm:$0xff] }
  0x47   : > { %2467 = vmatprep.mubr.f32.mxu1 %v3164_v18  ;;  %2495 = vmatprep.subr.mxu0 %v2059_v28  ;;  %v884_v42 = vsel %vm881_vm0, %v882_v5, %v883_v15  ;;  %v343_v15 = vld [vmem:[%s2928_s14 + $0x180] sm:$0xff] }
  0x48   : > { %2539 = vmatprep.subr.mxu1 %v2075_v32  ;;  %2424 = vmatmul.mubr.f32.gmra.mxu0 %v3187_v33  ;;  %v453_v21 = vadd.f32 %v2961_v26, %v396_v0  ;;  %v557_v0 = vld [vmem:[%s3853_s1 + $0x170] sm:$0xff] }
  0x49   : > { %2468 = vmatmul.mubr.f32.gmra.mxu1 %v3189_v34  ;;  %2496 = vmatpush3.msra.mxu0 %v2059_v28  ;;  %v498_v28 = vmax.f32 %v447_v1, 0.0  ;;  %v431_v1 = vadd.f32 %v2961_v26, %v374_v36 }
  0x4a   : > { %2540 = vmatpush3.msra.mxu1 %v2075_v32  ;;  %2497 = vmatprep.subr.mxu0 %v2058_v39  ;;  %v576_v32 = vmul.f32 %v525_v55, %v474_v10  ;;  %v500_v10 = vmax.f32 %v449_v45, 0.0 }
  0x4b   : > { %2541 = vmatprep.subr.mxu1 %v2074_v51  ;;  %2498 = vmatpush3.msra.mxu0 %v2058_v39  ;;  %v578_v39 = vmul.f32 %v527_v19, %v476_v11  ;;  %v3295_v50 = vmul.f32 %v549_v31, %v498_v28  ;;  %v398_v11 = vmul.f32 %v2939_v16, %v341_v58  ;;  %v482_v22 = vmax.f32 %v431_v1, 0.0  ;;  %v2116_v31 = vld [vmem:[%s3856_s4 + $0x2e8] sm:$0xff]  ;;  %v2098_v1 = vld [vmem:[%s3856_s4 + $0x258] sm:$0xff] }
  0x4c   : > { %2542 = vmatpush3.msra.mxu1 %v2074_v51  ;;  %2426 = vmatprep.mubr.f32.mxu0 %v3216_v52  ;;  %v529_v51 = vld [vmem:[%s3853_s1 + $0x48] sm:$0x1]  ;;  %v889_v60 = vrot.slane %v576_v32, 1  ;;  %v3350_v32 = vmul.f32 %v551_v13, %v500_v10  ;;  %v903_v10 = vrot.slane %v3245_v9, 1 }
  0x4d   : > { %2470 = vmatprep.mubr.f32.mxu1 %v3218_v53  ;;  %2499 = vmatprep.subr.mxu0 %v2057_v6  ;;  %v892_v5 = vrot.slane %v578_v39, 1  ;;  %v580_v55 = vmul.f32 %v529_v51, %v478_v46  ;;  %v455_v36 = vadd.f32 %v2961_v26, %v398_v11  ;;  %v897_v39 = vrot.slane %v3189_v34, 1  ;;  %v2115_v51 = vld [vmem:[%s3856_s4 + $0x2e0] sm:$0xff] }
  0x4e   : > { %2543 = vmatprep.subr.mxu1 %v2073_v7  ;;  %2427 = vmatmul.mubr.f32.gmra.mxu0 %v3243_v8  ;;  %v3330_v19 = vsel %vm881_vm0, %v888_v43, %v889_v60  ;;  %v504_v43 = vmax.f32 %v453_v21, 0.0  ;;  %v584_v45 = vmul.f32 %v533_v27, %v482_v22  ;;  %v402_v46 = vmul.f32 %v2939_v16, %v345_v29  ;;  %v2096_v27 = vld [vmem:[%s3856_s4 + $0x248] sm:$0xff] }
  0x4f   : > { %2471 = vmatmul.mubr.f32.gmra.mxu1 %v3245_v9  ;;  %2500 = vmatpush3.msra.mxu0 %v2057_v6  ;;  %v433_v6 = vadd.f32 %v2961_v26, %v376_v41  ;;  %v895_v35 = vrot.slane %v580_v55, 1  ;;  %v506_v60 = vmax.f32 %v455_v36, 0.0  ;;  %v3378_v63 = vsel %vm881_vm0, %v897_v39, %v898_v40  ;;  %v347_v39 = vld [vmem:[%s2928_s14 + $0x1b0] sm:$0xff]  ;;  %v2094_v40 = vld [vmem:[%s3856_s4 + $0x238] sm:$0xff] }
  0x50   : > { %2544 = vmatpush3.msra.mxu1 %v2073_v7  ;;  %2501 = vmatprep.subr.mxu0 %v2056_v23  ;;  %v2101_v7 = vld [vmem:[%s3856_s4 + $0x270] sm:$0xff] }
  0x51   : > { %2545 = vmatprep.subr.mxu1 %v2072_v24  ;;  %2502 = vmatpush3.msra.mxu0 %v2056_v23  ;;  %v3334_v23 = vsel %vm881_vm0, %v891_v4, %v892_v5  ;;  %v484_v28 = vmax.f32 %v433_v6, 0.0  ;;  %v3390_v4 = vmul.f32 %v555_v54, %v504_v43  ;;  %v900_v5 = vrot.slane %v3218_v53, 1  ;;  %v348_v43 = vld [vmem:[%s2928_s14 + $0x1c0] sm:$0xff]  ;;  %v2109_v54 = vld [vmem:[%s3856_s4 + $0x2b0] sm:$0xff] }
  0x52   : > { %2546 = vmatpush3.msra.mxu1 %v2072_v24  ;;  %2503 = vmatprep.subr.mxu0 %v2055_v37  ;;  %v553_v24 = vld [vmem:[%s3853_s1 + $0x150] sm:$0xff]  ;;  %v901_v6 = vrot.slane %v584_v45, 1  ;;  %v3397_v11 = vmul.f32 %v557_v0, %v506_v60  ;;  %v338_v0 = vld [vmem:[%s2928_s14 + $0x158] sm:$0x1] }
  0x53   : > { %2547 = vmatprep.subr.mxu1 %v2071_v38  ;;  %2504 = vmatpush3.msra.mxu0 %v2055_v37  ;;  %v535_v37 = vld [vmem:[%s3853_s1 + $0x78] sm:$0x1]  ;;  %v3360_v41 = vmul.f32 %v553_v24, %v502_v20  ;;  %v561_v24 = vld [vmem:[%s3853_s1 + $0x190] sm:$0xff] }
  0x54   : > { %2505 = vmatprep.mubr.f32.mxu0 %v884_v42  ;;  %2548 = vmatpush3.msra.mxu1 %v2071_v38  ;;  %v400_v38 = vmul.f32 %v2939_v16, %v343_v15  ;;  %v2099_v42 = vld [vmem:[%s3856_s4 + $0x260] sm:$0xff]  ;;  %v586_v58 = vmul.f32 %v535_v37, %v484_v28  ;;  %v3410_v20 = vsel %vm881_vm0, %v900_v5, %v901_v6  ;;  %v2112_v28 = vld [vmem:[%s3856_s4 + $0x2c8] sm:$0xff]  ;;  %v349_v5 = vld [vmem:[%s2928_s14 + $0x1d0] sm:$0xff] }
  0x55   : > { %2506 = vmatmul.mubr.f32.vlgmr.msra.gmra.mxu0 %v3291_v47  ;;  %2549 = vmatprep.mubr.f32.mxu1 %v3293_v49  ;;  %v559_v15 = vld [vmem:[%s3853_s1 + $0x180] sm:$0xff] }
  0x56   : > { %2561 = vmatprep.subr.mxu0 %v2102_v59  ;;  %2605 = vmatprep.subr.mxu1 %v2118_v3  ;;  %v457_v62 = vadd.f32 %v2961_v26, %v400_v38  ;;  %v904_v55 = vrot.slane %v586_v58, 1  ;;  %v2111_v37 = vld [vmem:[%s3856_s4 + $0x2c0] sm:$0xff]  ;;  %v404_v58 = vmul.f32 %v2939_v16, %v347_v39  ;;  %v342_v39 = vld [vmem:[%s2928_s14 + $0x178] sm:$0x1] }
  0x57   : > { %2550 = vmatmul.mubr.f32.vlgmr.msra.gmra.mxu1 %v3295_v50  ;;  %2562 = vmatpush3.msra.mxu0 %v2102_v59  ;;  %v3374_v59 = vsel %vm881_vm0, %v894_v25, %v895_v35  ;;  %v332_v25 = vld [vmem:[%s2928_s14 + $0x128] sm:$0x1]  ;;  %v2095_v35 = vld [vmem:[%s3856_s4 + $0x240] sm:$0xff] }
  0x58   : > { %2606 = vmatpush3.msra.mxu1 %v2118_v3  ;;  %2563 = vmatprep.subr.mxu0 %v2101_v7  ;;  %v2114_v3 = vld [vmem:[%s3856_s4 + $0x2d8] sm:$0xff]  ;;  %v508_v13 = vmax.f32 %v457_v62, 0.0  ;;  %v3413_v22 = vsel %vm881_vm0, %v903_v10, %v904_v55  ;;  %v389_v36 = vmul.f32 %v2939_v16, %v332_v25  ;;  %v405_v62 = vmul.f32 %v2939_v16, %v348_v43  ;;  %v2107_v55 = vld [vmem:[%s3856_s4 + $0x2a0] sm:$0xff] }
  0x59   : > { %2607 = vmatprep.subr.mxu1 %v2117_v12  ;;  %2508 = vmatprep.mubr.f32.mxu0 %v3330_v19  ;;  %v550_v25 = vld [vmem:[%s3853_s1 + $0x138] sm:$0x1] }
  0x5a   : > { %2564 = vmatpush3.msra.mxu0 %v2101_v7  ;;  %2608 = vmatpush3.msra.mxu1 %v2117_v12  ;;  %v459_v7 = vadd.f32 %v2961_v26, %v402_v46  ;;  %v2097_v12 = vld [vmem:[%s3856_s4 + $0x250] sm:$0xff]  ;;  %v3426_v29 = vmul.f32 %v559_v15, %v508_v13  ;;  %v446_v45 = vadd.f32 %v2961_v26, %v389_v36  ;;  %v336_v46 = vld [vmem:[%s2928_s14 + $0x148] sm:$0x1]  ;;  %v350_v15 = vld [vmem:[%s2928_s14 + $0x1e0] sm:$0xff] }
  0x5b   : > { %2509 = vmatmul.mubr.f32.gmra.mxu0 %v3334_v23  ;;  %2565 = vmatprep.subr.mxu0 %v2100_v30  ;;  %v393_v6 = vmul.f32 %v2939_v16, %v336_v46  ;;  %v548_v13 = vld [vmem:[%s3853_s1 + $0x128] sm:$0x1] }
  0x5c   : > { %2609 = vmatprep.subr.mxu1 %v2116_v31  ;;  %2552 = vmatprep.mubr.f32.mxu1 %v3350_v32  ;;  %v510_v21 = vmax.f32 %v459_v7, 0.0  ;;  %v2091_v7 = vld [vmem:[%s3856_s4 + $0x220] sm:$0xff]  ;;  %v497_v10 = vmax.f32 %v446_v45, 0.0 }
  0x5d   : > { %2566 = vmatpush3.msra.mxu0 %v2100_v30  ;;  %2610 = vmatpush3.msra.mxu1 %v2116_v31  ;;  %v334_v30 = vld [vmem:[%s2928_s14 + $0x138] sm:$0x1]  ;;  %v450_v36 = vadd.f32 %v2961_v26, %v393_v6  ;;  %v352_v6 = vld [vmem:[%s2928_s14 + $0x200] sm:$0xff] }
  0x5e   : > { %2567 = vmatprep.subr.mxu0 %v2099_v42  ;;  %2553 = vmatmul.mubr.f32.gmra.mxu1 %v3360_v41  ;;  %v3431_v31 = vmul.f32 %v561_v24, %v510_v21  ;;  %v391_v38 = vmul.f32 %v2939_v16, %v334_v30  ;;  %v395_v21 = vmul.f32 %v2939_v16, %v338_v0  ;;  %v2090_v30 = vld [vmem:[%s3856_s4 + $0x218] sm:$0xff] }
  0x5f   : > { %2611 = vmatprep.subr.mxu1 %v2115_v51  ;;  %2511 = vmatprep.mubr.f32.mxu0 %v3374_v59  ;;  %v462_v24 = vadd.f32 %v2961_v26, %v405_v62 }
  0x60   : > { %2568 = vmatpush3.msra.mxu0 %v2099_v42  ;;  %2612 = vmatpush3.msra.mxu1 %v2115_v51  ;;  %v2110_v42 = vld [vmem:[%s3856_s4 + $0x2b8] sm:$0xff]  ;;  %v2093_v51 = vld [vmem:[%s3856_s4 + $0x230] sm:$0xff]  ;;  %v448_v60 = vadd.f32 %v2961_v26, %v391_v38  ;;  %v407_v38 = vmul.f32 %v2939_v16, %v350_v15  ;;  %v452_v46 = vadd.f32 %v2961_v26, %v395_v21  ;;  %v344_v15 = vld [vmem:[%s2928_s14 + $0x188] sm:$0x1] }
  0x61   : > { %2512 = vmatmul.mubr.f32.gmra.mxu0 %v3378_v63  ;;  %2569 = vmatprep.subr.mxu0 %v2098_v1  ;;  %v513_v62 = vmax.f32 %v462_v24, 0.0  ;;  %v2087_v21 = vld [vmem:[%s3856_s4 + $0x200] sm:$0xff] }
  0x62   : > { %2613 = vmatprep.subr.mxu1 %v2114_v3  ;;  %2555 = vmatprep.mubr.f32.mxu1 %v3390_v4 }
  0x63   : > { %2570 = vmatpush3.msra.mxu0 %v2098_v1  ;;  %2614 = vmatpush3.msra.mxu1 %v2114_v3  ;;  %v2092_v1 = vld [vmem:[%s3856_s4 + $0x228] sm:$0xff] }
  0x64   : > { %2571 = vmatprep.subr.mxu0 %v2097_v12  ;;  %2556 = vmatmul.mubr.f32.gmra.mxu1 %v3397_v11  ;;  %v2108_v3 = vld [vmem:[%s3856_s4 + $0x2a8] sm:$0xff] }
  0x65   : > { %2615 = vmatprep.subr.mxu1 %v2113_v14  ;;  %2514 = vmatprep.mubr.f32.mxu0 %v3410_v20 }
  0x66   : > { %2572 = vmatpush3.msra.mxu0 %v2097_v12  ;;  %2616 = vmatpush3.msra.mxu1 %v2113_v14  ;;  %v461_v12 = vadd.f32 %v2961_v26, %v404_v58  ;;  %v499_v14 = vmax.f32 %v448_v60, 0.0  ;;  %v2088_v58 = vld [vmem:[%s3856_s4 + $0x208] sm:$0xff]  ;;  %v563_v60 = vld [vmem:[%s3853_s1 + $0x1b0] sm:$0xff] }
  0x67   : > { %2515 = vmatmul.mubr.f32.gmra.mxu0 %v3413_v22  ;;  %2573 = vmatprep.subr.mxu0 %v2096_v27 }
  0x68   : > { %2617 = vmatprep.subr.mxu1 %v2112_v28  ;;  %2558 = vmatprep.mubr.f32.mxu1 %v3426_v29  ;;  %v512_v43 = vmax.f32 %v461_v12, 0.0  ;;  %v601_v45 = vmul.f32 %v550_v25, %v499_v14  ;;  %v464_v12 = vadd.f32 %v2961_v26, %v407_v38  ;;  %v503_v25 = vmax.f32 %v452_v46, 0.0  ;;  %v346_v38 = vld [vmem:[%s2928_s14 + $0x198] sm:$0x1] }
  0x69   : > { %2574 = vmatpush3.msra.mxu0 %v2096_v27  ;;  %2618 = vmatpush3.msra.mxu1 %v2112_v28  ;;  %v406_v27 = vmul.f32 %v2939_v16, %v349_v5  ;;  %v340_v28 = vld [vmem:[%s2928_s14 + $0x168] sm:$0x1]  ;;  %v501_v5 = vmax.f32 %v450_v36, 0.0  ;;  %v554_v36 = vld [vmem:[%s3853_s1 + $0x158] sm:$0x1] }
  0x6a   : > { %2575 = vmatprep.subr.mxu0 %v2095_v35  ;;  %2559 = vmatmul.mubr.f32.gmra.mxu1 %v3431_v31  ;;  %v614_v24 = vmul.f32 %v563_v60, %v512_v43  ;;  %v2134_v46 = vld [vmem:[%s3856_s4 + $0x378] sm:$0xff] }
  0x6b   : > { %2619 = vmatprep.subr.mxu1 %v2111_v37  ;;  %2576 = vmatpush3.msra.mxu0 %v2095_v35  ;;  %v2106_v35 = vld [vmem:[%s3856_s4 + $0x298] sm:$0xff]  ;;  %v463_v0 = vadd.f32 %v2961_v26, %v406_v27  ;;  %v1324_v26 = vrot.slane %v601_v45, 1  ;;  %v3544_v27 = vld [vmem:[%s3855_s3] ss:$0 sm:$0xff] }
  0x6c   : > { %2620 = vmatpush3.msra.mxu1 %v2111_v37  ;;  %2577 = vmatprep.subr.mxu0 %v2094_v40  ;;  %v599_v37 = vmul.f32 %v548_v13, %v497_v10  ;;  %v552_v13 = vld [vmem:[%s3853_s1 + $0x148] sm:$0x1]  ;;  %v2150_v60 = vld [vmem:[%s3856_s4 + $0x3f8] sm:$0xff] }
  0x6d   : > { %2621 = vmatprep.subr.mxu1 %v2110_v42  ;;  %2578 = vmatpush3.msra.mxu0 %v2094_v40  ;;  %v2089_v40 = vld [vmem:[%s3856_s4 + $0x210] sm:$0xff] }
  0x6e   : > { %2622 = vmatpush3.msra.mxu1 %v2110_v42  ;;  %2579 = vmatprep.subr.mxu0 %v2093_v51  ;;  %v2105_v42 = vld [vmem:[%s3856_s4 + $0x290] sm:$0xff]  ;;  %v1321_v10 = vrot.slane %v599_v37, 1 }
  0x6f   : > { %2623 = vmatprep.subr.mxu1 %v2109_v54  ;;  %2580 = vmatpush3.msra.mxu0 %v2093_v51  ;;  %v351_v51 = vld [vmem:[%s2928_s14 + $0x1f0] sm:$0xff] }
  0x70   : > { %2624 = vmatpush3.msra.mxu1 %v2109_v54  ;;  %2581 = vmatprep.subr.mxu0 %v2092_v1  ;;  %v397_v54 = vmul.f32 %v2939_v16, %v340_v28  ;;  %v2104_v16 = vld [vmem:[%s3856_s4 + $0x288] sm:$0xff] }
  0x71   : > { %2625 = vmatprep.subr.mxu1 %v2108_v3  ;;  %2582 = vmatpush3.msra.mxu0 %v2092_v1  ;;  %v1320_v1 = vrot.slane %v3293_v49, 1 }
  0x72   : > { %2626 = vmatpush3.msra.mxu1 %v2108_v3  ;;  %2583 = vmatprep.subr.mxu0 %v2091_v7  ;;  %v564_v3 = vld [vmem:[%s3853_s1 + $0x1c0] sm:$0xff]  ;;  %v454_v28 = vadd.f32 %v3544_v27, %v397_v54 }
  0x73   : > { %2627 = vmatprep.subr.mxu1 %v2107_v55  ;;  %2584 = vmatpush3.msra.mxu0 %v2091_v7  ;;  %v3525_v7 = vld [vmem:[%s3854_s2] ss:$0 sm:$0xff]  ;;  %v1322_v45 = vsel %vm881_vm0, %v1320_v1, %v1321_v10  ;;  %v605_v1 = vmul.f32 %v554_v36, %v503_v25 }
  0x74   : > { %2628 = vmatpush3.msra.mxu1 %v2107_v55  ;;  %2585 = vmatprep.subr.mxu0 %v2090_v30  ;;  %v399_v49 = vmul.f32 %v3525_v7, %v342_v39  ;;  %v1323_v55 = vrot.slane %v3295_v50, 1  ;;  %v408_v14 = vmul.f32 %v3525_v7, %v351_v51  ;;  %v2103_v50 = vld [vmem:[%s3856_s4 + $0x280] sm:$0xff]  ;;  %v409_v37 = vmul.f32 %v3525_v7, %v352_v6  ;;  %v565_v39 = vld [vmem:[%s3853_s1 + $0x1d0] sm:$0xff] }
  0x75   : > { %2629 = vmatprep.subr.mxu1 %v2106_v35  ;;  %2586 = vmatpush3.msra.mxu0 %v2090_v30  ;;  %v615_v30 = vmul.f32 %v564_v3, %v513_v62  ;;  %v401_v43 = vmul.f32 %v3525_v7, %v344_v15  ;;  %v515_v51 = vmax.f32 %v464_v12, 0.0  ;;  %v354_v3 = vld [vmem:[%s2928_s14 + $0x220] sm:$0xff]  ;;  %v1326_v6 = vrot.slane %v3350_v32, 1  ;;  %v2133_v12 = vld [vmem:[%s3856_s4 + $0x370] sm:$0xff] }
  0x76   : > { %2630 = vmatpush3.msra.mxu1 %v2106_v35  ;;  %2587 = vmatprep.subr.mxu0 %v2089_v40  ;;  %v514_v35 = vmax.f32 %v463_v0, 0.0  ;;  %v465_v54 = vadd.f32 %v3544_v27, %v408_v14  ;;  %v1325_v62 = vsel %vm881_vm0, %v1323_v55, %v1324_v26  ;;  %v566_v0 = vld [vmem:[%s3853_s1 + $0x1e0] sm:$0xff]  ;;  %v466_v10 = vadd.f32 %v3544_v27, %v409_v37  ;;  %v556_v55 = vld [vmem:[%s3853_s1 + $0x168] sm:$0x1]  ;;  %v558_v26 = vld [vmem:[%s3853_s1 + $0x178] sm:$0x1] }
  0x77   : > { %2631 = vmatprep.subr.mxu1 %v2105_v42  ;;  %2588 = vmatpush3.msra.mxu0 %v2089_v40  ;;  %v603_v40 = vmul.f32 %v552_v13, %v501_v5  ;;  %v403_v5 = vmul.f32 %v3525_v7, %v346_v38  ;;  %v2149_v13 = vld [vmem:[%s3856_s4 + $0x3f0] sm:$0xff]  ;;  %v411_v25 = vmul.f32 %v3525_v7, %v354_v3  ;;  %v2148_v37 = vld [vmem:[%s3856_s4 + $0x3e8] sm:$0xff] }
  0x78   : > { %2632 = vmatpush3.msra.mxu1 %v2105_v42  ;;  %2589 = vmatprep.subr.mxu0 %v2088_v58  ;;  %v456_v42 = vadd.f32 %v3544_v27, %v399_v49  ;;  %v616_v49 = vmul.f32 %v565_v39, %v514_v35  ;;  %v567_v38 = vld [vmem:[%s3853_s1 + $0x1f0] sm:$0xff]  ;;  %v517_v39 = vmax.f32 %v466_v10, 0.0 }
  0x79   : > { %2633 = vmatprep.subr.mxu1 %v2104_v16  ;;  %2590 = vmatpush3.msra.mxu0 %v2088_v58  ;;  %v353_v58 = vld [vmem:[%s2928_s14 + $0x210] sm:$0xff]  ;;  %v1327_v32 = vrot.slane %v603_v40, 1  ;;  %v460_v36 = vadd.f32 %v3544_v27, %v403_v5  ;;  %v562_v5 = vld [vmem:[%s3853_s1 + $0x198] sm:$0x1] }
  0x7a   : > { %2634 = vmatpush3.msra.mxu1 %v2104_v16  ;;  %2591 = vmatprep.subr.mxu0 %v2087_v21  ;;  %v505_v16 = vmax.f32 %v454_v28, 0.0  ;;  %v507_v14 = vmax.f32 %v456_v42, 0.0  ;;  %v410_v15 = vmul.f32 %v3525_v7, %v353_v58  ;;  %v1330_v28 = vrot.slane %v605_v1, 1  ;;  %v568_v42 = vld [vmem:[%s3853_s1 + $0x200] sm:$0xff] }
  0x7b   : > { %2635 = vmatprep.subr.mxu1 %v2103_v50  ;;  %2592 = vmatpush3.msra.mxu0 %v2087_v21  ;;  %v458_v21 = vadd.f32 %v3544_v27, %v401_v43  ;;  %v1328_v40 = vsel %vm881_vm0, %v1326_v6, %v1327_v32  ;;  %v468_v58 = vadd.f32 %v3544_v27, %v411_v25  ;;  %v1335_v6 = vrot.slane %v3397_v11, 1  ;;  %v569_v32 = vld [vmem:[%s3853_s1 + $0x210] sm:$0xff] }
  0x7c   : > { %2593 = vmatprep.mubr.f32.mxu0 %v614_v24  ;;  %2636 = vmatpush3.msra.mxu1 %v2103_v50  ;;  %v1329_v50 = vrot.slane %v3360_v41, 1  ;;  %v617_v24 = vmul.f32 %v566_v0, %v515_v51  ;;  %v607_v35 = vmul.f32 %v556_v55, %v505_v16  ;;  %v2132_v41 = vld [vmem:[%s3856_s4 + $0x368] sm:$0xff]  ;;  %v609_v43 = vmul.f32 %v558_v26, %v507_v14  ;;  %v2145_v25 = vld [vmem:[%s3856_s4 + $0x3d0] sm:$0xff] }
  0x7d   : > { %2594 = vmatmul.mubr.f32.vlgmr.msra.gmra.mxu0 %v615_v30  ;;  %2637 = vmatprep.mubr.f32.mxu1 %v1322_v45  ;;  %v516_v30 = vmax.f32 %v465_v54, 0.0  ;;  %v467_v45 = vadd.f32 %v3544_v27, %v410_v15  ;;  %v1332_v51 = vrot.slane %v3390_v4, 1  ;;  %v2131_v54 = vld [vmem:[%s3856_s4 + $0x360] sm:$0xff]  ;;  %v511_v16 = vmax.f32 %v460_v36, 0.0 }
  0x7e   : > { %2649 = vmatprep.subr.mxu0 %v2134_v46  ;;  %2693 = vmatprep.subr.mxu1 %v2150_v60  ;;  %v2147_v4 = vld [vmem:[%s3856_s4 + $0x3e0] sm:$0xff]  ;;  %v1333_v1 = vrot.slane %v607_v35, 1  ;;  %v619_v3 = vmul.f32 %v568_v42, %v517_v39  ;;  %v519_v11 = vmax.f32 %v468_v58, 0.0  ;;  %v1341_v36 = vrot.slane %v3431_v31, 1  ;;  %v2126_v42 = vld [vmem:[%s3856_s4 + $0x338] sm:$0xff] }
  0x7f   : > { %2638 = vmatmul.mubr.f32.vlgmr.msra.gmra.mxu1 %v1325_v62  ;;  %2650 = vmatpush3.msra.mxu0 %v2134_v46  ;;  %v509_v46 = vmax.f32 %v458_v21, 0.0  ;;  %v1331_v62 = vsel %vm881_vm0, %v1329_v50, %v1330_v28  ;;  %v618_v0 = vmul.f32 %v567_v38, %v516_v30  ;;  %v518_v10 = vmax.f32 %v467_v45, 0.0  ;;  %v570_v15 = vld [vmem:[%s3853_s1 + $0x220] sm:$0xff]  ;;  %v2129_v50 = vld [vmem:[%s3856_s4 + $0x350] sm:$0xff] }
  0x80   : > { %2694 = vmatpush3.msra.mxu1 %v2150_v60  ;;  %2651 = vmatprep.subr.mxu0 %v2133_v12  ;;  %v560_v60 = vld [vmem:[%s3853_s1 + $0x188] sm:$0x1]  ;;  %v1334_v14 = vsel %vm881_vm0, %v1332_v51, %v1333_v1  ;;  %v613_v21 = vmul.f32 %v562_v5, %v511_v16  ;;  %v621_v35 = vmul.f32 %v570_v15, %v519_v11  ;;  %v2127_v31 = vld [vmem:[%s3856_s4 + $0x340] sm:$0xff]  ;;  %v2125_v45 = vld [vmem:[%s3856_s4 + $0x330] sm:$0xff] }
  0x81   : > { %2695 = vmatprep.subr.mxu1 %v2149_v13  ;;  %2596 = vmatprep.mubr.f32.mxu0 %v616_v49  ;;  %v1336_v49 = vrot.slane %v609_v43, 1  ;;  %v611_v55 = vmul.f32 %v560_v60, %v509_v46  ;;  %v620_v28 = vmul.f32 %v569_v32, %v518_v10  ;;  %v2142_v43 = vld [vmem:[%s3856_s4 + $0x3b8] sm:$0xff]  ;;  %v2141_v46 = vld [vmem:[%s3856_s4 + $0x3b0] sm:$0xff]  ;;  %v2124_v51 = vld [vmem:[%s3856_s4 + $0x328] sm:$0xff] }
  0x82   : > { %2652 = vmatpush3.msra.mxu0 %v2133_v12  ;;  %2696 = vmatpush3.msra.mxu1 %v2149_v13  ;;  %v2130_v12 = vld [vmem:[%s3856_s4 + $0x358] sm:$0xff]  ;;  %v2123_v58 = vld [vmem:[%s3856_s4 + $0x320] sm:$0xff]  ;;  %v2137_v1 = vld [vmem:[%s3856_s4 + $0x390] sm:$0xff] }
  0x83   : > { %2597 = vmatmul.mubr.f32.gmra.mxu0 %v617_v24  ;;  %2653 = vmatprep.subr.mxu0 %v2132_v41  ;;  %v2146_v13 = vld [vmem:[%s3856_s4 + $0x3d8] sm:$0xff]  ;;  %v1338_v24 = vrot.slane %v3426_v29, 1  ;;  %v1337_v26 = vsel %vm881_vm0, %v1335_v6, %v1336_v49  ;;  %v1339_v30 = vrot.slane %v611_v55, 1  ;;  %v2128_v29 = vld [vmem:[%s3856_s4 + $0x348] sm:$0xff]  ;;  %v2139_v60 = vld [vmem:[%s3856_s4 + $0x3a0] sm:$0xff] }
  0x84   : > { %2697 = vmatprep.subr.mxu1 %v2148_v37  ;;  %2640 = vmatprep.mubr.f32.mxu1 %v1328_v40  ;;  %v2143_v40 = vld [vmem:[%s3856_s4 + $0x3c0] sm:$0xff]  ;;  %v2120_v16 = vld [vmem:[%s3856_s4 + $0x308] sm:$0xff]  ;;  %v2166_v49 = vld [vmem:[%s3856_s4 + $0x478] sm:$0xff] }
  0x85   : > { %2654 = vmatpush3.msra.mxu0 %v2132_v41  ;;  %2698 = vmatpush3.msra.mxu1 %v2148_v37  ;;  %v1342_v41 = vrot.slane %v613_v21, 1  ;;  %v2144_v37 = vld [vmem:[%s3856_s4 + $0x3c8] sm:$0xff]  ;;  %v1340_v38 = vsel %vm881_vm0, %v1338_v24, %v1339_v30  ;;  %v2119_v5 = vld [vmem:[%s3856_s4 + $0x300] sm:$0xff]  ;;  %v2165_v55 = vld [vmem:[%s3856_s4 + $0x470] sm:$0xff] }
  0x86   : > { %2655 = vmatprep.subr.mxu0 %v2131_v54  ;;  %2641 = vmatmul.mubr.f32.gmra.mxu1 %v1331_v62  ;;  %v2122_v62 = vld [vmem:[%s3856_s4 + $0x318] sm:$0xff]  ;;  %v2135_v6 = vld [vmem:[%s3856_s4 + $0x380] sm:$0xff]  ;;  %v321_v21 = vld [vmem:[%s2928_s14 + $0x88] sm:$0x1] }
  0x87   : > { %2699 = vmatprep.subr.mxu1 %v2147_v4  ;;  %2599 = vmatprep.mubr.f32.mxu0 %v618_v0  ;;  %v1343_v39 = vsel %vm881_vm0, %v1341_v36, %v1342_v41  ;;  %v2121_v0 = vld [vmem:[%s3856_s4 + $0x310] sm:$0xff]  ;;  %v320_v10 = vld [vmem:[%s2928_s14 + $0x80] sm:$0xff]  ;;  %v2152_v30 = vld [vmem:[%s3856_s4 + $0x408] sm:$0xff] }
  0x88   : > { %2656 = vmatpush3.msra.mxu0 %v2131_v54  ;;  %2700 = vmatpush3.msra.mxu1 %v2147_v4  ;;  %v2140_v54 = vld [vmem:[%s3856_s4 + $0x3a8] sm:$0xff]  ;;  %v2138_v4 = vld [vmem:[%s3856_s4 + $0x398] sm:$0xff]  ;;  %v2159_v15 = vld [vmem:[%s3856_s4 + $0x440] sm:$0xff] }
  0x89   : > { %2600 = vmatmul.mubr.f32.gmra.mxu0 %v619_v3  ;;  %2657 = vmatprep.subr.mxu0 %v2130_v12  ;;  %v2136_v3 = vld [vmem:[%s3856_s4 + $0x388] sm:$0xff]  ;;  %v2151_v36 = vld [vmem:[%s3856_s4 + $0x400] sm:$0xff] }
  0x8a   : > { %2701 = vmatprep.subr.mxu1 %v2146_v13  ;;  %2643 = vmatprep.mubr.f32.mxu1 %v1334_v14  ;;  %v546_v14 = vld [vmem:[%s3853_s1 + $0x110] sm:$0xff] }
  0x8b   : > { %2658 = vmatpush3.msra.mxu0 %v2130_v12  ;;  %2702 = vmatpush3.msra.mxu1 %v2146_v13  ;;  %v377_v12 = vmul.f32 %v3525_v7, %v320_v10  ;;  %v330_v13 = vld [vmem:[%s2928_s14 + $0x110] sm:$0xff]  ;;  %s298_s14 = scalar_lea.vmem %s3858_s6, %s3881_s25 }
  0x8c   : > { %2659 = vmatprep.subr.mxu0 %v2129_v50  ;;  %2644 = vmatmul.mubr.f32.gmra.mxu1 %v1337_v26  ;;  %v2154_v26 = vld [vmem:[%s3856_s4 + $0x418] sm:$0xff] }
  0x8d   : > { %2703 = vmatprep.subr.mxu1 %v2145_v25  ;;  %2602 = vmatprep.mubr.f32.mxu0 %v620_v28  ;;  %v537_v28 = vld [vmem:[%s3853_s1 + $0x88] sm:$0x1] }
  0x8e   : > { %2660 = vmatpush3.msra.mxu0 %v2129_v50  ;;  %2704 = vmatpush3.msra.mxu1 %v2145_v25  ;;  %v2157_v50 = vld [vmem:[%s3856_s4 + $0x430] sm:$0xff] }
  0x8f   : > { %2603 = vmatmul.mubr.f32.gmra.mxu0 %v621_v35  ;;  %2661 = vmatprep.subr.mxu0 %v2128_v29 }
  0x90   : > { %2705 = vmatprep.subr.mxu1 %v2144_v37  ;;  %2646 = vmatprep.mubr.f32.mxu1 %v1340_v38 }
  0x91   : > { %2662 = vmatpush3.msra.mxu0 %v2128_v29  ;;  %2706 = vmatpush3.msra.mxu1 %v2144_v37 }
  0x92   : > { %2663 = vmatprep.subr.mxu0 %v2127_v31  ;;  %2647 = vmatmul.mubr.f32.gmra.mxu1 %v1343_v39 }
  0x93   : > { %2707 = vmatprep.subr.mxu1 %v2143_v40  ;;  %2664 = vmatpush3.msra.mxu0 %v2127_v31 }
  0x94   : > { %2708 = vmatpush3.msra.mxu1 %v2143_v40  ;;  %2665 = vmatprep.subr.mxu0 %v2126_v42 }
  0x95   : > { %2709 = vmatprep.subr.mxu1 %v2142_v43  ;;  %2666 = vmatpush3.msra.mxu0 %v2126_v42 }
  0x96   : > { %2710 = vmatpush3.msra.mxu1 %v2142_v43  ;;  %2667 = vmatprep.subr.mxu0 %v2125_v45 }
  0x97   : > { %2711 = vmatprep.subr.mxu1 %v2141_v46  ;;  %2668 = vmatpush3.msra.mxu0 %v2125_v45 }
  0x98   : > { %2712 = vmatpush3.msra.mxu1 %v2141_v46  ;;  %2669 = vmatprep.subr.mxu0 %v2124_v51 }
  0x99   : > { %2713 = vmatprep.subr.mxu1 %v2140_v54  ;;  %2670 = vmatpush3.msra.mxu0 %v2124_v51 }
  0x9a   : > { %2714 = vmatpush3.msra.mxu1 %v2140_v54  ;;  %2671 = vmatprep.subr.mxu0 %v2123_v58 }
  0x9b   : > { %2715 = vmatprep.subr.mxu1 %v2139_v60  ;;  %2672 = vmatpush3.msra.mxu0 %v2123_v58 }
  0x9c   : > { %2716 = vmatpush3.msra.mxu1 %v2139_v60  ;;  %2673 = vmatprep.subr.mxu0 %v2122_v62 }
  0x9d   : > { %2717 = vmatprep.subr.mxu1 %v2138_v4  ;;  %2674 = vmatpush3.msra.mxu0 %v2122_v62 }
  0x9e   : > { %2718 = vmatpush3.msra.mxu1 %v2138_v4  ;;  %2675 = vmatprep.subr.mxu0 %v2121_v0 }
  0x9f   : > { %2719 = vmatprep.subr.mxu1 %v2137_v1  ;;  %2676 = vmatpush3.msra.mxu0 %v2121_v0 }
  0xa0   : > { %2720 = vmatpush3.msra.mxu1 %v2137_v1  ;;  %2677 = vmatprep.subr.mxu0 %v2120_v16 }
  0xa1   : > { %2721 = vmatprep.subr.mxu1 %v2136_v3  ;;  %2678 = vmatpush3.msra.mxu0 %v2120_v16 }
  0xa2   : > { %2722 = vmatpush3.msra.mxu1 %v2136_v3  ;;  %2679 = vmatprep.subr.mxu0 %v2119_v5 }
  0xa3   : > { %2723 = vmatprep.subr.mxu1 %v2135_v6  ;;  %2680 = vmatpush3.msra.mxu0 %v2119_v5 }
  0xa4   : > { %2681 = vmatprep.mubr.f32.mxu0 %v3022_v57  ;;  %2724 = vmatpush3.msra.mxu1 %v2135_v6  ;;  %v2164_v57 = vld [vmem:[%s3856_s4 + $0x468] sm:$0xff] }
  0xa5   : > { %2682 = vmatmul.mubr.f32.vlgmr.msra.gmra.mxu0 %v3118_v48  ;;  %2725 = vmatprep.mubr.f32.mxu1 %v3020_v56  ;;  %v2163_v56 = vld [vmem:[%s3856_s4 + $0x460] sm:$0xff]  ;;  %v387_v48 = vmul.f32 %v3525_v7, %v330_v13 }
  0xa6   : > { %2737 = vmatprep.subr.mxu0 %v2166_v49  ;;  %2781 = vmatprep.subr.mxu1 %v2166_v49 }
  0xa7   : > { %2726 = vmatmul.mubr.f32.vlgmr.msra.gmra.mxu1 %v3112_v44  ;;  %2738 = vmatpush3.msra.mxu0 %v2166_v49  ;;  %v434_v44 = vadd.f32 %v3544_v27, %v377_v12  ;;  %v444_v32 = vadd.f32 %v3544_v27, %v387_v48 }
  0xa8   : > { %2797 = vmatpush3.msra.mxu1 %v2166_v49  ;;  %2739 = vmatprep.subr.mxu0 %v2165_v55 }
  0xa9   : > { %2782 = vmatprep.subr.mxu1 %v2165_v55  ;;  %2684 = vmatprep.mubr.f32.mxu0 %v3139_v2  ;;  %v2162_v2 = vld [vmem:[%s3856_s4 + $0x458] sm:$0xff] }
  0xaa   : > { %2740 = vmatpush3.msra.mxu0 %v2165_v55  ;;  %2798 = vmatpush3.msra.mxu1 %v2165_v55 }
  0xab   : > { %2685 = vmatmul.mubr.f32.gmra.mxu0 %v3164_v18  ;;  %2741 = vmatprep.subr.mxu0 %v2164_v57  ;;  %v485_v18 = vmax.f32 %v434_v44, 0.0 }
  0xac   : > { %2783 = vmatprep.subr.mxu1 %v2164_v57  ;;  %2728 = vmatprep.mubr.f32.mxu1 %v3133_v61  ;;  %v536_v61 = vld [vmem:[%s3853_s1 + $0x80] sm:$0xff] }
  0xad   : > { %2742 = vmatpush3.msra.mxu0 %v2164_v57  ;;  %2799 = vmatpush3.msra.mxu1 %v2164_v57  ;;  %v3743_v11 = vmul.f32 %v536_v61, %v485_v18 }
  0xae   : > { %2743 = vmatprep.subr.mxu0 %v2163_v56  ;;  %2729 = vmatmul.mubr.f32.gmra.mxu1 %v3162_v17  ;;  %v2161_v17 = vld [vmem:[%s3856_s4 + $0x450] sm:$0xff] }
  0xaf   : > { %2784 = vmatprep.subr.mxu1 %v2163_v56  ;;  %2687 = vmatprep.mubr.f32.mxu0 %v3189_v34  ;;  %v495_v34 = vmax.f32 %v444_v32, 0.0  ;;  %v1744_v41 = vrot.slane %v3743_v11, 1 }
  0xb0   : > { %2744 = vmatpush3.msra.mxu0 %v2163_v56  ;;  %2800 = vmatpush3.msra.mxu1 %v2163_v56 }
  0xb1   : > { %2688 = vmatmul.mubr.f32.gmra.mxu0 %v3218_v53  ;;  %2745 = vmatprep.subr.mxu0 %v2162_v2  ;;  %v2160_v53 = vld [vmem:[%s3856_s4 + $0x448] sm:$0xff] }
  0xb2   : > { %2785 = vmatprep.subr.mxu1 %v2162_v2  ;;  %2731 = vmatprep.mubr.f32.mxu1 %v3187_v33  ;;  %v597_v33 = vmul.f32 %v546_v14, %v495_v34 }
  0xb3   : > { %2746 = vmatpush3.msra.mxu0 %v2162_v2  ;;  %2801 = vmatpush3.msra.mxu1 %v2162_v2 }
  0xb4   : > { %2747 = vmatprep.subr.mxu0 %v2161_v17  ;;  %2732 = vmatmul.mubr.f32.gmra.mxu1 %v3216_v52  ;;  %v2158_v52 = vld [vmem:[%s3856_s4 + $0x438] sm:$0xff] }
  0xb5   : > { %2786 = vmatprep.subr.mxu1 %v2161_v17  ;;  %2690 = vmatprep.mubr.f32.mxu0 %v3245_v9  ;;  %v378_v9 = vmul.f32 %v3525_v7, %v321_v21  ;;  %v2155_v7 = vld [vmem:[%s3856_s4 + $0x420] sm:$0xff] }
  0xb6   : > { %2748 = vmatpush3.msra.mxu0 %v2161_v17  ;;  %2802 = vmatpush3.msra.mxu1 %v2161_v17 }
  0xb7   : > { %2691 = vmatmul.mubr.f32.gmra.mxu0 %v3743_v11  ;;  %2749 = vmatprep.subr.mxu0 %v2160_v53  ;;  %v435_v24 = vadd.f32 %v3544_v27, %v378_v9  ;;  %v2153_v27 = vld [vmem:[%s3856_s4 + $0x410] sm:$0xff] }
  0xb8   : > { %2787 = vmatprep.subr.mxu1 %v2160_v53  ;;  %2734 = vmatprep.mubr.f32.mxu1 %v3243_v8  ;;  %v2156_v8 = vld [vmem:[%s3856_s4 + $0x428] sm:$0xff] }
  0xb9   : > { %2750 = vmatpush3.msra.mxu0 %v2160_v53  ;;  %2803 = vmatpush3.msra.mxu1 %v2160_v53  ;;  %v486_v25 = vmax.f32 %v435_v24, 0.0 }
  0xba   : > { %2751 = vmatprep.subr.mxu0 %v2159_v15  ;;  %2735 = vmatmul.mubr.f32.gmra.mxu1 %v597_v33 }
  0xbb   : > { %2788 = vmatprep.subr.mxu1 %v2159_v15  ;;  %2752 = vmatpush3.msra.mxu0 %v2159_v15  ;;  %v588_v35 = vmul.f32 %v537_v28, %v486_v25 }
  0xbc   : > { %2804 = vmatpush3.msra.mxu1 %v2159_v15  ;;  %2753 = vmatprep.subr.mxu0 %v2158_v52 }
  0xbd   : > { %2789 = vmatprep.subr.mxu1 %v2158_v52  ;;  %2754 = vmatpush3.msra.mxu0 %v2158_v52  ;;  %v1745_v29 = vrot.slane %v588_v35, 1 }
  0xbe   : > { %2805 = vmatpush3.msra.mxu1 %v2158_v52  ;;  %2755 = vmatprep.subr.mxu0 %v2157_v50 }
  0xbf   : > { %2790 = vmatprep.subr.mxu1 %v2157_v50  ;;  %2756 = vmatpush3.msra.mxu0 %v2157_v50  ;;  %v1746_v37 = vsel %vm881_vm0, %v1744_v41, %v1745_v29 }
  0xc0   : > { %2806 = vmatpush3.msra.mxu1 %v2157_v50  ;;  %2757 = vmatprep.subr.mxu0 %v2156_v8 }
  0xc1   : > { %2791 = vmatprep.subr.mxu1 %v2156_v8  ;;  %2758 = vmatpush3.msra.mxu0 %v2156_v8 }
  0xc2   : > { %2807 = vmatpush3.msra.mxu1 %v2156_v8  ;;  %2759 = vmatprep.subr.mxu0 %v2155_v7 }
  0xc3   : > { %2792 = vmatprep.subr.mxu1 %v2155_v7  ;;  %2760 = vmatpush3.msra.mxu0 %v2155_v7 }
  0xc4   : > { %2808 = vmatpush3.msra.mxu1 %v2155_v7  ;;  %2761 = vmatprep.subr.mxu0 %v2154_v26 }
  0xc5   : > { %2793 = vmatprep.subr.mxu1 %v2154_v26  ;;  %2762 = vmatpush3.msra.mxu0 %v2154_v26 }
  0xc6   : > { %2809 = vmatpush3.msra.mxu1 %v2154_v26  ;;  %2763 = vmatprep.subr.mxu0 %v2153_v27 }
  0xc7   : > { %2794 = vmatprep.subr.mxu1 %v2153_v27  ;;  %2764 = vmatpush3.msra.mxu0 %v2153_v27 }
  0xc8   : > { %2810 = vmatpush3.msra.mxu1 %v2153_v27  ;;  %2765 = vmatprep.subr.mxu0 %v2152_v30 }
  0xc9   : > { %2795 = vmatprep.subr.mxu1 %v2152_v30  ;;  %2766 = vmatpush3.msra.mxu0 %v2152_v30 }
  0xca   : > { %2811 = vmatpush3.msra.mxu1 %v2152_v30  ;;  %2767 = vmatprep.subr.mxu0 %v2151_v36 }
  0xcb   : > { %2796 = vmatprep.subr.mxu1 %v2151_v36  ;;  %2768 = vmatpush3.msra.mxu0 %v2151_v36 }
  0xcc   : > { %2812 = vmatpush3.msra.mxu1 %v2151_v36  ;;  %2769 = vmatprep.mubr.f32.mxu0 %v3291_v47 }
  0xcd   : > { %2775 = vmatprep.mubr.f32.mxu1 %v3378_v63  ;;  %2770 = vmatmul.mubr.f32.vlgmr.msra.gmra.mxu0 %v3330_v19 }
  0xce   : > { %2776 = vmatmul.mubr.f32.vlgmr.msra.gmra.mxu1 %v3410_v20  ;;  %2772 = vmatprep.mubr.f32.mxu0 %v3334_v23 }
  0xcf   : > { %2778 = vmatprep.mubr.f32.mxu1 %v3413_v22 }
  0xd1   : > { %2773 = vmatmul.mubr.f32.gmra.mxu0 %v3374_v59 }
  0xd2   : > { %2779 = vmatmul.mubr.f32.gmra.mxu1 %v1746_v37 }
  0xed   : > { %v2419_v38 = vpop.f32.mrf.mxu0 }
  0xee   : > { %v2463_v31 = vpop.f32.mrf.mxu1 }
  0xef   : > { %v721_v39 = vpop.f32.mrf.mxu0  ;;  %v832_v26 = vadd.f32 %v2463_v31, %v2419_v38 }
  0xf0   : > { %v826_v40 = vpop.f32.mrf.mxu1 }
  0xf1   : > { %v827_v27 = vadd.f32 %v826_v40, %v721_v39 }
 0x102   : > { %v2422_v47 = vpop.f32.mrf.mxu0 }
 0x103   : > { %v2466_v42 = vpop.f32.mrf.mxu1 }
 0x104   : > { %v731_v63 = vpop.f32.mrf.mxu0  ;;  %v842_v37 = vadd.f32 %v2466_v42, %v2422_v47 }
 0x105   : > { %v836_v43 = vpop.f32.mrf.mxu1 }
 0x108   : > { %v2425_v19 = vpop.f32.mrf.mxu0 }
 0x109   : > { %v2469_v45 = vpop.f32.mrf.mxu1 }
 0x10a   : > { %v741_v20 = vpop.f32.mrf.mxu0  ;;  %v852_v25 = vadd.f32 %v2469_v45, %v2425_v19 }
 0x10b   : > { %v846_v46 = vpop.f32.mrf.mxu1 }
 0x10c   : > { %v847_v35 = vadd.f32 %v846_v46, %v741_v20 }
 0x10e   : > { %v2428_v23 = vpop.f32.mrf.mxu0 }
 0x10f   : > { %v2472_v51 = vpop.f32.mrf.mxu1 }
 0x110   : > { %v751_v22 = vpop.f32.mrf.mxu0 }
 0x111   : > { %v856_v54 = vpop.f32.mrf.mxu1 }
 0x115   : > { %v2507_v58 = vpop.f32.mrf.mxu0 }
 0x116   : > { %v1037_v36 = vadd.f32 %v2507_v58, %v832_v26 }
 0x117   : > { %v2551_v60 = vpop.f32.mrf.mxu1  ;;  %v997_v59 = vpop.f32.mrf.mxu0 }
 0x118   : > { %v1036_v29 = vadd.f32 %v997_v59, %v827_v27 }
 0x119   : > { %v1127_v62 = vpop.f32.mrf.mxu1 }
 0x11a   : > { %v1166_v31 = vadd.f32 %v1127_v62, %v1036_v29 }
 0x11b   : > { %v2510_v4 = vpop.f32.mrf.mxu0 }
 0x11d   : > { %v1007_v1 = vpop.f32.mrf.mxu0 }
 0x11e   : > { %v3797_v0 = vpop.f32.mrf.mxu1 }
 0x120   : > { %v3799_v16 = vpop.f32.mrf.mxu1 }
 0x121   : > { %3860 = vst [vmem:[#allocation2_spill] sm:$0xff] %v3799_v16  ;;  %v2513_v3 = vpop.f32.mrf.mxu0  ;;  %v1039_v16 = vadd.f32 %v2510_v4, %v842_v37 }
 0x122   : > { %v1041_v41 = vadd.f32 %v2513_v3, %v852_v25 }
 0x123   : > { %v1017_v6 = vpop.f32.mrf.mxu0 }
 0x124   : > { %v2557_v5 = vpop.f32.mrf.mxu1 }
 0x125   : > { %v1171_v38 = vadd.f32 %v2557_v5, %v1041_v41 }
 0x126   : > { %v1147_v49 = vpop.f32.mrf.mxu1 }
 0x127   : > { %v2516_v10 = vpop.f32.mrf.mxu0 }
 0x129   : > { %v1027_v12 = vpop.f32.mrf.mxu0 }
 0x12a   : > { %v2560_v55 = vpop.f32.mrf.mxu1 }
 0x12c   : > { %v1157_v13 = vpop.f32.mrf.mxu1 }
 0x13d   : > { %v2595_v57 = vpop.f32.mrf.mxu0 }
 0x13f   : > { %v2639_v56 = vpop.f32.mrf.mxu1  ;;  %v1257_v44 = vpop.f32.mrf.mxu0 }
 0x140   : > { %v1296_v58 = vadd.f32 %v1257_v44, %v1166_v31 }
 0x141   : > { %v1435_v48 = vpop.f32.mrf.mxu1 }
 0x142   : > { %v1474_v4 = vadd.f32 %v1435_v48, %v1296_v58 }
 0x143   : > { %v2598_v2 = vpop.f32.mrf.mxu0 }
 0x145   : > { %v1267_v32 = vpop.f32.mrf.mxu0 }
 0x146   : > { %v3801_v18 = vpop.f32.mrf.mxu1 }
 0x147   : > { %3861 = vst [vmem:[#allocation3_spill] sm:$0xff] %v3801_v18  ;;  %v857_v18 = vadd.f32 %v856_v54, %v751_v22 }
 0x148   : > { %v3803_v61 = vpop.f32.mrf.mxu1 }
 0x149   : > { %3862 = vst [vmem:[#allocation4_spill] sm:$0xff] %v3803_v61  ;;  %v2601_v17 = vpop.f32.mrf.mxu0  ;;  %v1042_v45 = vadd.f32 %v1027_v12, %v857_v18 }
 0x14a   : > { %v1301_v46 = vadd.f32 %v2601_v17, %v1171_v38 }
 0x14b   : > { %v1277_v34 = vpop.f32.mrf.mxu0  ;;  %v1172_v54 = vadd.f32 %v1157_v13, %v1042_v45 }
 0x14c   : > { %v2645_v11 = vpop.f32.mrf.mxu1 }
 0x14d   : > { %v1479_v62 = vadd.f32 %v2645_v11, %v1301_v46 }
 0x14e   : > { %v1455_v14 = vpop.f32.mrf.mxu1 }
 0x14f   : > { %v2604_v53 = vpop.f32.mrf.mxu0 }
 0x151   : > { %v1287_v15 = vpop.f32.mrf.mxu0 }
 0x152   : > { %v3805_v33 = vpop.f32.mrf.mxu1 }
 0x153   : > { %3863 = vst [vmem:[#allocation5_spill] sm:$0xff] %v3805_v33  ;;  %v862_v33 = vadd.f32 %v2472_v51, %v2428_v23  ;;  %v3868_v23 = vld [vmem:[#allocation2_spill] sm:$0xff] }
 0x154   : > { %v3807_v21 = vpop.f32.mrf.mxu1 }
 0x155   : > { %3864 = vst [vmem:[#allocation6_spill] sm:$0xff] %v3807_v21  ;;  %v1040_v21 = vadd.f32 %v1017_v6, %v847_v35  ;;  %v1043_v40 = vadd.f32 %v2516_v10, %v862_v33  ;;  %v1302_v10 = vadd.f32 %v1287_v15, %v1172_v54 }
 0x157   : > { %v1170_v19 = vadd.f32 %v1147_v49, %v1040_v21  ;;  %v1173_v22 = vadd.f32 %v2560_v55, %v1043_v40  ;;  %v3870_v55 = vld [vmem:[#allocation4_spill] sm:$0xff] }
 0x159   : > { %v1303_v3 = vadd.f32 %v2604_v53, %v1173_v22 }
 0x15c   : > { %v3872_v48 = vld [vmem:[#allocation6_spill] sm:$0xff] }
 0x165   : > { %v2683_v52 = vpop.f32.mrf.mxu0 }
 0x167   : > { %v3809_v9 = vpop.f32.mrf.mxu1  ;;  %v1565_v50 = vpop.f32.mrf.mxu0 }
 0x168   : > { %3865 = vst [vmem:[#allocation7_spill] sm:$0xff] %v3809_v9  ;;  %v837_v9 = vadd.f32 %v836_v43, %v731_v63  ;;  %v1169_v63 = vadd.f32 %v3797_v0, %v1039_v16  ;;  %v1300_v43 = vadd.f32 %v1277_v34, %v1170_v19  ;;  %v1604_v44 = vadd.f32 %v1565_v50, %v1474_v4  ;;  %v3869_v0 = vld [vmem:[#allocation3_spill] sm:$0xff] }
 0x169   : > { %v3811_v8 = vpop.f32.mrf.mxu1 }
 0x16a   : > { %3866 = vst [vmem:[#allocation8_spill] sm:$0xff] %v3811_v8  ;;  %v1038_v39 = vadd.f32 %v1007_v1, %v837_v9  ;;  %v1299_v59 = vadd.f32 %v2598_v2, %v1169_v63  ;;  %v1478_v49 = vadd.f32 %v1455_v14, %v1300_v43 }
 0x16b   : > { %v2686_v24 = vpop.f32.mrf.mxu0 }
 0x16c   : > { %v1168_v51 = vadd.f32 %v3868_v23, %v1038_v39  ;;  %v1477_v16 = vadd.f32 %v3869_v0, %v1299_v59 }
 0x16d   : > { %v1575_v28 = vpop.f32.mrf.mxu0 }
 0x16e   : > { %v3813_v7 = vpop.f32.mrf.mxu1  ;;  %v1298_v1 = vadd.f32 %v1267_v32, %v1168_v51  ;;  %v1480_v32 = vadd.f32 %v3872_v48, %v1302_v10  ;;  %v1607_v33 = vadd.f32 %v2686_v24, %v1477_v16 }
 0x16f   : > { %3867 = vst [vmem:[#allocation9_spill] sm:$0xff] %v3813_v7  ;;  %v1167_v7 = vadd.f32 %v2551_v60, %v1037_v36  ;;  %v3873_v34 = vld [vmem:[#allocation7_spill] sm:$0xff] }
 0x170   : > { %v3815_v30 = vpop.f32.mrf.mxu1  ;;  %v1476_v13 = vadd.f32 %v3870_v55, %v1298_v1 }
 0x171   : > { %v2689_v61 = vpop.f32.mrf.mxu0  ;;  %v1297_v20 = vadd.f32 %v2595_v57, %v1167_v7  ;;  %v3874_v15 = vld [vmem:[#allocation8_spill] sm:$0xff] }
 0x172   : > { %v1609_v57 = vadd.f32 %v2689_v61, %v1479_v62  ;;  %v1734_v21 = vadd.f32 %v3874_v15, %v1604_v44  ;;  %v1606_v61 = vadd.f32 %v1575_v28, %v1476_v13 }
 0x173   : > { %v1585_v47 = vpop.f32.mrf.mxu0  ;;  %v1475_v60 = vadd.f32 %v2639_v56, %v1297_v20  ;;  %v3871_v56 = vld [vmem:[#allocation5_spill] sm:$0xff] }
 0x174   : > { %v2733_v8 = vpop.f32.mrf.mxu1  ;;  %v1608_v18 = vadd.f32 %v1585_v47, %v1478_v49  ;;  %v1481_v2 = vadd.f32 %v3871_v56, %v1303_v3  ;;  %v1736_v31 = vadd.f32 %v3815_v30, %v1606_v61 }
 0x175   : > { %v1605_v12 = vadd.f32 %v2683_v52, %v1475_v60  ;;  %v1739_v14 = vadd.f32 %v2733_v8, %v1609_v57 }
 0x176   : > { %v1715_v42 = vpop.f32.mrf.mxu1  ;;  %v3875_v35 = vld [vmem:[#allocation9_spill] sm:$0xff] }
 0x177   : > { %v2692_v5 = vpop.f32.mrf.mxu0  ;;  %v1735_v53 = vadd.f32 %v3873_v34, %v1605_v12  ;;  %v1738_v7 = vadd.f32 %v1715_v42, %v1608_v18  ;;  %v1737_v28 = vadd.f32 %v3875_v35, %v1607_v33 }
 0x178   : > { %v1611_v52 = vadd.f32 %v2692_v5, %v1481_v2 }
 0x179   : > { %v1595_v17 = vpop.f32.mrf.mxu0 }
 0x17a   : > { %v2736_v6 = vpop.f32.mrf.mxu1  ;;  %v1610_v26 = vadd.f32 %v1595_v17, %v1480_v32 }
 0x17b   : > { %v1741_v29 = vadd.f32 %v2736_v6, %v1611_v52 }
 0x17c   : > { %v1725_v11 = vpop.f32.mrf.mxu1 }
 0x17d   : > { %v1740_v39 = vadd.f32 %v1725_v11, %v1610_v26 }
 0x18d   : > { %v2771_v9 = vpop.f32.mrf.mxu0 }
 0x18e   : > { %v2777_v50 = vpop.f32.mrf.mxu1  ;;  %v1871_v25 = vadd.f32 %v2771_v9, %v1735_v53 }
 0x18f   : > { %v1875_v24 = vadd.f32 %v2777_v50, %v1739_v14  ;;  %v1831_v8 = vpop.f32.mrf.mxu0 }
 0x190   : > { %v1851_v27 = vpop.f32.mrf.mxu1  ;;  %1879 = vst [vmem:[%s3829_s30 + $0x8] sm:$0xff] %v1871_v25  ;;  %v1870_v36 = vadd.f32 %v1831_v8, %v1734_v21  ;;  %v1901_v58 = vmul.f32 %v1871_v25, %v1871_v25 }
 0x191   : > { %1883 = vst [vmem:[%s3829_s30 + $0x28] sm:$0xff] %v1875_v24  ;;  %v1874_v41 = vadd.f32 %v1851_v27, %v1738_v7  ;;  %v2774_v37 = vpop.f32.mrf.mxu0  ;;  %v1905_v4 = vmul.f32 %v1875_v24, %v1875_v24 }
 0x192   : > { %v2780_v38 = vpop.f32.mrf.mxu1  ;;  %1878 = vst [vmem:[%s3829_s30] sm:$0xff] %v1870_v36  ;;  %v1900_v40 = vmul.f32 %v1870_v36, %v1870_v36  ;;  %v1873_v19 = vadd.f32 %v2774_v37, %v1737_v28  ;;  %v1886_v47 = vadd.f32 %v1871_v25, %v1870_v36 }
 0x193   : > { %1882 = vst [vmem:[%s3829_s30 + $0x20] sm:$0xff] %v1874_v41  ;;  %v1877_v45 = vadd.f32 %v2780_v38, %v1741_v29  ;;  %v1841_v20 = vpop.f32.mrf.mxu0  ;;  %v1904_v60 = vmul.f32 %v1874_v41, %v1874_v41 }
 0x194   : > { %v1861_v46 = vpop.f32.mrf.mxu1  ;;  %1881 = vst [vmem:[%s3829_s30 + $0x18] sm:$0xff] %v1873_v19  ;;  %v1872_v42 = vadd.f32 %v1841_v20, %v1736_v31  ;;  %v1908_v43 = vadd.f32 %v1901_v58, %v1900_v40  ;;  %v1903_v51 = vmul.f32 %v1873_v19, %v1873_v19 }
 0x195   : > { %v1876_v63 = vadd.f32 %v1861_v46, %v1740_v39  ;;  %1885 = vst [vmem:[%s3829_s30 + $0x38] sm:$0xff] %v1877_v45  ;;  %v1907_v10 = vmul.f32 %v1877_v45, %v1877_v45 }
 0x196   : > { %1880 = vst [vmem:[%s3829_s30 + $0x10] sm:$0xff] %v1872_v42  ;;  %v1887_v23 = vadd.f32 %v1886_v47, %v1872_v42  ;;  %v1902_v30 = vmul.f32 %v1872_v42, %v1872_v42 }
 0x197   : > { %1884 = vst [vmem:[%s3829_s30 + $0x30] sm:$0xff] %v1876_v63  ;;  %v1906_v6 = vmul.f32 %v1876_v63, %v1876_v63 }
 0x198   : > { %v1888_v22 = vadd.f32 %v1887_v23, %v1873_v19  ;;  %v1909_v54 = vadd.f32 %v1908_v43, %v1902_v30 }
 0x19a   : > { %v1910_v59 = vadd.f32 %v1909_v54, %v1903_v51  ;;  %v1889_v62 = vadd.f32 %v1888_v22, %v1874_v41 }
 0x19c   : > { %v1890_v1 = vadd.f32 %v1889_v62, %v1875_v24  ;;  %v1911_v3 = vadd.f32 %v1910_v59, %v1904_v60 }
 0x19e   : > { %v1891_v5 = vadd.f32 %v1890_v1, %v1876_v63  ;;  %v1912_v49 = vadd.f32 %v1911_v3, %v1905_v4 }
 0x1a0   : > { %v1892_v12 = vadd.f32 %v1891_v5, %v1877_v45  ;;  %v1913_v57 = vadd.f32 %v1912_v49, %v1906_v6 }
 0x1a2   : > { %v1893_v44 = vrot.slane %v1892_v12, 4  ;;  %v1914_v0 = vadd.f32 %v1913_v57, %v1907_v10 }
 0x1a4   : > { %v1894_v16 = vadd.f32 %v1893_v44, %v1892_v12  ;;  %v1915_v18 = vrot.slane %v1914_v0, 4 }
 0x1a6   : > { %v1895_v55 = vrot.slane %v1894_v16, 2  ;;  %v1916_v13 = vadd.f32 %v1915_v18, %v1914_v0 }
 0x1a8   : > { %v1896_v56 = vadd.f32 %v1895_v55, %v1894_v16  ;;  %v1917_v2 = vrot.slane %v1916_v13, 2 }
 0x1aa   : > { %v1897_v17 = vrot.slane %v1896_v56, 1  ;;  %v1918_v11 = vadd.f32 %v1917_v2, %v1916_v13 }
 0x1ac   : > { %v1898_v48 = vadd.f32 %v1897_v17, %v1896_v56  ;;  %v1919_v32 = vrot.slane %v1918_v11, 1 }
 0x1ae   : > { %1899 = vst [vmem:[%s298_s14] sm:$0x1] %v1898_v48  ;;  %v1920_v34 = vadd.f32 %v1919_v32, %v1918_v11 }
 0x1b0   : > { %1921 = vst [vmem:[%s301_s12] sm:$0x1] %v1920_v34 }
 0x1b1 PF: > { %s18_s24 = sadd.s32 1, %s2830_s24  }
 0x1b2   : > { %p15_p6 = scmp.ge.s32.totalorder %s18_s24, 4  }
 0x1b4   :  { %17 = sbr.rel (!%p15_p6) target bundleno = 1 (0x1), region = 102 }

// kernel: res_bottleneck_block.6
= control target key start
LH: loop header
LB: loop body
LE: loop exit
PB: predicated region body
PF: predicated region fallthrough
CT: control target
= control target key end

     0   :  { %s713_s21 = smov 0   ;;  %s806_s0 = inlined_call_operand.vmem [shape: f32[128,128], index: 0, kind: input, shape index: {}]   ;;  %s807_s1 = inlined_call_operand.vmem [shape: f32[1,128], index: 1, kind: input, shape index: {}]   ;;  %s808_s2 = inlined_call_operand.vmem [shape: f32[1,128], index: 2, kind: input, shape index: {}]   ;;  %s809_s3 = inlined_call_operand.vmem [shape: f32[128,128], index: 3, kind: input, shape index: {}]   ;;  %s810_s4 = inlined_call_operand.vmem [shape: f32[128,128], index: 4, kind: output, shape index: {0}]   ;;  %s811_s5 = inlined_call_operand.vmem [shape: f32[2,1,128], index: 5, kind: output, shape index: {1}]   ;;  %s812_s6 = inlined_call_operand.vmem [shape: f32[2,1,128], index: 6, kind: output, shape index: {2}]  }
   0x1 LB: > { %s719_s1 = sadd.s32 4294967295, %s676_s21   ;;  %p555_p0 = scmp.ge.s32.totalorder %s676_s21, 1  ;;  %s676_s21 = sphi %s713_s21, %s17_s21  }
   0x2   : > { %p218_p1 = scmp.lt.s32.totalorder %s676_s21, 3 }
   0x4   : > { %p219_p2 = pnand %p555_p0, %p218_p1 }
   0x5   : > { %s556_s7 = sshll.u32 (!%p219_p2), %s719_s1, 3  ;;  %p266_p4 = scmp.lt.s32.totalorder (!%p219_p2), %s719_s1, 1 }
   0x6   : > { %222 = sbr.rel (%p219_p2) target bundleno = 270 (0x10e), region = 36  ;;  %p255_p3 = scmp.lt.s32.totalorder (!%p219_p2), %s556_s7, 15 }
   0xb   : > { %v295_v0 = vld [vmem:[%s809_s3 + $0x78] sm:$0xff]  ;;  %v294_v1 = vld [vmem:[%s809_s3 + $0x70] sm:$0xff]  ;;  %v293_v2 = vld [vmem:[%s809_s3 + $0x68] sm:$0xff]  ;;  %s814_s7 = smov (!%p255_p3, %s556_s7), 15  ;;  %s816_s1 = smov (!%p266_p4, %s719_s1), 1 }
   0xc   : > { %586 = vmatprep.subr.mxu0 %v295_v0  ;;  %630 = vmatprep.subr.mxu1 %v295_v0  ;;  %v292_v3 = vld [vmem:[%s809_s3 + $0x60] sm:$0xff]  ;;  %v291_v4 = vld [vmem:[%s809_s3 + $0x58] sm:$0xff]  ;;  %v290_v5 = vld [vmem:[%s809_s3 + $0x50] sm:$0xff]  ;;  %s557_s20 = sshll.u32 %s814_s7, 3  ;;  %s268_s15 = scalar_lea.vmem %s811_s5, %s816_s1 }
   0xd   : > { %587 = vmatpush3.msra.mxu0 %v295_v0  ;;  %646 = vmatpush3.msra.mxu1 %v295_v0  ;;  %v289_v6 = vld [vmem:[%s809_s3 + $0x48] sm:$0xff]  ;;  %v288_v7 = vld [vmem:[%s809_s3 + $0x40] sm:$0xff]  ;;  %v287_v8 = vld [vmem:[%s809_s3 + $0x38] sm:$0xff]  ;;  %s768_s25 = scalar_lea.vmem %s806_s0, %s557_s20  ;;  %s264_s13 = scalar_lea.vmem %s810_s4, %s557_s20 }
   0xe   : > { %588 = vmatprep.subr.mxu0 %v294_v1  ;;  %631 = vmatprep.subr.mxu1 %v294_v1  ;;  %v286_v9 = vld [vmem:[%s809_s3 + $0x30] sm:$0xff]  ;;  %v285_v10 = vld [vmem:[%s809_s3 + $0x28] sm:$0xff]  ;;  %v284_v11 = vld [vmem:[%s809_s3 + $0x20] sm:$0xff]  ;;  %s271_s18 = scalar_lea.vmem %s812_s6, %s816_s1 }
   0xf   : > { %589 = vmatpush3.msra.mxu0 %v294_v1  ;;  %647 = vmatpush3.msra.mxu1 %v294_v1  ;;  %v283_v12 = vld [vmem:[%s809_s3 + $0x18] sm:$0xff]  ;;  %v282_v13 = vld [vmem:[%s809_s3 + $0x10] sm:$0xff]  ;;  %v272_v14 = vld [vmem:[%s768_s25] sm:$0xff] }
  0x10   : > { %590 = vmatprep.subr.mxu0 %v293_v2  ;;  %632 = vmatprep.subr.mxu1 %v293_v2  ;;  %v281_v15 = vld [vmem:[%s809_s3 + $0x8] sm:$0xff]  ;;  %v280_v16 = vld [vmem:[%s809_s3] sm:$0xff]  ;;  %v274_v18 = vld [vmem:[%s768_s25 + $0x10] sm:$0xff] }
  0x11   : > { %591 = vmatpush3.msra.mxu0 %v293_v2  ;;  %648 = vmatpush3.msra.mxu1 %v293_v2  ;;  %v273_v17 = vld [vmem:[%s768_s25 + $0x8] sm:$0xff]  ;;  %v276_v19 = vld [vmem:[%s768_s25 + $0x20] sm:$0xff]  ;;  %v278_v21 = vld [vmem:[%s768_s25 + $0x30] sm:$0xff] }
  0x12   : > { %592 = vmatprep.subr.mxu0 %v292_v3  ;;  %633 = vmatprep.subr.mxu1 %v292_v3  ;;  %v277_v20 = vld [vmem:[%s768_s25 + $0x28] sm:$0xff]  ;;  %v275_v22 = vld [vmem:[%s768_s25 + $0x18] sm:$0xff] }
  0x13   : > { %593 = vmatpush3.msra.mxu0 %v292_v3  ;;  %649 = vmatpush3.msra.mxu1 %v292_v3  ;;  %v279_v23 = vld [vmem:[%s768_s25 + $0x38] sm:$0xff] }
  0x14   : > { %594 = vmatprep.subr.mxu0 %v291_v4  ;;  %634 = vmatprep.subr.mxu1 %v291_v4 }
  0x15   : > { %595 = vmatpush3.msra.mxu0 %v291_v4  ;;  %650 = vmatpush3.msra.mxu1 %v291_v4 }
  0x16   : > { %596 = vmatprep.subr.mxu0 %v290_v5  ;;  %635 = vmatprep.subr.mxu1 %v290_v5 }
  0x17   : > { %597 = vmatpush3.msra.mxu0 %v290_v5  ;;  %651 = vmatpush3.msra.mxu1 %v290_v5 }
  0x18   : > { %598 = vmatprep.subr.mxu0 %v289_v6  ;;  %636 = vmatprep.subr.mxu1 %v289_v6 }
  0x19   : > { %599 = vmatpush3.msra.mxu0 %v289_v6  ;;  %652 = vmatpush3.msra.mxu1 %v289_v6 }
  0x1a   : > { %600 = vmatprep.subr.mxu0 %v288_v7  ;;  %637 = vmatprep.subr.mxu1 %v288_v7 }
  0x1b   : > { %601 = vmatpush3.msra.mxu0 %v288_v7  ;;  %653 = vmatpush3.msra.mxu1 %v288_v7 }
  0x1c   : > { %602 = vmatprep.subr.mxu0 %v287_v8  ;;  %638 = vmatprep.subr.mxu1 %v287_v8 }
  0x1d   : > { %603 = vmatpush3.msra.mxu0 %v287_v8  ;;  %654 = vmatpush3.msra.mxu1 %v287_v8 }
  0x1e   : > { %604 = vmatprep.subr.mxu0 %v286_v9  ;;  %639 = vmatprep.subr.mxu1 %v286_v9 }
  0x1f   : > { %605 = vmatpush3.msra.mxu0 %v286_v9  ;;  %655 = vmatpush3.msra.mxu1 %v286_v9 }
  0x20   : > { %606 = vmatprep.subr.mxu0 %v285_v10  ;;  %640 = vmatprep.subr.mxu1 %v285_v10 }
  0x21   : > { %607 = vmatpush3.msra.mxu0 %v285_v10  ;;  %656 = vmatpush3.msra.mxu1 %v285_v10 }
  0x22   : > { %608 = vmatprep.subr.mxu0 %v284_v11  ;;  %641 = vmatprep.subr.mxu1 %v284_v11 }
  0x23   : > { %609 = vmatpush3.msra.mxu0 %v284_v11  ;;  %657 = vmatpush3.msra.mxu1 %v284_v11 }
  0x24   : > { %610 = vmatprep.subr.mxu0 %v283_v12  ;;  %642 = vmatprep.subr.mxu1 %v283_v12 }
  0x25   : > { %611 = vmatpush3.msra.mxu0 %v283_v12  ;;  %658 = vmatpush3.msra.mxu1 %v283_v12 }
  0x26   : > { %612 = vmatprep.subr.mxu0 %v282_v13  ;;  %618 = vmatprep.mubr.f32.mxu0 %v272_v14 }
  0x27   : > { %613 = vmatpush3.msra.mxu0 %v282_v13  ;;  %643 = vmatprep.subr.mxu1 %v282_v13 }
  0x28   : > { %614 = vmatprep.subr.mxu0 %v281_v15  ;;  %659 = vmatpush3.msra.mxu1 %v282_v13 }
  0x29   : > { %615 = vmatpush3.msra.mxu0 %v281_v15  ;;  %644 = vmatprep.subr.mxu1 %v281_v15 }
  0x2a   : > { %616 = vmatprep.subr.mxu0 %v280_v16  ;;  %660 = vmatpush3.msra.mxu1 %v281_v15 }
  0x2b   : > { %617 = vmatpush3.msra.mxu0 %v280_v16  ;;  %645 = vmatprep.subr.mxu1 %v280_v16 }
  0x2c   : > { %619 = vmatmul.mubr.f32.vlgmr.msra.gmra.mxu0 %v273_v17  ;;  %661 = vmatpush3.msra.mxu1 %v280_v16 }
  0x2d   : > { %621 = vmatprep.mubr.f32.mxu0 %v274_v18  ;;  %624 = vmatprep.mubr.f32.mxu1 %v276_v19 }
  0x2e   : > { %625 = vmatmul.mubr.f32.vlgmr.msra.gmra.mxu1 %v277_v20 }
  0x2f   : > { %627 = vmatprep.mubr.f32.mxu1 %v278_v21 }
  0x30   : > { %622 = vmatmul.mubr.f32.gmra.mxu0 %v275_v22 }
  0x32   : > { %628 = vmatmul.mubr.f32.gmra.mxu1 %v279_v23 }
  0xec   : > { %v620_v24 = vpop.f32.mrf.mxu0 }
  0xed   : > { %402 = vst [vmem:[%s264_s13 + $0x8] sm:$0xff] %v620_v24  ;;  %v424_v30 = vmul.f32 %v620_v24, %v620_v24 }
  0xee   : > { %v362_v25 = vpop.f32.mrf.mxu0  ;;  %v626_v26 = vpop.f32.mrf.mxu1 }
  0xef   : > { %401 = vst [vmem:[%s264_s13] sm:$0xff] %v362_v25  ;;  %v423_v27 = vmul.f32 %v362_v25, %v362_v25  ;;  %406 = vst [vmem:[%s264_s13 + $0x28] sm:$0xff] %v626_v26  ;;  %v409_v31 = vadd.f32 %v620_v24, %v362_v25  ;;  %v428_v44 = vmul.f32 %v626_v26, %v626_v26 }
  0xf0   : > { %v623_v28 = vpop.f32.mrf.mxu0  ;;  %v382_v29 = vpop.f32.mrf.mxu1 }
  0xf1   : > { %404 = vst [vmem:[%s264_s13 + $0x18] sm:$0xff] %v623_v28  ;;  %405 = vst [vmem:[%s264_s13 + $0x20] sm:$0xff] %v382_v29  ;;  %v431_v34 = vadd.f32 %v424_v30, %v423_v27  ;;  %v426_v38 = vmul.f32 %v623_v28, %v623_v28  ;;  %v427_v43 = vmul.f32 %v382_v29, %v382_v29 }
  0xf2   : > { %v372_v32 = vpop.f32.mrf.mxu0  ;;  %v629_v33 = vpop.f32.mrf.mxu1 }
  0xf3   : > { %403 = vst [vmem:[%s264_s13 + $0x10] sm:$0xff] %v372_v32  ;;  %v410_v35 = vadd.f32 %v409_v31, %v372_v32  ;;  %v425_v36 = vmul.f32 %v372_v32, %v372_v32  ;;  %408 = vst [vmem:[%s264_s13 + $0x38] sm:$0xff] %v629_v33  ;;  %v430_v50 = vmul.f32 %v629_v33, %v629_v33 }
  0xf4   : > { %v392_v37 = vpop.f32.mrf.mxu1 }
  0xf5   : > { %v411_v39 = vadd.f32 %v623_v28, %v410_v35  ;;  %v432_v40 = vadd.f32 %v431_v34, %v425_v36  ;;  %407 = vst [vmem:[%s264_s13 + $0x30] sm:$0xff] %v392_v37  ;;  %v429_v48 = vmul.f32 %v392_v37, %v392_v37 }
  0xf7   : > { %v433_v41 = vadd.f32 %v432_v40, %v426_v38  ;;  %v412_v42 = vadd.f32 %v411_v39, %v382_v29 }
  0xf9   : > { %v434_v45 = vadd.f32 %v433_v41, %v427_v43  ;;  %v413_v46 = vadd.f32 %v626_v26, %v412_v42 }
  0xfb   : > { %v414_v47 = vadd.f32 %v413_v46, %v392_v37  ;;  %v435_v49 = vadd.f32 %v434_v45, %v428_v44 }
  0xfd   : > { %v415_v51 = vadd.f32 %v629_v33, %v414_v47  ;;  %v436_v52 = vadd.f32 %v435_v49, %v429_v48 }
  0xff   : > { %v416_v53 = vrot.slane %v415_v51, 4  ;;  %v437_v54 = vadd.f32 %v436_v52, %v430_v50 }
 0x101   : > { %v417_v55 = vadd.f32 %v416_v53, %v415_v51  ;;  %v438_v56 = vrot.slane %v437_v54, 4 }
 0x103   : > { %v418_v57 = vrot.slane %v417_v55, 2  ;;  %v439_v58 = vadd.f32 %v438_v56, %v437_v54 }
 0x105   : > { %v419_v59 = vadd.f32 %v418_v57, %v417_v55  ;;  %v440_v60 = vrot.slane %v439_v58, 2 }
 0x107   : > { %v420_v61 = vrot.slane %v419_v59, 1  ;;  %v441_v62 = vadd.f32 %v440_v60, %v439_v58 }
 0x109   : > { %v421_v63 = vadd.f32 %v420_v61, %v419_v59  ;;  %v442_v0 = vrot.slane %v441_v62, 1 }
 0x10b   : > { %422 = vst [vmem:[%s268_s15] sm:$0x1] %v421_v63  ;;  %v443_v1 = vadd.f32 %v442_v0, %v441_v62 }
 0x10d   : > { %444 = vst [vmem:[%s271_s18] sm:$0x1] %v443_v1 }
 0x10e PF: > { %s17_s21 = sadd.s32 1, %s676_s21  }
 0x10f   : > { %p14_p5 = scmp.ge.s32.totalorder %s17_s21, 4  }
 0x111   :  { %16 = sbr.rel (!%p14_p5) target bundleno = 1 (0x1), region = 90 }

// kernel: res_bottleneck_block.9
= control target key start
LH: loop header
LB: loop body
LE: loop exit
PB: predicated region body
PF: predicated region fallthrough
CT: control target
= control target key end

     0   :  { %11 = vsyncpa [#allocation3], 0  ;;  %s811_s0 = inlined_call_operand.vmem [shape: f32[128,128], index: 0, kind: input, shape index: {}]   ;;  %s812_s1 = inlined_call_operand.vmem [shape: f32[128,128], index: 1, kind: input, shape index: {}]   ;;  %s813_s2 = inlined_call_operand.vmem [shape: f32[1,128], index: 2, kind: input, shape index: {}]   ;;  %s814_s3 = inlined_call_operand.vmem [shape: f32[1,128], index: 3, kind: input, shape index: {}]   ;;  %s815_s4 = inlined_call_operand.vmem [shape: f32[1,128], index: 4, kind: input, shape index: {}]   ;;  %s816_s5 = inlined_call_operand.vmem [shape: f32[1,128], index: 5, kind: input, shape index: {}]   ;;  %s817_s6 = inlined_call_operand.hbm [shape: f32[128,128], index: 6, kind: output, shape index: {}]  }
   0x1   :  { %13 = vsyncpa [#allocation3 + $0x1], 0  ;;  %s631_s21 = smov 0   ;;  %s633_s22 = smov 0  }
   0x2   :  { %s635_s23 = smov 0   ;;  %s637_s24 = smov 0  }
   0x3 LB: > { %s652_s25 = sadd.s32 4294967295, %s591_s24   ;;  %s471_s26 = sadd.s32 4294967294, %s591_s24   ;;  %s591_s24 = sphi %s637_s24, %s823_s24   ;;  %s587_s23 = sphi %s635_s23, %s822_s23   ;;  %s583_s22 = sphi %s633_s22, %s821_s22   ;;  %s579_s21 = sphi %s631_s21, %s820_s21  }
   0x4   : > { %s656_s27 = sadd.s32 1, %s591_s24   ;;  %s162_s28 = sadd.s32 1, %s587_s23 }
   0x5   : > { %s159_s29 = ssub.s32 %s591_s24, %s656_s27  ;;  %p172_p0 = scmp.ne.s32.totalorder %s587_s23, %s583_s22 }
   0x6   : > { %p160_p1 = scmp.eq.s32.totalorder %s159_s29, 0  ;;  %p173_p2 = scmp.eq.s32.totalorder %s652_s25, 1 }
   0x7   : > { %p178_p3 = scmp.ne.s32.totalorder %s583_s22, %s579_s21  ;;  %p179_p4 = scmp.eq.s32.totalorder %s471_s26, 1 }
   0x8   : > { %s667_s30 = scalar_select %p160_p1, %s587_s23, %s162_s28  }
   0x9   : > { %p669_p5 = por %p173_p2, %p172_p0  ;;  %p673_p6 = por %p179_p4, %p178_p3 }
   0xa   : > { %p474_p7 = scmp.ge.s32.totalorder %s591_s24, 1  ;;  %p227_p8 = scmp.lt.s32.totalorder %s591_s24, 3 }
   0xc   : > { %p228_p9 = pnand %p474_p7, %p227_p8 }
   0xd   : > { %s476_s9 = sshll.u32 (!%p228_p9), %s652_s25, 3  ;;  %s489_s14 = sshll.u32 (!%p228_p9), %s652_s25, 10 }
   0xe   : > { %231 = sbr.rel (%p228_p9) target bundleno = 58 (0x3a), region = 44  ;;  %p263_p10 = scmp.lt.s32.totalorder (!%p228_p9), %s476_s9, 15 }
   0xf   : > { %s593_s19 = smov (!%p228_p9), [#allocation2]  }
  0x13   : > { %s825_s9 = smov (!%p263_p10, %s476_s9), 15  ;;  %v683_v0 = vld [vmem:[%s813_s2] ss:$0 sm:$0xff] }
  0x14   : > { %s477_s10 = sshll.u32 %s825_s9, 3  ;;  %v688_v1 = vld [vmem:[%s815_s4] ss:$0 sm:$0xff] }
  0x15   : > { %s693_s17 = scalar_lea.vmem %s811_s0, %s477_s10  ;;  %s698_s20 = scalar_lea.vmem %s812_s1, %s477_s10  ;;  %v703_v2 = vld [vmem:[%s814_s3] ss:$0 sm:$0xff] }
  0x16   : > { %v708_v3 = vld [vmem:[%s816_s5] ss:$0 sm:$0xff]  ;;  %v276_v6 = vld [vmem:[%s693_s17 + $0x8] sm:$0xff]  ;;  %v277_v11 = vld [vmem:[%s693_s17 + $0x10] sm:$0xff]  ;;  %s259_s10 = sand.u32 1, %s583_s22  }
  0x17   : > { %v275_v4 = vld [vmem:[%s693_s17] sm:$0xff]  ;;  %v291_v9 = vmul.f32 %v683_v0, %v276_v6  ;;  %v322_v10 = vld [vmem:[%s698_s20 + $0x8] sm:$0xff]  ;;  %v323_v12 = vld [vmem:[%s698_s20 + $0x10] sm:$0xff]  ;;  %v292_v14 = vmul.f32 %v683_v0, %v277_v11  ;;  %s475_s11 = sshll.u32 %s259_s10, 6  ;;  %s771_s18 = scalar_lea.sflag [#allocation3], %s259_s10 }
  0x18   : > { %v321_v5 = vld [vmem:[%s698_s20] sm:$0xff]  ;;  %v290_v7 = vmul.f32 %v683_v0, %v275_v4  ;;  %v337_v13 = vmul.f32 %v688_v1, %v322_v10  ;;  %v338_v15 = vmul.f32 %v688_v1, %v323_v12  ;;  %v278_v16 = vld [vmem:[%s693_s17 + $0x18] sm:$0xff]  ;;  %v280_v24 = vld [vmem:[%s693_s17 + $0x28] sm:$0xff]  ;;  %s261_s12 = scalar_lea.vmem [#allocation2], %s475_s11 }
  0x19   : > { %v336_v8 = vmul.f32 %v688_v1, %v321_v5  ;;  %v324_v17 = vld [vmem:[%s698_s20 + $0x18] sm:$0xff]  ;;  %v279_v18 = vld [vmem:[%s693_s17 + $0x20] sm:$0xff]  ;;  %v306_v21 = vadd.f32 %v703_v2, %v291_v9  ;;  %v293_v22 = vmul.f32 %v683_v0, %v278_v16  ;;  %v307_v26 = vadd.f32 %v703_v2, %v292_v14  ;;  %v326_v33 = vld [vmem:[%s698_s20 + $0x28] sm:$0xff]  ;;  %s397_s13 = sshll.u32 %s261_s12, 4  ;;  %s762_s13 = int_to_ptr.vmem [resolvable:$true] %s397_s13 }
  0x1a   : > { %v305_v19 = vadd.f32 %v703_v2, %v290_v7  ;;  %v325_v23 = vld [vmem:[%s698_s20 + $0x20] sm:$0xff]  ;;  %v352_v25 = vadd.f32 %v708_v3, %v337_v13  ;;  %v353_v27 = vadd.f32 %v708_v3, %v338_v15  ;;  %v339_v28 = vmul.f32 %v688_v1, %v324_v17  ;;  %v281_v42 = vld [vmem:[%s693_s17 + $0x30] sm:$0xff]  ;;  %v282_v48 = vld [vmem:[%s693_s17 + $0x38] sm:$0xff]  ;;  %s767_s17 = scalar_lea.hbm %s817_s6, %s489_s14  ;;  %s531_s25 = scalar_lea.vmem %s762_s13, 1024 }
  0x1b   : > { %v351_v20 = vadd.f32 %v708_v3, %v336_v8  ;;  %v314_v30 = vmax.f32 %v306_v21, 0.0  ;;  %v308_v31 = vadd.f32 %v703_v2, %v293_v22  ;;  %v294_v32 = vmul.f32 %v683_v0, %v279_v18  ;;  %v327_v47 = vld [vmem:[%s698_s20 + $0x30] sm:$0xff]  ;;  %v328_v53 = vld [vmem:[%s698_s20 + $0x38] sm:$0xff]  ;;  %p532_p11 = scmp.ne.s32.totalorder %s762_s13, %s531_s25  ;;  %s535_s20 = sshll.u32 %s593_s19, 4  ;;  %s536_s20 = int_to_ptr.vmem [resolvable:$false] %s535_s20 }
  0x1c   : > { %v313_v29 = vmax.f32 %v305_v19, 0.0  ;;  %v315_v34 = vmax.f32 %v307_v26, 0.0  ;;  %v354_v35 = vadd.f32 %v708_v3, %v339_v28  ;;  %v340_v36 = vmul.f32 %v688_v1, %v325_v23  ;;  %s537_s26 = scalar_lea.vmem %s536_s20, 2048  ;;  %p538_p0 = scmp.lt.s32.totalorder %s762_s13, %s536_s20 }
  0x1d   : > { %v295_v37 = vmul.f32 %v683_v0, %v280_v24  ;;  %v360_v39 = vadd.f32 %v352_v25, %v314_v30  ;;  %v316_v40 = vmax.f32 %v308_v31, 0.0  ;;  %v309_v41 = vadd.f32 %v703_v2, %v294_v32  ;;  %p533_p12 = pnand %p532_p11, %p669_p5  ;;  %p539_p1 = scmp.lt.s32.totalorder %s537_s26, %s531_s25 }
  0x1e   : > { %v359_v38 = vadd.f32 %v351_v20, %v313_v29  ;;  %v361_v43 = vadd.f32 %v353_v27, %v315_v34  ;;  %v355_v44 = vadd.f32 %v708_v3, %v340_v36  ;;  %v341_v46 = vmul.f32 %v688_v1, %v326_v33 }
  0x1f   : > { %v310_v45 = vadd.f32 %v703_v2, %v295_v37  ;;  %v368_v50 = vmax.f32 %v360_v39, 0.0  ;;  %v362_v51 = vadd.f32 %v354_v35, %v316_v40  ;;  %v317_v52 = vmax.f32 %v309_v41, 0.0  ;;  %p534_p13 = pneg %p533_p12  ;;  %p540_p2 = por %p539_p1, %p538_p0 }
  0x20   : > { %v367_v49 = vmax.f32 %v359_v38, 0.0  ;;  %v369_v54 = vmax.f32 %v361_v43, 0.0  ;;  %v356_v56 = vadd.f32 %v708_v3, %v341_v46  ;;  %v296_v57 = vmul.f32 %v683_v0, %v281_v42 }
  0x21   : > { %v318_v55 = vmax.f32 %v310_v45, 0.0  ;;  %376 = vst [vmem:[%s261_s12 + $0x8] sm:$0xff] %v368_v50  ;;  %v370_v58 = vmax.f32 %v362_v51, 0.0  ;;  %v363_v59 = vadd.f32 %v355_v44, %v317_v52  ;;  %v342_v60 = vmul.f32 %v688_v1, %v327_v47  ;;  %p541_p3 = pnand %p540_p2, %p534_p13 }
  0x22   : > { %375 = vst [vmem:[%s261_s12] sm:$0xff] %v367_v49  ;;  %v297_v61 = vmul.f32 %v683_v0, %v282_v48  ;;  %377 = vst [vmem:[%s261_s12 + $0x10] sm:$0xff] %v369_v54  ;;  %v311_v63 = vadd.f32 %v703_v2, %v296_v57  ;;  %v343_v4 = vmul.f32 %v688_v1, %v328_v53 }
  0x23   : > { %v364_v62 = vadd.f32 %v356_v56, %v318_v55  ;;  %378 = vst [vmem:[%s261_s12 + $0x18] sm:$0xff] %v370_v58  ;;  %v371_v5 = vmax.f32 %v363_v59, 0.0  ;;  %v357_v6 = vadd.f32 %v708_v3, %v342_v60 }
  0x24   : > { %v312_v7 = vadd.f32 %v703_v2, %v297_v61  ;;  %v319_v9 = vmax.f32 %v311_v63, 0.0  ;;  %v358_v10 = vadd.f32 %v708_v3, %v343_v4 }
  0x25   : > { %v372_v8 = vmax.f32 %v364_v62, 0.0  ;;  %379 = vst [vmem:[%s261_s12 + $0x20] sm:$0xff] %v371_v5 }
  0x26   : > { %v320_v0 = vmax.f32 %v312_v7, 0.0  ;;  %v365_v11 = vadd.f32 %v357_v6, %v319_v9 }
  0x27   : > { %380 = vst [vmem:[%s261_s12 + $0x28] sm:$0xff] %v372_v8 }
  0x28   : > { %v366_v12 = vadd.f32 %v358_v10, %v320_v0  ;;  %v373_v1 = vmax.f32 %v365_v11, 0.0 }
  0x2a   : > { %v374_v2 = vmax.f32 %v366_v12, 0.0  ;;  %381 = vst [vmem:[%s261_s12 + $0x30] sm:$0xff] %v373_v1 }
  0x2c   : > { %382 = vst [vmem:[%s261_s12 + $0x38] sm:$0xff] %v374_v2 }
  0x2d   : > { %544 = shalt.err (!%p541_p3)
}
  0x2e   : > { %s545_s28 = scalar_lea.hbm %s767_s17, 1024  ;;  %s549_s10 = scalar_lea.hbm %s817_s6, 2048 }
  0x2f   : > { %p546_p4 = scmp.ne.s32.totalorder %s767_s17, %s545_s28  ;;  %p550_p9 = scmp.lt.s32.totalorder %s767_s17, %s817_s6 }
  0x30   : > { %p551_p10 = scmp.lt.s32.totalorder %s549_s10, %s545_s28 }
  0x31   : > { %p547_p7 = pnand %p546_p4, %p669_p5 }
  0x32   : > { %p552_p11 = por %p551_p10, %p550_p9 }
  0x33   : > { %p548_p8 = pneg %p547_p7 }
  0x35   : > { %p553_p12 = pnand %p552_p11, %p548_p8 }
  0x37   : > { %556 = shalt.err (!%p553_p12)
}
  0x38   : > { %s594_s14 = smov 128   ;;  %s595_s15 = smov 8  }
  0x39   : > { %490 = dma.vmem_to_hbm [thread:$0]  (%p669_p5), %s762_s13, 1024, %s767_s17, %s771_s18, %s594_s14, %s594_s14, %s595_s15  }
  0x3a PF: > { %p496_p13 = scmp.ge.s32.totalorder %s591_s24, 2  ;;  %s412_s16 = sand.u32 1, %s579_s21  }
  0x3b   : > { %s413_s25 = scalar_lea.sflag [#allocation3], %s412_s16 }
  0x3c   : > { %p493_p0 = pnand %p496_p13, %p673_p6 }
  0x3e   : > { %p494_p1 = pneg %p493_p0 }
  0x40   : > { %574 = dma.done.wait (%p494_p1), %s413_s25, 1024  }
  0x41   : > { %576 = vsyncadd (%p494_p1), %s413_s25, 4294966272  ;;  %p16_p2 = scmp.ge.s32.totalorder %s656_s27, 4   ;;  %s820_s21 = smov %s583_s22 }
  0x42   : > { %s821_s22 = smov %s587_s23  ;;  %s822_s23 = smov %s667_s30 }
  0x43   : > { %s823_s24 = smov %s656_s27  ;;  %18 = sbr.rel (!%p16_p2) target bundleno = 3 (0x3), region = 82 }
  0x48   :  { %418 = vsyncpa [#allocation3], 1 }
  0x49   :  { %420 = vsyncpa [#allocation3 + $0x1], 1 }

</bundles_post_ra>
